<compile_context>
chip_gen: v7x
topology: tpu7x:2x2x1
jax: 0.10.0
libtpu: 0.0.40
codegen_flags: <defaults>
</compile_context>

<pallas_src>
import functools

import jax
import jax.numpy as jnp
from jax.experimental import pallas as pl
from jax.experimental.pallas import tpu as pltpu

COMPUTE_DTYPE = jnp.bfloat16  # activations & weights fed to the MXU


# -----------------------------------------------------------------------------
# Pallas kernel: one (i, j, k) grid step of  o = x @ w (+ b)
# -----------------------------------------------------------------------------
def _linear_kernel(*refs, has_bias):
    if has_bias:
        x_ref, w_ref, b_ref, o_ref, acc_ref = refs
    else:
        x_ref, w_ref, o_ref, acc_ref = refs
        b_ref = None

    k = pl.program_id(2)

    @pl.when(k == 0)
    def _init():
        acc_ref[...] = jnp.zeros_like(acc_ref)

    acc_ref[...] += jnp.dot(
        x_ref[...], w_ref[...], preferred_element_type=jnp.float32
    )

    @pl.when(k == pl.num_programs(2) - 1)
    def _store():
        acc = acc_ref[...]
        if b_ref is not None:
            acc = acc + b_ref[...].astype(jnp.float32)
        o_ref[...] = acc.astype(o_ref.dtype)


def _pick_tile(dim, pref):
    """Largest tile <= pref that evenly divides dim (falls back to full dim)."""
    if dim <= pref:
        return dim
    t = pref
    while t >= 8 and dim % t:
        t //= 2
    return t if (t >= 8 and dim % t == 0) else dim


def pallas_linear(x, w, b=None, *, tm=128, tn=256, tk=256, out_dtype=None):
    """y = x @ w (+ b).  x: [M, K], w: [K, N], b: [1, N] or None."""
    M, K = x.shape
    Kw, N = w.shape
    assert K == Kw, (K, Kw)
    out_dtype = out_dtype or x.dtype

    tm = _pick_tile(M, tm)
    tn = _pick_tile(N, tn)
    tk = _pick_tile(K, tk)
    grid = (M // tm, N // tn, K // tk)

    in_specs = [
        pl.BlockSpec((tm, tk), lambda i, j, k: (i, k)),
        pl.BlockSpec((tk, tn), lambda i, j, k: (k, j)),
    ]
    args = [x, w]
    if b is not None:
        in_specs.append(pl.BlockSpec((1, tn), lambda i, j, k: (0, j)))
        args.append(b)

    return pl.pallas_call(
        functools.partial(_linear_kernel, has_bias=b is not None),
        out_shape=jax.ShapeDtypeStruct((M, N), out_dtype),
        grid_spec=pltpu.PrefetchScalarGridSpec(
            num_scalar_prefetch=0,
            grid=grid,
            in_specs=in_specs,
            out_specs=pl.BlockSpec((tm, tn), lambda i, j, k: (i, j)),
            scratch_shapes=[pltpu.VMEM((tm, tn), jnp.float32)],
        ),
        compiler_params=pltpu.CompilerParams(
            dimension_semantics=("parallel", "parallel", "arbitrary"),
            vmem_limit_bytes=48 << 20,
        ),
    )(*args)


# -----------------------------------------------------------------------------
# Parameters (synthetic, deterministic) — mirrors NoLeafModule's layer stack.
# -----------------------------------------------------------------------------
_LAYER_SPECS = [
    # (in_features, out_features, has_bias) in forward order
    (1024, 2048, True),    # proj1
    (2048, 2048, False),   # F.linear(x, weight1)
    (2048, 512, True),     # proj1_2
    (512, 2048, True),     # proj2
    (2048, 2048, False),   # F.linear(x, weight2)
    (2048, 1024, True),    # proj2_2
    (1024, 1024, True),    # proj3
    (1024, 1024, False),   # F.linear(x, weight3)
    (1024, 512, True),     # proj3_2
]


def init_params(key):
    """Weights stored in [in, out] layout (PyTorch's [out, in].T), transposed
    once here so no `.T` ever runs inside the jitted forward."""
    params = []
    keys = jax.random.split(key, 2 * len(_LAYER_SPECS))
    for idx, (fan_in, fan_out, has_bias) in enumerate(_LAYER_SPECS):
        kw, kb = keys[2 * idx], keys[2 * idx + 1]
        scale = 1.0 / (fan_in ** 0.5)
        w = (scale * jax.random.normal(kw, (fan_in, fan_out), jnp.float32)
             ).astype(COMPUTE_DTYPE)
        b = None
        if has_bias:
            b = (scale * jax.random.normal(kb, (1, fan_out), jnp.float32)
                 ).astype(COMPUTE_DTYPE)
        params.append((w, b))
    return params


# -----------------------------------------------------------------------------
# Forward pass
# -----------------------------------------------------------------------------
def no_leaf_forward(params, x):
    lead = x.shape[:-1]
    h = x.reshape(-1, x.shape[-1]).astype(COMPUTE_DTYPE)
    for w, b in params:
        h = pallas_linear(h, w, b)
    return h.reshape(*lead, h.shape[-1])


def no_leaf_reference(params, x):
    """Pure-JAX reference with the same bf16-in / f32-accumulate policy."""
    lead = x.shape[:-1]
    h = x.reshape(-1, x.shape[-1]).astype(COMPUTE_DTYPE)
    for w, b in params:
        y = jnp.dot(h, w, preferred_element_type=jnp.float32)
        if b is not None:
            y = y + b.astype(jnp.float32)
        h = y.astype(COMPUTE_DTYPE)
    return h.reshape(*lead, h.shape[-1])


# -----------------------------------------------------------------------------
if __name__ == "__main__":
    B, S, D_IN = 2, 8, 1024          # module's input feature dim is fixed at 1024
    key = jax.random.PRNGKey(0)
    k_par, k_x = jax.random.split(key)

    params = init_params(k_par)
    x = jax.random.normal(k_x, (B, S, D_IN), dtype=jnp.float32)

    fwd = jax.jit(no_leaf_forward)
    out = fwd(params, x)
    jax.block_until_ready(out)

    assert out.shape == (B, S, 512), out.shape
    out_f32 = out.astype(jnp.float32)
    assert bool(jnp.all(jnp.isfinite(out_f32)))

    ref_f32 = no_leaf_reference(params, x).astype(jnp.float32)
    assert bool(jnp.allclose(out_f32, ref_f32, atol=1e-1, rtol=1e-1)), (
        float(jnp.max(jnp.abs(out_f32 - ref_f32))))

    print("KERNEL_OK")
</pallas_src>

<mosaic_0001>
module attributes {stable_mosaic.version = 11 : i64} {
  func.func @_linear_kernel(%arg0: i32, %arg1: i32, %arg2: i32, %arg3: memref<16x256xbf16, #tpu.memory_space<vmem>>, %arg4: memref<256x256xbf16, #tpu.memory_space<vmem>>, %arg5: memref<1x256xbf16, #tpu.memory_space<vmem>>, %arg6: memref<16x256xbf16, #tpu.memory_space<vmem>>, %arg7: memref<16x256xf32, #tpu.memory_space<vmem>>) attributes {dimension_semantics = [#tpu.dimension_semantics<parallel>, #tpu.dimension_semantics<parallel>, #tpu.dimension_semantics<arbitrary>], iteration_bounds = array<i64: 1, 2, 8>, scalar_prefetch = 0 : i64, scratch_operands = 1 : i64, tpu.core_type = #tpu.core_type<tc>, window_params = [{transform_indices = @transform_0, window_bounds = array<i64: 16, 256>}, {transform_indices = @transform_1, window_bounds = array<i64: 256, 256>}, {transform_indices = @transform_2, window_bounds = array<i64: 1, 256>}, {transform_indices = @transform_3, window_bounds = array<i64: 16, 256>}]} {
    %c0_i32 = arith.constant 0 : i32
    %0 = arith.cmpi eq, %arg2, %c0_i32 : i32
    %1 = arith.extui %0 : i1 to i32
    %c0_i32_0 = arith.constant 0 : i32
    %2 = arith.cmpi ne, %1, %c0_i32_0 : i32
    scf.if %2 {
      %cst_9 = arith.constant 0.000000e+00 : f32
      %12 = vector.broadcast %cst_9 : f32 to vector<16x256xf32>
      %c0_10 = arith.constant 0 : index
      %c0_11 = arith.constant 0 : index
      %13 = vector.load %arg7[%c0_10, %c0_11] : memref<16x256xf32, #tpu.memory_space<vmem>>, vector<16x256xf32>
      tpu.vector_store %arg7[%c0_10, %c0_11], %12 {strides = array<i32>} : memref<16x256xf32, #tpu.memory_space<vmem>>, vector<16x256xf32>,
    } else {
    }
    %c0 = arith.constant 0 : index
    %c0_1 = arith.constant 0 : index
    %3 = vector.load %arg7[%c0, %c0_1] : memref<16x256xf32, #tpu.memory_space<vmem>>, vector<16x256xf32>
    %c0_2 = arith.constant 0 : index
    %c0_3 = arith.constant 0 : index
    %4 = vector.load %arg3[%c0_2, %c0_3] : memref<16x256xbf16, #tpu.memory_space<vmem>>, vector<16x256xbf16>
    %c0_4 = arith.constant 0 : index
    %c0_5 = arith.constant 0 : index
    %5 = vector.load %arg4[%c0_4, %c0_5] : memref<256x256xbf16, #tpu.memory_space<vmem>>, vector<256x256xbf16>
    %cst = arith.constant dense<0.000000e+00> : vector<16x256xf32>
    %6 = tpu.matmul %4, %5, %cst {dimension_numbers = #tpu.dot_dimension_numbers<[1], [0], [0], [1], [0, 0, 1, 1], [], []>} : vector<16x256xbf16>, vector<256x256xbf16>, vector<16x256xf32> -> vector<16x256xf32>
    %7 = arith.addf %3, %6 : vector<16x256xf32>
    %c0_6 = arith.constant 0 : index
    %c0_7 = arith.constant 0 : index
    %8 = vector.load %arg7[%c0_6, %c0_7] : memref<16x256xf32, #tpu.memory_space<vmem>>, vector<16x256xf32>
    tpu.vector_store %arg7[%c0_6, %c0_7], %7 {strides = array<i32>} : memref<16x256xf32, #tpu.memory_space<vmem>>, vector<16x256xf32>,
    %c7_i32 = arith.constant 7 : i32
    %9 = arith.cmpi eq, %arg2, %c7_i32 : i32
    %10 = arith.extui %9 : i1 to i32
    %c0_i32_8 = arith.constant 0 : i32
    %11 = arith.cmpi ne, %10, %c0_i32_8 : i32
    scf.if %11 {
      %c0_9 = arith.constant 0 : index
      %c0_10 = arith.constant 0 : index
      %12 = vector.load %arg7[%c0_9, %c0_10] : memref<16x256xf32, #tpu.memory_space<vmem>>, vector<16x256xf32>
      %c0_11 = arith.constant 0 : index
      %c0_12 = arith.constant 0 : index
      %13 = vector.load %arg5[%c0_11, %c0_12] : memref<1x256xbf16, #tpu.memory_space<vmem>>, vector<1x256xbf16>
      %14 = arith.extf %13 : vector<1x256xbf16> to vector<1x256xf32>
      %15 = vector.broadcast %14 : vector<1x256xf32> to vector<16x256xf32>
      %16 = arith.addf %12, %15 : vector<16x256xf32>
      %17 = arith.truncf %16 : vector<16x256xf32> to vector<16x256xbf16>
      %c0_13 = arith.constant 0 : index
      %c0_14 = arith.constant 0 : index
      %18 = vector.load %arg6[%c0_13, %c0_14] : memref<16x256xbf16, #tpu.memory_space<vmem>>, vector<16x256xbf16>
      tpu.vector_store %arg6[%c0_13, %c0_14], %17 {strides = array<i32>} : memref<16x256xbf16, #tpu.memory_space<vmem>>, vector<16x256xbf16>,
    } else {
    }
    return
  }
  func.func @transform_0(%arg0: i32, %arg1: i32, %arg2: i32) -> (i32, i32) {
    %c0_i32 = arith.constant 0 : i32
    return %arg0, %arg2 : i32, i32
  }
  func.func @transform_1(%arg0: i32, %arg1: i32, %arg2: i32) -> (i32, i32) {
    %c0_i32 = arith.constant 0 : i32
    return %arg2, %arg1 : i32, i32
  }
  func.func @transform_2(%arg0: i32, %arg1: i32, %arg2: i32) -> (i32, i32) {
    %c0_i32 = arith.constant 0 : i32
    %c0_i32_0 = arith.constant 0 : i32
    return %c0_i32, %arg1 : i32, i32
  }
  func.func @transform_3(%arg0: i32, %arg1: i32, %arg2: i32) -> (i32, i32) {
    %c0_i32 = arith.constant 0 : i32
    return %arg0, %arg1 : i32, i32
  }
}

module attributes {stable_mosaic.version = 11 : i64} {
  func.func @_linear_kernel(%arg0: i32, %arg1: i32, %arg2: i32, %arg3: memref<16x256xbf16, #tpu.memory_space<vmem>>, %arg4: memref<256x256xbf16, #tpu.memory_space<vmem>>, %arg5: memref<16x256xbf16, #tpu.memory_space<vmem>>, %arg6: memref<16x256xf32, #tpu.memory_space<vmem>>) attributes {dimension_semantics = [#tpu.dimension_semantics<parallel>, #tpu.dimension_semantics<parallel>, #tpu.dimension_semantics<arbitrary>], iteration_bounds = array<i64: 1, 8, 8>, scalar_prefetch = 0 : i64, scratch_operands = 1 : i64, tpu.core_type = #tpu.core_type<tc>, window_params = [{transform_indices = @transform_0, window_bounds = array<i64: 16, 256>}, {transform_indices = @transform_1, window_bounds = array<i64: 256, 256>}, {transform_indices = @transform_2, window_bounds = array<i64: 16, 256>}]} {
    %c0_i32 = arith.constant 0 : i32
    %0 = arith.cmpi eq, %arg2, %c0_i32 : i32
    %1 = arith.extui %0 : i1 to i32
    %c0_i32_0 = arith.constant 0 : i32
    %2 = arith.cmpi ne, %1, %c0_i32_0 : i32
    scf.if %2 {
      %cst_9 = arith.constant 0.000000e+00 : f32
      %12 = vector.broadcast %cst_9 : f32 to vector<16x256xf32>
      %c0_10 = arith.constant 0 : index
      %c0_11 = arith.constant 0 : index
      %13 = vector.load %arg6[%c0_10, %c0_11] : memref<16x256xf32, #tpu.memory_space<vmem>>, vector<16x256xf32>
      tpu.vector_store %arg6[%c0_10, %c0_11], %12 {strides = array<i32>} : memref<16x256xf32, #tpu.memory_space<vmem>>, vector<16x256xf32>,
    } else {
    }
    %c0 = arith.constant 0 : index
    %c0_1 = arith.constant 0 : index
    %3 = vector.load %arg6[%c0, %c0_1] : memref<16x256xf32, #tpu.memory_space<vmem>>, vector<16x256xf32>
    %c0_2 = arith.constant 0 : index
    %c0_3 = arith.constant 0 : index
    %4 = vector.load %arg3[%c0_2, %c0_3] : memref<16x256xbf16, #tpu.memory_space<vmem>>, vector<16x256xbf16>
    %c0_4 = arith.constant 0 : index
    %c0_5 = arith.constant 0 : index
    %5 = vector.load %arg4[%c0_4, %c0_5] : memref<256x256xbf16, #tpu.memory_space<vmem>>, vector<256x256xbf16>
    %cst = arith.constant dense<0.000000e+00> : vector<16x256xf32>
    %6 = tpu.matmul %4, %5, %cst {dimension_numbers = #tpu.dot_dimension_numbers<[1], [0], [0], [1], [0, 0, 1, 1], [], []>} : vector<16x256xbf16>, vector<256x256xbf16>, vector<16x256xf32> -> vector<16x256xf32>
    %7 = arith.addf %3, %6 : vector<16x256xf32>
    %c0_6 = arith.constant 0 : index
    %c0_7 = arith.constant 0 : index
    %8 = vector.load %arg6[%c0_6, %c0_7] : memref<16x256xf32, #tpu.memory_space<vmem>>, vector<16x256xf32>
    tpu.vector_store %arg6[%c0_6, %c0_7], %7 {strides = array<i32>} : memref<16x256xf32, #tpu.memory_space<vmem>>, vector<16x256xf32>,
    %c7_i32 = arith.constant 7 : i32
    %9 = arith.cmpi eq, %arg2, %c7_i32 : i32
    %10 = arith.extui %9 : i1 to i32
    %c0_i32_8 = arith.constant 0 : i32
    %11 = arith.cmpi ne, %10, %c0_i32_8 : i32
    scf.if %11 {
      %c0_9 = arith.constant 0 : index
      %c0_10 = arith.constant 0 : index
      %12 = vector.load %arg6[%c0_9, %c0_10] : memref<16x256xf32, #tpu.memory_space<vmem>>, vector<16x256xf32>
      %13 = arith.truncf %12 : vector<16x256xf32> to vector<16x256xbf16>
      %c0_11 = arith.constant 0 : index
      %c0_12 = arith.constant 0 : index
      %14 = vector.load %arg5[%c0_11, %c0_12] : memref<16x256xbf16, #tpu.memory_space<vmem>>, vector<16x256xbf16>
      tpu.vector_store %arg5[%c0_11, %c0_12], %13 {strides = array<i32>} : memref<16x256xbf16, #tpu.memory_space<vmem>>, vector<16x256xbf16>,
    } else {
    }
    return
  }
  func.func @transform_0(%arg0: i32, %arg1: i32, %arg2: i32) -> (i32, i32) {
    %c0_i32 = arith.constant 0 : i32
    return %arg0, %arg2 : i32, i32
  }
  func.func @transform_1(%arg0: i32, %arg1: i32, %arg2: i32) -> (i32, i32) {
    %c0_i32 = arith.constant 0 : i32
    return %arg2, %arg1 : i32, i32
  }
  func.func @transform_2(%arg0: i32, %arg1: i32, %arg2: i32) -> (i32, i32) {
    %c0_i32 = arith.constant 0 : i32
    return %arg0, %arg1 : i32, i32
  }
}

module attributes {stable_mosaic.version = 11 : i64} {
  func.func @_linear_kernel(%arg0: i32, %arg1: i32, %arg2: i32, %arg3: memref<16x256xbf16, #tpu.memory_space<vmem>>, %arg4: memref<256x256xbf16, #tpu.memory_space<vmem>>, %arg5: memref<1x256xbf16, #tpu.memory_space<vmem>>, %arg6: memref<16x256xbf16, #tpu.memory_space<vmem>>, %arg7: memref<16x256xf32, #tpu.memory_space<vmem>>) attributes {dimension_semantics = [#tpu.dimension_semantics<parallel>, #tpu.dimension_semantics<parallel>, #tpu.dimension_semantics<arbitrary>], iteration_bounds = array<i64: 1, 8, 4>, scalar_prefetch = 0 : i64, scratch_operands = 1 : i64, tpu.core_type = #tpu.core_type<tc>, window_params = [{transform_indices = @transform_0, window_bounds = array<i64: 16, 256>}, {transform_indices = @transform_1, window_bounds = array<i64: 256, 256>}, {transform_indices = @transform_2, window_bounds = array<i64: 1, 256>}, {transform_indices = @transform_3, window_bounds = array<i64: 16, 256>}]} {
    %c0_i32 = arith.constant 0 : i32
    %0 = arith.cmpi eq, %arg2, %c0_i32 : i32
    %1 = arith.extui %0 : i1 to i32
    %c0_i32_0 = arith.constant 0 : i32
    %2 = arith.cmpi ne, %1, %c0_i32_0 : i32
    scf.if %2 {
      %cst_9 = arith.constant 0.000000e+00 : f32
      %12 = vector.broadcast %cst_9 : f32 to vector<16x256xf32>
      %c0_10 = arith.constant 0 : index
      %c0_11 = arith.constant 0 : index
      %13 = vector.load %arg7[%c0_10, %c0_11] : memref<16x256xf32, #tpu.memory_space<vmem>>, vector<16x256xf32>
      tpu.vector_store %arg7[%c0_10, %c0_11], %12 {strides = array<i32>} : memref<16x256xf32, #tpu.memory_space<vmem>>, vector<16x256xf32>,
    } else {
    }
    %c0 = arith.constant 0 : index
    %c0_1 = arith.constant 0 : index
    %3 = vector.load %arg7[%c0, %c0_1] : memref<16x256xf32, #tpu.memory_space<vmem>>, vector<16x256xf32>
    %c0_2 = arith.constant 0 : index
    %c0_3 = arith.constant 0 : index
    %4 = vector.load %arg3[%c0_2, %c0_3] : memref<16x256xbf16, #tpu.memory_space<vmem>>, vector<16x256xbf16>
    %c0_4 = arith.constant 0 : index
    %c0_5 = arith.constant 0 : index
    %5 = vector.load %arg4[%c0_4, %c0_5] : memref<256x256xbf16, #tpu.memory_space<vmem>>, vector<256x256xbf16>
    %cst = arith.constant dense<0.000000e+00> : vector<16x256xf32>
    %6 = tpu.matmul %4, %5, %cst {dimension_numbers = #tpu.dot_dimension_numbers<[1], [0], [0], [1], [0, 0, 1, 1], [], []>} : vector<16x256xbf16>, vector<256x256xbf16>, vector<16x256xf32> -> vector<16x256xf32>
    %7 = arith.addf %3, %6 : vector<16x256xf32>
    %c0_6 = arith.constant 0 : index
    %c0_7 = arith.constant 0 : index
    %8 = vector.load %arg7[%c0_6, %c0_7] : memref<16x256xf32, #tpu.memory_space<vmem>>, vector<16x256xf32>
    tpu.vector_store %arg7[%c0_6, %c0_7], %7 {strides = array<i32>} : memref<16x256xf32, #tpu.memory_space<vmem>>, vector<16x256xf32>,
    %c3_i32 = arith.constant 3 : i32
    %9 = arith.cmpi eq, %arg2, %c3_i32 : i32
    %10 = arith.extui %9 : i1 to i32
    %c0_i32_8 = arith.constant 0 : i32
    %11 = arith.cmpi ne, %10, %c0_i32_8 : i32
    scf.if %11 {
      %c0_9 = arith.constant 0 : index
      %c0_10 = arith.constant 0 : index
      %12 = vector.load %arg7[%c0_9, %c0_10] : memref<16x256xf32, #tpu.memory_space<vmem>>, vector<16x256xf32>
      %c0_11 = arith.constant 0 : index
      %c0_12 = arith.constant 0 : index
      %13 = vector.load %arg5[%c0_11, %c0_12] : memref<1x256xbf16, #tpu.memory_space<vmem>>, vector<1x256xbf16>
      %14 = arith.extf %13 : vector<1x256xbf16> to vector<1x256xf32>
      %15 = vector.broadcast %14 : vector<1x256xf32> to vector<16x256xf32>
      %16 = arith.addf %12, %15 : vector<16x256xf32>
      %17 = arith.truncf %16 : vector<16x256xf32> to vector<16x256xbf16>
      %c0_13 = arith.constant 0 : index
      %c0_14 = arith.constant 0 : index
      %18 = vector.load %arg6[%c0_13, %c0_14] : memref<16x256xbf16, #tpu.memory_space<vmem>>, vector<16x256xbf16>
      tpu.vector_store %arg6[%c0_13, %c0_14], %17 {strides = array<i32>} : memref<16x256xbf16, #tpu.memory_space<vmem>>, vector<16x256xbf16>,
    } else {
    }
    return
  }
  func.func @transform_0(%arg0: i32, %arg1: i32, %arg2: i32) -> (i32, i32) {
    %c0_i32 = arith.constant 0 : i32
    return %arg0, %arg2 : i32, i32
  }
  func.func @transform_1(%arg0: i32, %arg1: i32, %arg2: i32) -> (i32, i32) {
    %c0_i32 = arith.constant 0 : i32
    return %arg2, %arg1 : i32, i32
  }
  func.func @transform_2(%arg0: i32, %arg1: i32, %arg2: i32) -> (i32, i32) {
    %c0_i32 = arith.constant 0 : i32
    %c0_i32_0 = arith.constant 0 : i32
    return %c0_i32, %arg1 : i32, i32
  }
  func.func @transform_3(%arg0: i32, %arg1: i32, %arg2: i32) -> (i32, i32) {
    %c0_i32 = arith.constant 0 : i32
    return %arg0, %arg1 : i32, i32
  }
}

module attributes {stable_mosaic.version = 11 : i64} {
  func.func @_linear_kernel(%arg0: i32, %arg1: i32, %arg2: i32, %arg3: memref<16x256xbf16, #tpu.memory_space<vmem>>, %arg4: memref<256x256xbf16, #tpu.memory_space<vmem>>, %arg5: memref<1x256xbf16, #tpu.memory_space<vmem>>, %arg6: memref<16x256xbf16, #tpu.memory_space<vmem>>, %arg7: memref<16x256xf32, #tpu.memory_space<vmem>>) attributes {dimension_semantics = [#tpu.dimension_semantics<parallel>, #tpu.dimension_semantics<parallel>, #tpu.dimension_semantics<arbitrary>], iteration_bounds = array<i64: 1, 8, 2>, scalar_prefetch = 0 : i64, scratch_operands = 1 : i64, tpu.core_type = #tpu.core_type<tc>, window_params = [{transform_indices = @transform_0, window_bounds = array<i64: 16, 256>}, {transform_indices = @transform_1, window_bounds = array<i64: 256, 256>}, {transform_indices = @transform_2, window_bounds = array<i64: 1, 256>}, {transform_indices = @transform_3, window_bounds = array<i64: 16, 256>}]} {
    %c0_i32 = arith.constant 0 : i32
    %0 = arith.cmpi eq, %arg2, %c0_i32 : i32
    %1 = arith.extui %0 : i1 to i32
    %c0_i32_0 = arith.constant 0 : i32
    %2 = arith.cmpi ne, %1, %c0_i32_0 : i32
    scf.if %2 {
      %cst_9 = arith.constant 0.000000e+00 : f32
      %12 = vector.broadcast %cst_9 : f32 to vector<16x256xf32>
      %c0_10 = arith.constant 0 : index
      %c0_11 = arith.constant 0 : index
      %13 = vector.load %arg7[%c0_10, %c0_11] : memref<16x256xf32, #tpu.memory_space<vmem>>, vector<16x256xf32>
      tpu.vector_store %arg7[%c0_10, %c0_11], %12 {strides = array<i32>} : memref<16x256xf32, #tpu.memory_space<vmem>>, vector<16x256xf32>,
    } else {
    }
    %c0 = arith.constant 0 : index
    %c0_1 = arith.constant 0 : index
    %3 = vector.load %arg7[%c0, %c0_1] : memref<16x256xf32, #tpu.memory_space<vmem>>, vector<16x256xf32>
    %c0_2 = arith.constant 0 : index
    %c0_3 = arith.constant 0 : index
    %4 = vector.load %arg3[%c0_2, %c0_3] : memref<16x256xbf16, #tpu.memory_space<vmem>>, vector<16x256xbf16>
    %c0_4 = arith.constant 0 : index
    %c0_5 = arith.constant 0 : index
    %5 = vector.load %arg4[%c0_4, %c0_5] : memref<256x256xbf16, #tpu.memory_space<vmem>>, vector<256x256xbf16>
    %cst = arith.constant dense<0.000000e+00> : vector<16x256xf32>
    %6 = tpu.matmul %4, %5, %cst {dimension_numbers = #tpu.dot_dimension_numbers<[1], [0], [0], [1], [0, 0, 1, 1], [], []>} : vector<16x256xbf16>, vector<256x256xbf16>, vector<16x256xf32> -> vector<16x256xf32>
    %7 = arith.addf %3, %6 : vector<16x256xf32>
    %c0_6 = arith.constant 0 : index
    %c0_7 = arith.constant 0 : index
    %8 = vector.load %arg7[%c0_6, %c0_7] : memref<16x256xf32, #tpu.memory_space<vmem>>, vector<16x256xf32>
    tpu.vector_store %arg7[%c0_6, %c0_7], %7 {strides = array<i32>} : memref<16x256xf32, #tpu.memory_space<vmem>>, vector<16x256xf32>,
    %c1_i32 = arith.constant 1 : i32
    %9 = arith.cmpi eq, %arg2, %c1_i32 : i32
    %10 = arith.extui %9 : i1 to i32
    %c0_i32_8 = arith.constant 0 : i32
    %11 = arith.cmpi ne, %10, %c0_i32_8 : i32
    scf.if %11 {
      %c0_9 = arith.constant 0 : index
      %c0_10 = arith.constant 0 : index
      %12 = vector.load %arg7[%c0_9, %c0_10] : memref<16x256xf32, #tpu.memory_space<vmem>>, vector<16x256xf32>
      %c0_11 = arith.constant 0 : index
      %c0_12 = arith.constant 0 : index
      %13 = vector.load %arg5[%c0_11, %c0_12] : memref<1x256xbf16, #tpu.memory_space<vmem>>, vector<1x256xbf16>
      %14 = arith.extf %13 : vector<1x256xbf16> to vector<1x256xf32>
      %15 = vector.broadcast %14 : vector<1x256xf32> to vector<16x256xf32>
      %16 = arith.addf %12, %15 : vector<16x256xf32>
      %17 = arith.truncf %16 : vector<16x256xf32> to vector<16x256xbf16>
      %c0_13 = arith.constant 0 : index
      %c0_14 = arith.constant 0 : index
      %18 = vector.load %arg6[%c0_13, %c0_14] : memref<16x256xbf16, #tpu.memory_space<vmem>>, vector<16x256xbf16>
      tpu.vector_store %arg6[%c0_13, %c0_14], %17 {strides = array<i32>} : memref<16x256xbf16, #tpu.memory_space<vmem>>, vector<16x256xbf16>,
    } else {
    }
    return
  }
  func.func @transform_0(%arg0: i32, %arg1: i32, %arg2: i32) -> (i32, i32) {
    %c0_i32 = arith.constant 0 : i32
    return %arg0, %arg2 : i32, i32
  }
  func.func @transform_1(%arg0: i32, %arg1: i32, %arg2: i32) -> (i32, i32) {
    %c0_i32 = arith.constant 0 : i32
    return %arg2, %arg1 : i32, i32
  }
  func.func @transform_2(%arg0: i32, %arg1: i32, %arg2: i32) -> (i32, i32) {
    %c0_i32 = arith.constant 0 : i32
    %c0_i32_0 = arith.constant 0 : i32
    return %c0_i32, %arg1 : i32, i32
  }
  func.func @transform_3(%arg0: i32, %arg1: i32, %arg2: i32) -> (i32, i32) {
    %c0_i32 = arith.constant 0 : i32
    return %arg0, %arg1 : i32, i32
  }
}

module attributes {stable_mosaic.version = 11 : i64} {
  func.func @_linear_kernel(%arg0: i32, %arg1: i32, %arg2: i32, %arg3: memref<16x256xbf16, #tpu.memory_space<vmem>>, %arg4: memref<256x256xbf16, #tpu.memory_space<vmem>>, %arg5: memref<16x256xbf16, #tpu.memory_space<vmem>>, %arg6: memref<16x256xf32, #tpu.memory_space<vmem>>) attributes {dimension_semantics = [#tpu.dimension_semantics<parallel>, #tpu.dimension_semantics<parallel>, #tpu.dimension_semantics<arbitrary>], iteration_bounds = array<i64: 1, 8, 8>, scalar_prefetch = 0 : i64, scratch_operands = 1 : i64, tpu.core_type = #tpu.core_type<tc>, window_params = [{transform_indices = @transform_0, window_bounds = array<i64: 16, 256>}, {transform_indices = @transform_1, window_bounds = array<i64: 256, 256>}, {transform_indices = @transform_2, window_bounds = array<i64: 16, 256>}]} {
    %c0_i32 = arith.constant 0 : i32
    %0 = arith.cmpi eq, %arg2, %c0_i32 : i32
    %1 = arith.extui %0 : i1 to i32
    %c0_i32_0 = arith.constant 0 : i32
    %2 = arith.cmpi ne, %1, %c0_i32_0 : i32
    scf.if %2 {
      %cst_9 = arith.constant 0.000000e+00 : f32
      %12 = vector.broadcast %cst_9 : f32 to vector<16x256xf32>
      %c0_10 = arith.constant 0 : index
      %c0_11 = arith.constant 0 : index
      %13 = vector.load %arg6[%c0_10, %c0_11] : memref<16x256xf32, #tpu.memory_space<vmem>>, vector<16x256xf32>
      tpu.vector_store %arg6[%c0_10, %c0_11], %12 {strides = array<i32>} : memref<16x256xf32, #tpu.memory_space<vmem>>, vector<16x256xf32>,
    } else {
    }
    %c0 = arith.constant 0 : index
    %c0_1 = arith.constant 0 : index
    %3 = vector.load %arg6[%c0, %c0_1] : memref<16x256xf32, #tpu.memory_space<vmem>>, vector<16x256xf32>
    %c0_2 = arith.constant 0 : index
    %c0_3 = arith.constant 0 : index
    %4 = vector.load %arg3[%c0_2, %c0_3] : memref<16x256xbf16, #tpu.memory_space<vmem>>, vector<16x256xbf16>
    %c0_4 = arith.constant 0 : index
    %c0_5 = arith.constant 0 : index
    %5 = vector.load %arg4[%c0_4, %c0_5] : memref<256x256xbf16, #tpu.memory_space<vmem>>, vector<256x256xbf16>
    %cst = arith.constant dense<0.000000e+00> : vector<16x256xf32>
    %6 = tpu.matmul %4, %5, %cst {dimension_numbers = #tpu.dot_dimension_numbers<[1], [0], [0], [1], [0, 0, 1, 1], [], []>} : vector<16x256xbf16>, vector<256x256xbf16>, vector<16x256xf32> -> vector<16x256xf32>
    %7 = arith.addf %3, %6 : vector<16x256xf32>
    %c0_6 = arith.constant 0 : index
    %c0_7 = arith.constant 0 : index
    %8 = vector.load %arg6[%c0_6, %c0_7] : memref<16x256xf32, #tpu.memory_space<vmem>>, vector<16x256xf32>
    tpu.vector_store %arg6[%c0_6, %c0_7], %7 {strides = array<i32>} : memref<16x256xf32, #tpu.memory_space<vmem>>, vector<16x256xf32>,
    %c7_i32 = arith.constant 7 : i32
    %9 = arith.cmpi eq, %arg2, %c7_i32 : i32
    %10 = arith.extui %9 : i1 to i32
    %c0_i32_8 = arith.constant 0 : i32
    %11 = arith.cmpi ne, %10, %c0_i32_8 : i32
    scf.if %11 {
      %c0_9 = arith.constant 0 : index
      %c0_10 = arith.constant 0 : index
      %12 = vector.load %arg6[%c0_9, %c0_10] : memref<16x256xf32, #tpu.memory_space<vmem>>, vector<16x256xf32>
      %13 = arith.truncf %12 : vector<16x256xf32> to vector<16x256xbf16>
      %c0_11 = arith.constant 0 : index
      %c0_12 = arith.constant 0 : index
      %14 = vector.load %arg5[%c0_11, %c0_12] : memref<16x256xbf16, #tpu.memory_space<vmem>>, vector<16x256xbf16>
      tpu.vector_store %arg5[%c0_11, %c0_12], %13 {strides = array<i32>} : memref<16x256xbf16, #tpu.memory_space<vmem>>, vector<16x256xbf16>,
    } else {
    }
    return
  }
  func.func @transform_0(%arg0: i32, %arg1: i32, %arg2: i32) -> (i32, i32) {
    %c0_i32 = arith.constant 0 : i32
    return %arg0, %arg2 : i32, i32
  }
  func.func @transform_1(%arg0: i32, %arg1: i32, %arg2: i32) -> (i32, i32) {
    %c0_i32 = arith.constant 0 : i32
    return %arg2, %arg1 : i32, i32
  }
  func.func @transform_2(%arg0: i32, %arg1: i32, %arg2: i32) -> (i32, i32) {
    %c0_i32 = arith.constant 0 : i32
    return %arg0, %arg1 : i32, i32
  }
}

module attributes {stable_mosaic.version = 11 : i64} {
  func.func @_linear_kernel(%arg0: i32, %arg1: i32, %arg2: i32, %arg3: memref<16x256xbf16, #tpu.memory_space<vmem>>, %arg4: memref<256x256xbf16, #tpu.memory_space<vmem>>, %arg5: memref<1x256xbf16, #tpu.memory_space<vmem>>, %arg6: memref<16x256xbf16, #tpu.memory_space<vmem>>, %arg7: memref<16x256xf32, #tpu.memory_space<vmem>>) attributes {dimension_semantics = [#tpu.dimension_semantics<parallel>, #tpu.dimension_semantics<parallel>, #tpu.dimension_semantics<arbitrary>], iteration_bounds = array<i64: 1, 4, 4>, scalar_prefetch = 0 : i64, scratch_operands = 1 : i64, tpu.core_type = #tpu.core_type<tc>, window_params = [{transform_indices = @transform_0, window_bounds = array<i64: 16, 256>}, {transform_indices = @transform_1, window_bounds = array<i64: 256, 256>}, {transform_indices = @transform_2, window_bounds = array<i64: 1, 256>}, {transform_indices = @transform_3, window_bounds = array<i64: 16, 256>}]} {
    %c0_i32 = arith.constant 0 : i32
    %0 = arith.cmpi eq, %arg2, %c0_i32 : i32
    %1 = arith.extui %0 : i1 to i32
    %c0_i32_0 = arith.constant 0 : i32
    %2 = arith.cmpi ne, %1, %c0_i32_0 : i32
    scf.if %2 {
      %cst_9 = arith.constant 0.000000e+00 : f32
      %12 = vector.broadcast %cst_9 : f32 to vector<16x256xf32>
      %c0_10 = arith.constant 0 : index
      %c0_11 = arith.constant 0 : index
      %13 = vector.load %arg7[%c0_10, %c0_11] : memref<16x256xf32, #tpu.memory_space<vmem>>, vector<16x256xf32>
      tpu.vector_store %arg7[%c0_10, %c0_11], %12 {strides = array<i32>} : memref<16x256xf32, #tpu.memory_space<vmem>>, vector<16x256xf32>,
    } else {
    }
    %c0 = arith.constant 0 : index
    %c0_1 = arith.constant 0 : index
    %3 = vector.load %arg7[%c0, %c0_1] : memref<16x256xf32, #tpu.memory_space<vmem>>, vector<16x256xf32>
    %c0_2 = arith.constant 0 : index
    %c0_3 = arith.constant 0 : index
    %4 = vector.load %arg3[%c0_2, %c0_3] : memref<16x256xbf16, #tpu.memory_space<vmem>>, vector<16x256xbf16>
    %c0_4 = arith.constant 0 : index
    %c0_5 = arith.constant 0 : index
    %5 = vector.load %arg4[%c0_4, %c0_5] : memref<256x256xbf16, #tpu.memory_space<vmem>>, vector<256x256xbf16>
    %cst = arith.constant dense<0.000000e+00> : vector<16x256xf32>
    %6 = tpu.matmul %4, %5, %cst {dimension_numbers = #tpu.dot_dimension_numbers<[1], [0], [0], [1], [0, 0, 1, 1], [], []>} : vector<16x256xbf16>, vector<256x256xbf16>, vector<16x256xf32> -> vector<16x256xf32>
    %7 = arith.addf %3, %6 : vector<16x256xf32>
    %c0_6 = arith.constant 0 : index
    %c0_7 = arith.constant 0 : index
    %8 = vector.load %arg7[%c0_6, %c0_7] : memref<16x256xf32, #tpu.memory_space<vmem>>, vector<16x256xf32>
    tpu.vector_store %arg7[%c0_6, %c0_7], %7 {strides = array<i32>} : memref<16x256xf32, #tpu.memory_space<vmem>>, vector<16x256xf32>,
    %c3_i32 = arith.constant 3 : i32
    %9 = arith.cmpi eq, %arg2, %c3_i32 : i32
    %10 = arith.extui %9 : i1 to i32
    %c0_i32_8 = arith.constant 0 : i32
    %11 = arith.cmpi ne, %10, %c0_i32_8 : i32
    scf.if %11 {
      %c0_9 = arith.constant 0 : index
      %c0_10 = arith.constant 0 : index
      %12 = vector.load %arg7[%c0_9, %c0_10] : memref<16x256xf32, #tpu.memory_space<vmem>>, vector<16x256xf32>
      %c0_11 = arith.constant 0 : index
      %c0_12 = arith.constant 0 : index
      %13 = vector.load %arg5[%c0_11, %c0_12] : memref<1x256xbf16, #tpu.memory_space<vmem>>, vector<1x256xbf16>
      %14 = arith.extf %13 : vector<1x256xbf16> to vector<1x256xf32>
      %15 = vector.broadcast %14 : vector<1x256xf32> to vector<16x256xf32>
      %16 = arith.addf %12, %15 : vector<16x256xf32>
      %17 = arith.truncf %16 : vector<16x256xf32> to vector<16x256xbf16>
      %c0_13 = arith.constant 0 : index
      %c0_14 = arith.constant 0 : index
      %18 = vector.load %arg6[%c0_13, %c0_14] : memref<16x256xbf16, #tpu.memory_space<vmem>>, vector<16x256xbf16>
      tpu.vector_store %arg6[%c0_13, %c0_14], %17 {strides = array<i32>} : memref<16x256xbf16, #tpu.memory_space<vmem>>, vector<16x256xbf16>,
    } else {
    }
    return
  }
  func.func @transform_0(%arg0: i32, %arg1: i32, %arg2: i32) -> (i32, i32) {
    %c0_i32 = arith.constant 0 : i32
    return %arg0, %arg2 : i32, i32
  }
  func.func @transform_1(%arg0: i32, %arg1: i32, %arg2: i32) -> (i32, i32) {
    %c0_i32 = arith.constant 0 : i32
    return %arg2, %arg1 : i32, i32
  }
  func.func @transform_2(%arg0: i32, %arg1: i32, %arg2: i32) -> (i32, i32) {
    %c0_i32 = arith.constant 0 : i32
    %c0_i32_0 = arith.constant 0 : i32
    return %c0_i32, %arg1 : i32, i32
  }
  func.func @transform_3(%arg0: i32, %arg1: i32, %arg2: i32) -> (i32, i32) {
    %c0_i32 = arith.constant 0 : i32
    return %arg0, %arg1 : i32, i32
  }
}

module attributes {stable_mosaic.version = 11 : i64} {
  func.func @_linear_kernel(%arg0: i32, %arg1: i32, %arg2: i32, %arg3: memref<16x256xbf16, #tpu.memory_space<vmem>>, %arg4: memref<256x256xbf16, #tpu.memory_space<vmem>>, %arg5: memref<1x256xbf16, #tpu.memory_space<vmem>>, %arg6: memref<16x256xbf16, #tpu.memory_space<vmem>>, %arg7: memref<16x256xf32, #tpu.memory_space<vmem>>) attributes {dimension_semantics = [#tpu.dimension_semantics<parallel>, #tpu.dimension_semantics<parallel>, #tpu.dimension_semantics<arbitrary>], iteration_bounds = array<i64: 1, 4, 8>, scalar_prefetch = 0 : i64, scratch_operands = 1 : i64, tpu.core_type = #tpu.core_type<tc>, window_params = [{transform_indices = @transform_0, window_bounds = array<i64: 16, 256>}, {transform_indices = @transform_1, window_bounds = array<i64: 256, 256>}, {transform_indices = @transform_2, window_bounds = array<i64: 1, 256>}, {transform_indices = @transform_3, window_bounds = array<i64: 16, 256>}]} {
    %c0_i32 = arith.constant 0 : i32
    %0 = arith.cmpi eq, %arg2, %c0_i32 : i32
    %1 = arith.extui %0 : i1 to i32
    %c0_i32_0 = arith.constant 0 : i32
    %2 = arith.cmpi ne, %1, %c0_i32_0 : i32
    scf.if %2 {
      %cst_9 = arith.constant 0.000000e+00 : f32
      %12 = vector.broadcast %cst_9 : f32 to vector<16x256xf32>
      %c0_10 = arith.constant 0 : index
      %c0_11 = arith.constant 0 : index
      %13 = vector.load %arg7[%c0_10, %c0_11] : memref<16x256xf32, #tpu.memory_space<vmem>>, vector<16x256xf32>
      tpu.vector_store %arg7[%c0_10, %c0_11], %12 {strides = array<i32>} : memref<16x256xf32, #tpu.memory_space<vmem>>, vector<16x256xf32>,
    } else {
    }
    %c0 = arith.constant 0 : index
    %c0_1 = arith.constant 0 : index
    %3 = vector.load %arg7[%c0, %c0_1] : memref<16x256xf32, #tpu.memory_space<vmem>>, vector<16x256xf32>
    %c0_2 = arith.constant 0 : index
    %c0_3 = arith.constant 0 : index
    %4 = vector.load %arg3[%c0_2, %c0_3] : memref<16x256xbf16, #tpu.memory_space<vmem>>, vector<16x256xbf16>
    %c0_4 = arith.constant 0 : index
    %c0_5 = arith.constant 0 : index
    %5 = vector.load %arg4[%c0_4, %c0_5] : memref<256x256xbf16, #tpu.memory_space<vmem>>, vector<256x256xbf16>
    %cst = arith.constant dense<0.000000e+00> : vector<16x256xf32>
    %6 = tpu.matmul %4, %5, %cst {dimension_numbers = #tpu.dot_dimension_numbers<[1], [0], [0], [1], [0, 0, 1, 1], [], []>} : vector<16x256xbf16>, vector<256x256xbf16>, vector<16x256xf32> -> vector<16x256xf32>
    %7 = arith.addf %3, %6 : vector<16x256xf32>
    %c0_6 = arith.constant 0 : index
    %c0_7 = arith.constant 0 : index
    %8 = vector.load %arg7[%c0_6, %c0_7] : memref<16x256xf32, #tpu.memory_space<vmem>>, vector<16x256xf32>
    tpu.vector_store %arg7[%c0_6, %c0_7], %7 {strides = array<i32>} : memref<16x256xf32, #tpu.memory_space<vmem>>, vector<16x256xf32>,
    %c7_i32 = arith.constant 7 : i32
    %9 = arith.cmpi eq, %arg2, %c7_i32 : i32
    %10 = arith.extui %9 : i1 to i32
    %c0_i32_8 = arith.constant 0 : i32
    %11 = arith.cmpi ne, %10, %c0_i32_8 : i32
    scf.if %11 {
      %c0_9 = arith.constant 0 : index
      %c0_10 = arith.constant 0 : index
      %12 = vector.load %arg7[%c0_9, %c0_10] : memref<16x256xf32, #tpu.memory_space<vmem>>, vector<16x256xf32>
      %c0_11 = arith.constant 0 : index
      %c0_12 = arith.constant 0 : index
      %13 = vector.load %arg5[%c0_11, %c0_12] : memref<1x256xbf16, #tpu.memory_space<vmem>>, vector<1x256xbf16>
      %14 = arith.extf %13 : vector<1x256xbf16> to vector<1x256xf32>
      %15 = vector.broadcast %14 : vector<1x256xf32> to vector<16x256xf32>
      %16 = arith.addf %12, %15 : vector<16x256xf32>
      %17 = arith.truncf %16 : vector<16x256xf32> to vector<16x256xbf16>
      %c0_13 = arith.constant 0 : index
      %c0_14 = arith.constant 0 : index
      %18 = vector.load %arg6[%c0_13, %c0_14] : memref<16x256xbf16, #tpu.memory_space<vmem>>, vector<16x256xbf16>
      tpu.vector_store %arg6[%c0_13, %c0_14], %17 {strides = array<i32>} : memref<16x256xbf16, #tpu.memory_space<vmem>>, vector<16x256xbf16>,
    } else {
    }
    return
  }
  func.func @transform_0(%arg0: i32, %arg1: i32, %arg2: i32) -> (i32, i32) {
    %c0_i32 = arith.constant 0 : i32
    return %arg0, %arg2 : i32, i32
  }
  func.func @transform_1(%arg0: i32, %arg1: i32, %arg2: i32) -> (i32, i32) {
    %c0_i32 = arith.constant 0 : i32
    return %arg2, %arg1 : i32, i32
  }
  func.func @transform_2(%arg0: i32, %arg1: i32, %arg2: i32) -> (i32, i32) {
    %c0_i32 = arith.constant 0 : i32
    %c0_i32_0 = arith.constant 0 : i32
    return %c0_i32, %arg1 : i32, i32
  }
  func.func @transform_3(%arg0: i32, %arg1: i32, %arg2: i32) -> (i32, i32) {
    %c0_i32 = arith.constant 0 : i32
    return %arg0, %arg1 : i32, i32
  }
}

module attributes {stable_mosaic.version = 11 : i64} {
  func.func @_linear_kernel(%arg0: i32, %arg1: i32, %arg2: i32, %arg3: memref<16x256xbf16, #tpu.memory_space<vmem>>, %arg4: memref<256x256xbf16, #tpu.memory_space<vmem>>, %arg5: memref<16x256xbf16, #tpu.memory_space<vmem>>, %arg6: memref<16x256xf32, #tpu.memory_space<vmem>>) attributes {dimension_semantics = [#tpu.dimension_semantics<parallel>, #tpu.dimension_semantics<parallel>, #tpu.dimension_semantics<arbitrary>], iteration_bounds = array<i64: 1, 4, 4>, scalar_prefetch = 0 : i64, scratch_operands = 1 : i64, tpu.core_type = #tpu.core_type<tc>, window_params = [{transform_indices = @transform_0, window_bounds = array<i64: 16, 256>}, {transform_indices = @transform_1, window_bounds = array<i64: 256, 256>}, {transform_indices = @transform_2, window_bounds = array<i64: 16, 256>}]} {
    %c0_i32 = arith.constant 0 : i32
    %0 = arith.cmpi eq, %arg2, %c0_i32 : i32
    %1 = arith.extui %0 : i1 to i32
    %c0_i32_0 = arith.constant 0 : i32
    %2 = arith.cmpi ne, %1, %c0_i32_0 : i32
    scf.if %2 {
      %cst_9 = arith.constant 0.000000e+00 : f32
      %12 = vector.broadcast %cst_9 : f32 to vector<16x256xf32>
      %c0_10 = arith.constant 0 : index
      %c0_11 = arith.constant 0 : index
      %13 = vector.load %arg6[%c0_10, %c0_11] : memref<16x256xf32, #tpu.memory_space<vmem>>, vector<16x256xf32>
      tpu.vector_store %arg6[%c0_10, %c0_11], %12 {strides = array<i32>} : memref<16x256xf32, #tpu.memory_space<vmem>>, vector<16x256xf32>,
    } else {
    }
    %c0 = arith.constant 0 : index
    %c0_1 = arith.constant 0 : index
    %3 = vector.load %arg6[%c0, %c0_1] : memref<16x256xf32, #tpu.memory_space<vmem>>, vector<16x256xf32>
    %c0_2 = arith.constant 0 : index
    %c0_3 = arith.constant 0 : index
    %4 = vector.load %arg3[%c0_2, %c0_3] : memref<16x256xbf16, #tpu.memory_space<vmem>>, vector<16x256xbf16>
    %c0_4 = arith.constant 0 : index
    %c0_5 = arith.constant 0 : index
    %5 = vector.load %arg4[%c0_4, %c0_5] : memref<256x256xbf16, #tpu.memory_space<vmem>>, vector<256x256xbf16>
    %cst = arith.constant dense<0.000000e+00> : vector<16x256xf32>
    %6 = tpu.matmul %4, %5, %cst {dimension_numbers = #tpu.dot_dimension_numbers<[1], [0], [0], [1], [0, 0, 1, 1], [], []>} : vector<16x256xbf16>, vector<256x256xbf16>, vector<16x256xf32> -> vector<16x256xf32>
    %7 = arith.addf %3, %6 : vector<16x256xf32>
    %c0_6 = arith.constant 0 : index
    %c0_7 = arith.constant 0 : index
    %8 = vector.load %arg6[%c0_6, %c0_7] : memref<16x256xf32, #tpu.memory_space<vmem>>, vector<16x256xf32>
    tpu.vector_store %arg6[%c0_6, %c0_7], %7 {strides = array<i32>} : memref<16x256xf32, #tpu.memory_space<vmem>>, vector<16x256xf32>,
    %c3_i32 = arith.constant 3 : i32
    %9 = arith.cmpi eq, %arg2, %c3_i32 : i32
    %10 = arith.extui %9 : i1 to i32
    %c0_i32_8 = arith.constant 0 : i32
    %11 = arith.cmpi ne, %10, %c0_i32_8 : i32
    scf.if %11 {
      %c0_9 = arith.constant 0 : index
      %c0_10 = arith.constant 0 : index
      %12 = vector.load %arg6[%c0_9, %c0_10] : memref<16x256xf32, #tpu.memory_space<vmem>>, vector<16x256xf32>
      %13 = arith.truncf %12 : vector<16x256xf32> to vector<16x256xbf16>
      %c0_11 = arith.constant 0 : index
      %c0_12 = arith.constant 0 : index
      %14 = vector.load %arg5[%c0_11, %c0_12] : memref<16x256xbf16, #tpu.memory_space<vmem>>, vector<16x256xbf16>
      tpu.vector_store %arg5[%c0_11, %c0_12], %13 {strides = array<i32>} : memref<16x256xbf16, #tpu.memory_space<vmem>>, vector<16x256xbf16>,
    } else {
    }
    return
  }
  func.func @transform_0(%arg0: i32, %arg1: i32, %arg2: i32) -> (i32, i32) {
    %c0_i32 = arith.constant 0 : i32
    return %arg0, %arg2 : i32, i32
  }
  func.func @transform_1(%arg0: i32, %arg1: i32, %arg2: i32) -> (i32, i32) {
    %c0_i32 = arith.constant 0 : i32
    return %arg2, %arg1 : i32, i32
  }
  func.func @transform_2(%arg0: i32, %arg1: i32, %arg2: i32) -> (i32, i32) {
    %c0_i32 = arith.constant 0 : i32
    return %arg0, %arg1 : i32, i32
  }
}

module attributes {stable_mosaic.version = 11 : i64} {
  func.func @_linear_kernel(%arg0: i32, %arg1: i32, %arg2: i32, %arg3: memref<16x256xbf16, #tpu.memory_space<vmem>>, %arg4: memref<256x256xbf16, #tpu.memory_space<vmem>>, %arg5: memref<1x256xbf16, #tpu.memory_space<vmem>>, %arg6: memref<16x256xbf16, #tpu.memory_space<vmem>>, %arg7: memref<16x256xf32, #tpu.memory_space<vmem>>) attributes {dimension_semantics = [#tpu.dimension_semantics<parallel>, #tpu.dimension_semantics<parallel>, #tpu.dimension_semantics<arbitrary>], iteration_bounds = array<i64: 1, 2, 4>, scalar_prefetch = 0 : i64, scratch_operands = 1 : i64, tpu.core_type = #tpu.core_type<tc>, window_params = [{transform_indices = @transform_0, window_bounds = array<i64: 16, 256>}, {transform_indices = @transform_1, window_bounds = array<i64: 256, 256>}, {transform_indices = @transform_2, window_bounds = array<i64: 1, 256>}, {transform_indices = @transform_3, window_bounds = array<i64: 16, 256>}]} {
    %c0_i32 = arith.constant 0 : i32
    %0 = arith.cmpi eq, %arg2, %c0_i32 : i32
    %1 = arith.extui %0 : i1 to i32
    %c0_i32_0 = arith.constant 0 : i32
    %2 = arith.cmpi ne, %1, %c0_i32_0 : i32
    scf.if %2 {
      %cst_9 = arith.constant 0.000000e+00 : f32
      %12 = vector.broadcast %cst_9 : f32 to vector<16x256xf32>
      %c0_10 = arith.constant 0 : index
      %c0_11 = arith.constant 0 : index
      %13 = vector.load %arg7[%c0_10, %c0_11] : memref<16x256xf32, #tpu.memory_space<vmem>>, vector<16x256xf32>
      tpu.vector_store %arg7[%c0_10, %c0_11], %12 {strides = array<i32>} : memref<16x256xf32, #tpu.memory_space<vmem>>, vector<16x256xf32>,
    } else {
    }
    %c0 = arith.constant 0 : index
    %c0_1 = arith.constant 0 : index
    %3 = vector.load %arg7[%c0, %c0_1] : memref<16x256xf32, #tpu.memory_space<vmem>>, vector<16x256xf32>
    %c0_2 = arith.constant 0 : index
    %c0_3 = arith.constant 0 : index
    %4 = vector.load %arg3[%c0_2, %c0_3] : memref<16x256xbf16, #tpu.memory_space<vmem>>, vector<16x256xbf16>
    %c0_4 = arith.constant 0 : index
    %c0_5 = arith.constant 0 : index
    %5 = vector.load %arg4[%c0_4, %c0_5] : memref<256x256xbf16, #tpu.memory_space<vmem>>, vector<256x256xbf16>
    %cst = arith.constant dense<0.000000e+00> : vector<16x256xf32>
    %6 = tpu.matmul %4, %5, %cst {dimension_numbers = #tpu.dot_dimension_numbers<[1], [0], [0], [1], [0, 0, 1, 1], [], []>} : vector<16x256xbf16>, vector<256x256xbf16>, vector<16x256xf32> -> vector<16x256xf32>
    %7 = arith.addf %3, %6 : vector<16x256xf32>
    %c0_6 = arith.constant 0 : index
    %c0_7 = arith.constant 0 : index
    %8 = vector.load %arg7[%c0_6, %c0_7] : memref<16x256xf32, #tpu.memory_space<vmem>>, vector<16x256xf32>
    tpu.vector_store %arg7[%c0_6, %c0_7], %7 {strides = array<i32>} : memref<16x256xf32, #tpu.memory_space<vmem>>, vector<16x256xf32>,
    %c3_i32 = arith.constant 3 : i32
    %9 = arith.cmpi eq, %arg2, %c3_i32 : i32
    %10 = arith.extui %9 : i1 to i32
    %c0_i32_8 = arith.constant 0 : i32
    %11 = arith.cmpi ne, %10, %c0_i32_8 : i32
    scf.if %11 {
      %c0_9 = arith.constant 0 : index
      %c0_10 = arith.constant 0 : index
      %12 = vector.load %arg7[%c0_9, %c0_10] : memref<16x256xf32, #tpu.memory_space<vmem>>, vector<16x256xf32>
      %c0_11 = arith.constant 0 : index
      %c0_12 = arith.constant 0 : index
      %13 = vector.load %arg5[%c0_11, %c0_12] : memref<1x256xbf16, #tpu.memory_space<vmem>>, vector<1x256xbf16>
      %14 = arith.extf %13 : vector<1x256xbf16> to vector<1x256xf32>
      %15 = vector.broadcast %14 : vector<1x256xf32> to vector<16x256xf32>
      %16 = arith.addf %12, %15 : vector<16x256xf32>
      %17 = arith.truncf %16 : vector<16x256xf32> to vector<16x256xbf16>
      %c0_13 = arith.constant 0 : index
      %c0_14 = arith.constant 0 : index
      %18 = vector.load %arg6[%c0_13, %c0_14] : memref<16x256xbf16, #tpu.memory_space<vmem>>, vector<16x256xbf16>
      tpu.vector_store %arg6[%c0_13, %c0_14], %17 {strides = array<i32>} : memref<16x256xbf16, #tpu.memory_space<vmem>>, vector<16x256xbf16>,
    } else {
    }
    return
  }
  func.func @transform_0(%arg0: i32, %arg1: i32, %arg2: i32) -> (i32, i32) {
    %c0_i32 = arith.constant 0 : i32
    return %arg0, %arg2 : i32, i32
  }
  func.func @transform_1(%arg0: i32, %arg1: i32, %arg2: i32) -> (i32, i32) {
    %c0_i32 = arith.constant 0 : i32
    return %arg2, %arg1 : i32, i32
  }
  func.func @transform_2(%arg0: i32, %arg1: i32, %arg2: i32) -> (i32, i32) {
    %c0_i32 = arith.constant 0 : i32
    %c0_i32_0 = arith.constant 0 : i32
    return %c0_i32, %arg1 : i32, i32
  }
  func.func @transform_3(%arg0: i32, %arg1: i32, %arg2: i32) -> (i32, i32) {
    %c0_i32 = arith.constant 0 : i32
    return %arg0, %arg1 : i32, i32
  }
}

</mosaic_0001>

<bundles_post_ra>
// kernel: no_leaf_forward.11
= control target key start
LH: loop header
LB: loop body
LE: loop exit
PB: predicated region body
PF: predicated region fallthrough
CT: control target
= control target key end

     0   :  { %s1223_s12 = smov 0   ;;  %s1225_s13 = smov 0   ;;  %s1510_s0 = inlined_call_operand.vmem [shape: bf16[16,2048], index: 0, kind: input, shape index: {}]   ;;  %s1511_s1 = inlined_call_operand.vmem [shape: bf16[2048,512], index: 1, kind: input, shape index: {}]   ;;  %s1512_s2 = inlined_call_operand.vmem [shape: bf16[1,512], index: 2, kind: input, shape index: {}]   ;;  %s1513_s3 = inlined_call_operand.vmem [shape: bf16[16,512], index: 3, kind: output, shape index: {}]  }
   0x1   :  { %s1227_s14 = smov 0   ;;  %s1229_s15 = smov 0  }
   0x2   :  { %s1231_s16 = smov 0   ;;  %s1233_s17 = smov 0  }
   0x3   :  { %s1235_s18 = smov 0   ;;  %s1237_s19 = smov 0  }
   0x4   :  { %s1239_s20 = smov 0   ;;  %s1241_s21 = smov 0  }
   0x5   :  { %s1243_s22 = smov 0  }
   0x6 LB: > { %s909_s23 = sadd.s32 4294967295, %s1200_s22   ;;  %s25_s24 = sadd.s32 1, %s1192_s20  ;;  %s1200_s22 = sphi %s1243_s22, %s13_s22   ;;  %s1196_s21 = sphi %s1241_s21, %s1534_s21   ;;  %s1192_s20 = sphi %s1239_s20, %s1533_s20   ;;  %s1188_s19 = sphi %s1237_s19, %s1532_s19   ;;  %s1184_s18 = sphi %s1235_s18, %s1531_s18   ;;  %s1180_s17 = sphi %s1233_s17, %s1530_s17   ;;  %s1176_s16 = sphi %s1231_s16, %s1529_s16   ;;  %s1172_s15 = sphi %s1229_s15, %s1528_s15   ;;  %s1168_s14 = sphi %s1227_s14, %s1527_s14   ;;  %s1164_s13 = sphi %s1225_s13, %s1526_s13   ;;  %s1160_s12 = sphi %s1223_s12, %s1525_s12  }
   0x7   : > { %p26_p0 = scmp.ge.s32.totalorder %s25_s24, 8  ;;  %s28_s25 = sadd.s32 1, %s1196_s21 }
   0x8   : > { %s41_s26 = sadd.s32 1, %s1180_s17  ;;  %p48_p1 = scmp.ne.s32.totalorder %s1180_s17, %s1176_s16 }
   0x9   : > { %s1536_s24 = smov (%p26_p0, %s25_s24), 0  ;;  %s1538_s25 = smov (!%p26_p0, %s28_s25), %s1196_s21 }
   0xa   : > { %1516 = sst [smem:[#allocation6_spill]] %s1536_s24  ;;  %s37_s27 = ssub.s32 %s1192_s20, %s1536_s24 }
   0xb   : > { %p49_p2 = scmp.eq.s32.totalorder %s1200_s22, 0  ;;  %p30_p3 = scmp.ge.s32.totalorder %s1538_s25, 2 }
   0xc   : > { %p39_p4 = scmp.eq.s32.totalorder %s37_s27, 0  ;;  %s69_s29 = sadd.s32 1, %s1172_s15 }
   0xd   : > { %p1290_p5 = por %p49_p2, %p48_p1  ;;  %s1540_s25 = smov (%p30_p3, %s1538_s25), 0 }
   0xe   : > { %1518 = sst [smem:[#allocation7_spill]] %s1540_s25  ;;  %s65_s4 = ssub.s32 %s1196_s21, %s1540_s25 }
   0xf   : > { %s1298_s30 = scalar_select %p39_p4, %s1180_s17, %s41_s26  }
  0x10   : > { %p76_p6 = scmp.ne.s32.totalorder %s1172_s15, %s1168_s14  ;;  %s66_s5 = sor.u32 %s65_s4, %s37_s27 }
  0x11   : > { %1519 = sst [smem:[#allocation8_spill]] %s1298_s30  ;;  %p121_p7 = scmp.eq.s32.totalorder %s65_s4, 0 }
  0x12   : > { %p67_p8 = scmp.eq.s32.totalorder %s66_s5, 0  ;;  %p1304_p9 = por %p76_p6, %p49_p2 }
  0x13   : > { %s123_s7 = sadd.s32 1, %s1164_s13  ;;  %p133_p10 = scmp.ne.s32.totalorder %s1164_s13, %s1160_s12 }
  0x14   : > { %s1312_s8 = scalar_select %p67_p8, %s1172_s15, %s69_s29  }
  0x15   : > { %s1315_s9 = scalar_select %p121_p7, %s1164_s13, %s123_s7  }
  0x16   : > { %p134_p11 = scmp.eq.s32.totalorder %s909_s23, 15  ;;  %p912_p13 = scmp.ge.s32.totalorder %s1200_s22, 16 }
  0x18   : > { %p1317_p12 = por %p134_p11, %p133_p10  ;;  %156 = sbr.rel (%p912_p13) target bundleno = 61 (0x3d), region = 16 }
  0x1f   : > { %159 = sbr.rel (!%p1290_p5) target bundleno = 38 (0x26), region = 20  ;;  %s161_s11 = sand.u32 (%p1290_p5), 1, %s1180_s17  }
  0x20   : > { %s969_s26 = sshll.u32 (%p1290_p5), %s1192_s20, 3  ;;  %s913_s27 = sshll.u32 (%p1290_p5), %s161_s11, 4 }
  0x21   : > { %s169_s5 = scalar_lea.vmem (%p1290_p5), %s1510_s0, %s969_s26  ;;  %s163_s23 = scalar_lea.vmem (%p1290_p5), [#allocation3], %s913_s27 }
  0x22   : > { %v199_v0 = vld [vmem:[%s169_s5] sm:$0xff] (%p1290_p5) }
  0x23   : > { %v201_v1 = vld [vmem:[%s169_s5 + $0x40] sm:$0xff] (%p1290_p5)  ;;  %200 = vst [vmem:[%s163_s23] sm:$0xff] (%p1290_p5), %v199_v0 }
  0x24   : > { %202 = vst [vmem:[%s163_s23 + $0x8] sm:$0xff] (%p1290_p5), %v201_v1 }
  0x26 PF: > { %208 = sbr.rel (!%p1304_p9) target bundleno = 61 (0x3d), region = 58  ;;  %s210_s28 = sand.u32 (%p1304_p9), 1, %s1172_s15  }
  0x27   : > { %s918_s7 = sshll.u32 (%p1304_p9), %s1196_s21, 1  ;;  %s916_s25 = sshll.u32 (%p1304_p9), %s210_s28, 8 }
  0x28   : > { %s970_s11 = sshll.u32 (%p1304_p9), %s1192_s20, 7  ;;  %s1342_s6 = scalar_lea.vmem (%p1304_p9), [#allocation4], %s916_s25 }
  0x29   : > { %s216_s24 = sadd.s32 (%p1304_p9), %s970_s11, %s918_s7 }
  0x2a   : > { %s920_s30 = sshll.u32 (%p1304_p9), %s216_s24, 2 }
  0x2b   : > { %s1337_s4 = scalar_lea.vmem (%p1304_p9), %s1511_s1, %s920_s30 }
  0x2c   : > { %v308_v2 = vld [vmem:[%s1337_s4] sm:$0xff] (%p1304_p9)  ;;  %v310_v3 = vld [vmem:[%s1337_s4 + $0x10] sm:$0xff] (%p1304_p9) }
  0x2d   : > { %v312_v4 = vld [vmem:[%s1337_s4 + $0x20] sm:$0xff]  ;;  %309 = vst [vmem:[%s1342_s6] sm:$0xff] %v308_v2  ;;  %311 = vst [vmem:[%s1342_s6 + $0x8] sm:$0xff] %v310_v3  ;;  %v314_v5 = vld [vmem:[%s1337_s4 + $0x30] sm:$0xff] }
  0x2e   : > { %313 = vst [vmem:[%s1342_s6 + $0x10] sm:$0xff] %v312_v4  ;;  %v316_v6 = vld [vmem:[%s1337_s4 + $0x40] sm:$0xff]  ;;  %v318_v7 = vld [vmem:[%s1337_s4 + $0x50] sm:$0xff]  ;;  %315 = vst [vmem:[%s1342_s6 + $0x18] sm:$0xff] %v314_v5 }
  0x2f   : > { %317 = vst [vmem:[%s1342_s6 + $0x20] sm:$0xff] %v316_v6  ;;  %319 = vst [vmem:[%s1342_s6 + $0x28] sm:$0xff] %v318_v7  ;;  %v320_v8 = vld [vmem:[%s1337_s4 + $0x60] sm:$0xff]  ;;  %v322_v9 = vld [vmem:[%s1337_s4 + $0x70] sm:$0xff] }
  0x30   : > { %v324_v10 = vld [vmem:[%s1337_s4 + $0x80] sm:$0xff]  ;;  %321 = vst [vmem:[%s1342_s6 + $0x30] sm:$0xff] %v320_v8  ;;  %323 = vst [vmem:[%s1342_s6 + $0x38] sm:$0xff] %v322_v9  ;;  %v326_v11 = vld [vmem:[%s1337_s4 + $0x90] sm:$0xff] }
  0x31   : > { %325 = vst [vmem:[%s1342_s6 + $0x40] sm:$0xff] %v324_v10  ;;  %v328_v12 = vld [vmem:[%s1337_s4 + $0xa0] sm:$0xff]  ;;  %v330_v13 = vld [vmem:[%s1337_s4 + $0xb0] sm:$0xff]  ;;  %327 = vst [vmem:[%s1342_s6 + $0x48] sm:$0xff] %v326_v11 }
  0x32   : > { %329 = vst [vmem:[%s1342_s6 + $0x50] sm:$0xff] %v328_v12  ;;  %331 = vst [vmem:[%s1342_s6 + $0x58] sm:$0xff] %v330_v13  ;;  %v332_v14 = vld [vmem:[%s1337_s4 + $0xc0] sm:$0xff]  ;;  %v334_v15 = vld [vmem:[%s1337_s4 + $0xd0] sm:$0xff] }
  0x33   : > { %v336_v16 = vld [vmem:[%s1337_s4 + $0xe0] sm:$0xff]  ;;  %333 = vst [vmem:[%s1342_s6 + $0x60] sm:$0xff] %v332_v14  ;;  %335 = vst [vmem:[%s1342_s6 + $0x68] sm:$0xff] %v334_v15  ;;  %v338_v17 = vld [vmem:[%s1337_s4 + $0xf0] sm:$0xff] }
  0x34   : > { %337 = vst [vmem:[%s1342_s6 + $0x70] sm:$0xff] %v336_v16  ;;  %v340_v18 = vld [vmem:[%s1337_s4 + $0x100] sm:$0xff]  ;;  %v342_v19 = vld [vmem:[%s1337_s4 + $0x110] sm:$0xff]  ;;  %339 = vst [vmem:[%s1342_s6 + $0x78] sm:$0xff] %v338_v17 }
  0x35   : > { %341 = vst [vmem:[%s1342_s6 + $0x80] sm:$0xff] %v340_v18  ;;  %343 = vst [vmem:[%s1342_s6 + $0x88] sm:$0xff] %v342_v19  ;;  %v344_v20 = vld [vmem:[%s1337_s4 + $0x120] sm:$0xff]  ;;  %v346_v21 = vld [vmem:[%s1337_s4 + $0x130] sm:$0xff] }
  0x36   : > { %v348_v22 = vld [vmem:[%s1337_s4 + $0x140] sm:$0xff]  ;;  %345 = vst [vmem:[%s1342_s6 + $0x90] sm:$0xff] %v344_v20  ;;  %347 = vst [vmem:[%s1342_s6 + $0x98] sm:$0xff] %v346_v21  ;;  %v350_v23 = vld [vmem:[%s1337_s4 + $0x150] sm:$0xff] }
  0x37   : > { %349 = vst [vmem:[%s1342_s6 + $0xa0] sm:$0xff] %v348_v22  ;;  %v352_v24 = vld [vmem:[%s1337_s4 + $0x160] sm:$0xff]  ;;  %v354_v25 = vld [vmem:[%s1337_s4 + $0x170] sm:$0xff]  ;;  %351 = vst [vmem:[%s1342_s6 + $0xa8] sm:$0xff] %v350_v23 }
  0x38   : > { %353 = vst [vmem:[%s1342_s6 + $0xb0] sm:$0xff] %v352_v24  ;;  %355 = vst [vmem:[%s1342_s6 + $0xb8] sm:$0xff] %v354_v25  ;;  %v356_v26 = vld [vmem:[%s1337_s4 + $0x180] sm:$0xff]  ;;  %v358_v27 = vld [vmem:[%s1337_s4 + $0x190] sm:$0xff] }
  0x39   : > { %v360_v28 = vld [vmem:[%s1337_s4 + $0x1a0] sm:$0xff]  ;;  %357 = vst [vmem:[%s1342_s6 + $0xc0] sm:$0xff] %v356_v26  ;;  %359 = vst [vmem:[%s1342_s6 + $0xc8] sm:$0xff] %v358_v27  ;;  %v362_v29 = vld [vmem:[%s1337_s4 + $0x1b0] sm:$0xff] }
  0x3a   : > { %361 = vst [vmem:[%s1342_s6 + $0xd0] sm:$0xff] %v360_v28  ;;  %v364_v30 = vld [vmem:[%s1337_s4 + $0x1c0] sm:$0xff]  ;;  %v366_v31 = vld [vmem:[%s1337_s4 + $0x1d0] sm:$0xff]  ;;  %363 = vst [vmem:[%s1342_s6 + $0xd8] sm:$0xff] %v362_v29 }
  0x3b   : > { %365 = vst [vmem:[%s1342_s6 + $0xe0] sm:$0xff] %v364_v30  ;;  %367 = vst [vmem:[%s1342_s6 + $0xe8] sm:$0xff] %v366_v31  ;;  %v368_v32 = vld [vmem:[%s1337_s4 + $0x1e0] sm:$0xff]  ;;  %v370_v33 = vld [vmem:[%s1337_s4 + $0x1f0] sm:$0xff] }
  0x3c   : > { %369 = vst [vmem:[%s1342_s6 + $0xf0] sm:$0xff] %v368_v32  ;;  %371 = vst [vmem:[%s1342_s6 + $0xf8] sm:$0xff] %v370_v33 }
  0x3d PF: > { %p921_p0 = scmp.ge.s32.totalorder %s1200_s22, 1  ;;  %p384_p1 = scmp.lt.s32.totalorder %s1200_s22, 17 }
  0x3f   : > { %p385_p2 = pnand %p921_p0, %p384_p1 }
  0x40   : > { %s391_s24 = sand.u32 (!%p385_p2), 1, %s1176_s16   ;;  %s398_s25 = sand.u32 (!%p385_p2), 1, %s1168_s14  }
  0x41   : > { %388 = sbr.rel (%p385_p2) target bundleno = 382 (0x17e), region = 100  ;;  %s1409_s30 = sshll.u32 (!%p385_p2), %s391_s24, 4 }
  0x42   : > { %s923_s27 = sshll.u32 (!%p385_p2), %s398_s25, 8  ;;  %s425_s5 = sand.u32 (!%p385_p2), 1, %s1160_s12  }
  0x43   : > { %s925_s23 = sshll.u32 (!%p385_p2), %s1188_s19, 1  ;;  %s924_s28 = sshll.u32 (!%p385_p2), %s425_s5, 4 }
  0x44   : > { %p433_p3 = scmp.lt.s32.totalorder (!%p385_p2), %s925_s23, 3  ;;  %s393_s26 = scalar_lea.vmem (!%p385_p2), [#allocation3], %s1409_s30 }
  0x45   : > { %s1420_s4 = scalar_lea.vmem (!%p385_p2), [#allocation4], %s923_s27  ;;  %s1422_s16 = scalar_lea.vmem (!%p385_p2), [#allocation5], %s924_s28 }
  0x46   : > { %p926_p4 = scmp.ne.s32.totalorder (!%p385_p2), %s1184_s18, 0 }
  0x48   : > { %s1542_s23 = smov (!%p433_p3, %s925_s23), 3  ;;  %442 = sbr.rel (%p926_p4) target bundleno = 79 (0x4f), region = 112 }
  0x49   : > { %s435_s29 = scalar_lea.vmem %s1512_s2, %s1542_s23  ;;  %v1202_v34 = vmov (!%p926_p4), 0.0  }
  0x4a   : > { %443 = vst [vmem:[#allocation2] sm:$0xff] (!%p926_p4), %v1202_v34  ;;  %444 = vst [vmem:[#allocation2 + $0x8] sm:$0xff] (!%p926_p4), %v1202_v34 }
  0x4b   : > { %445 = vst [vmem:[#allocation2 + $0x10] sm:$0xff] (!%p926_p4), %v1202_v34  ;;  %446 = vst [vmem:[#allocation2 + $0x18] sm:$0xff] (!%p926_p4), %v1202_v34 }
  0x4f PF: > { %v1063_v35 = vld [vmem:[%s1420_s4 + $0x4] ss:$8 sps:$4 sm:$0xff]   ;;  %v1065_v36 = vld [vmem:[%s1420_s4] ss:$8 sps:$4 sm:$0xff]   ;;  %v1066_v37 = vld [vmem:[%s1420_s4 + $0x14] ss:$8 sps:$4 sm:$0xff]  }
  0x50   : > { %655 = vmatprep.subr.bf16.mxu0 %v1063_v35  ;;  %v1068_v38 = vld [vmem:[%s1420_s4 + $0x10] ss:$8 sps:$4 sm:$0xff]   ;;  %v1069_v39 = vld [vmem:[%s1420_s4 + $0x24] ss:$8 sps:$4 sm:$0xff]   ;;  %v1071_v40 = vld [vmem:[%s1420_s4 + $0x20] ss:$8 sps:$4 sm:$0xff]  }
  0x51   : > { %656 = vmatpush1.bf16.msra.mxu0 %v1065_v36  ;;  %v1072_v41 = vld [vmem:[%s1420_s4 + $0x34] ss:$8 sps:$4 sm:$0xff]   ;;  %v1074_v42 = vld [vmem:[%s1420_s4 + $0x30] ss:$8 sps:$4 sm:$0xff]   ;;  %v1075_v43 = vld [vmem:[%s1420_s4 + $0x44] ss:$8 sps:$4 sm:$0xff]  }
  0x52   : > { %657 = vmatprep.subr.bf16.mxu0 %v1066_v37  ;;  %v1077_v44 = vld [vmem:[%s1420_s4 + $0x40] ss:$8 sps:$4 sm:$0xff]   ;;  %v1078_v45 = vld [vmem:[%s1420_s4 + $0x54] ss:$8 sps:$4 sm:$0xff]   ;;  %v1080_v46 = vld [vmem:[%s1420_s4 + $0x50] ss:$8 sps:$4 sm:$0xff]  }
  0x53   : > { %v1081_v47 = vld [vmem:[%s1420_s4 + $0x64] ss:$8 sps:$4 sm:$0xff]   ;;  %v1083_v49 = vld [vmem:[%s1420_s4 + $0x60] ss:$8 sps:$4 sm:$0xff]   ;;  %v1084_v50 = vld [vmem:[%s1420_s4 + $0x74] ss:$8 sps:$4 sm:$0xff]  }
  0x54   : > { %v1113_v48 = vld [vmem:[%s393_s26 + $0x4] ss:$8 sps:$4 sm:$0xff]   ;;  %v1086_v51 = vld [vmem:[%s1420_s4 + $0x70] ss:$8 sps:$4 sm:$0xff]   ;;  %v1089_v53 = vld [vmem:[%s1420_s4 + $0x80] ss:$8 sps:$4 sm:$0xff]  }
  0x55   : > { %658 = vmatpush1.bf16.msra.mxu0 %v1068_v38  ;;  %687 = vmatprep.mubr.bf16.mxu0 %v1113_v48  ;;  %v1087_v52 = vld [vmem:[%s1420_s4 + $0x84] ss:$8 sps:$4 sm:$0xff]   ;;  %v1090_v54 = vld [vmem:[%s1420_s4 + $0x94] ss:$8 sps:$4 sm:$0xff]   ;;  %v1092_v55 = vld [vmem:[%s1420_s4 + $0x90] ss:$8 sps:$4 sm:$0xff]  }
  0x56   : > { %659 = vmatprep.subr.bf16.mxu0 %v1069_v39  ;;  %v1093_v56 = vld [vmem:[%s1420_s4 + $0xa4] ss:$8 sps:$4 sm:$0xff]   ;;  %v1095_v57 = vld [vmem:[%s1420_s4 + $0xa0] ss:$8 sps:$4 sm:$0xff]   ;;  %v1096_v58 = vld [vmem:[%s1420_s4 + $0xb4] ss:$8 sps:$4 sm:$0xff]  }
  0x57   : > { %v1098_v59 = vld [vmem:[%s1420_s4 + $0xb0] ss:$8 sps:$4 sm:$0xff]   ;;  %v1099_v60 = vld [vmem:[%s1420_s4 + $0xc4] ss:$8 sps:$4 sm:$0xff]   ;;  %v1101_v61 = vld [vmem:[%s1420_s4 + $0xc0] ss:$8 sps:$4 sm:$0xff]  }
  0x58   : > { %v1102_v62 = vld [vmem:[%s1420_s4 + $0xd4] ss:$8 sps:$4 sm:$0xff]   ;;  %v1104_v63 = vld [vmem:[%s1420_s4 + $0xd0] ss:$8 sps:$4 sm:$0xff]   ;;  %v1105_v0 = vld [vmem:[%s1420_s4 + $0xe4] ss:$8 sps:$4 sm:$0xff]  }
  0x59   : > { %660 = vmatpush1.bf16.msra.mxu0 %v1071_v40  ;;  %v1107_v1 = vld [vmem:[%s1420_s4 + $0xe0] ss:$8 sps:$4 sm:$0xff]   ;;  %v1108_v2 = vld [vmem:[%s1420_s4 + $0xf4] ss:$8 sps:$4 sm:$0xff]   ;;  %v1110_v3 = vld [vmem:[%s1420_s4 + $0xf0] ss:$8 sps:$4 sm:$0xff]  }
  0x5a   : > { %661 = vmatprep.subr.bf16.mxu0 %v1072_v41  ;;  %v1111_v4 = vld [vmem:[%s393_s26] ss:$8 sps:$4 sm:$0xff]   ;;  %p961_p5 = scmp.ne.s32.totalorder %s1184_s18, 7 }
  0x5b   : > { %v447_v5 = vld [vmem:[#allocation2] sm:$0xff]  ;;  %v448_v6 = vld [vmem:[#allocation2 + $0x8] sm:$0xff]  ;;  %v449_v8 = vld [vmem:[#allocation2 + $0x10] sm:$0xff]  ;;  %v717_v18 = vlaneseq (!%p961_p5) }
  0x5c   : > { %v450_v11 = vld [vmem:[#allocation2 + $0x18] sm:$0xff]  ;;  %v714_v17 = vld [vmem:[%s435_s29] sm:$0x3] (!%p961_p5) }
  0x5d   : > { %662 = vmatpush1.bf16.msra.mxu0 %v1074_v42  ;;  %v715_v19 = vunpack.c.l.bf16 (!%p961_p5), %v714_v17  ;;  %v718_v20 = vshrl.u32 (!%p961_p5), %v717_v18, 7 }
  0x5e   : > { %663 = vmatprep.subr.bf16.mxu0 %v1075_v43 }
  0x5f   : > { %v719_v21 = vsub.s32 (!%p961_p5), 0, %v718_v20  ;;  %v723_v22 = vsub.s32 (!%p961_p5), 2, %v718_v20 }
  0x61   : > { %664 = vmatpush1.bf16.msra.mxu0 %v1077_v44  ;;  %v720_v24 = vrot.slane (!%p961_p5), %v715_v19, %v719_v21  ;;  %v724_v25 = vrot.slane (!%p961_p5), %v715_v19, %v723_v22 }
  0x62   : > { %665 = vmatprep.subr.bf16.mxu0 %v1078_v45 }
  0x63   : > { %v730_v29 = vrot.slane (!%p961_p5), %v720_v24, %v719_v21  ;;  %v734_v30 = vrot.slane (!%p961_p5), %v724_v25, %v719_v21 }
  0x65   : > { %666 = vmatpush1.bf16.msra.mxu0 %v1080_v46 }
  0x66   : > { %667 = vmatprep.subr.bf16.mxu0 %v1081_v47 }
  0x69   : > { %668 = vmatpush1.bf16.msra.mxu0 %v1083_v49 }
  0x6a   : > { %669 = vmatprep.subr.bf16.mxu0 %v1084_v50 }
  0x6d   : > { %670 = vmatpush1.bf16.msra.mxu0 %v1086_v51 }
  0x6e   : > { %671 = vmatprep.subr.bf16.mxu0 %v1087_v52 }
  0x71   : > { %672 = vmatpush1.bf16.msra.mxu0 %v1089_v53 }
  0x72   : > { %673 = vmatprep.subr.bf16.mxu0 %v1090_v54 }
  0x75   : > { %674 = vmatpush1.bf16.msra.mxu0 %v1092_v55 }
  0x76   : > { %675 = vmatprep.subr.bf16.mxu0 %v1093_v56 }
  0x79   : > { %676 = vmatpush1.bf16.msra.mxu0 %v1095_v57 }
  0x7a   : > { %677 = vmatprep.subr.bf16.mxu0 %v1096_v58 }
  0x7d   : > { %678 = vmatpush1.bf16.msra.mxu0 %v1098_v59 }
  0x7e   : > { %679 = vmatprep.subr.bf16.mxu0 %v1099_v60 }
  0x81   : > { %680 = vmatpush1.bf16.msra.mxu0 %v1101_v61 }
  0x82   : > { %681 = vmatprep.subr.bf16.mxu0 %v1102_v62 }
  0x85   : > { %682 = vmatpush1.bf16.msra.mxu0 %v1104_v63 }
  0x86   : > { %683 = vmatprep.subr.bf16.mxu0 %v1105_v0 }
  0x89   : > { %684 = vmatpush1.bf16.msra.mxu0 %v1107_v1 }
  0x8a   : > { %685 = vmatprep.subr.bf16.mxu0 %v1108_v2 }
  0x8d   : > { %686 = vmatpush1.bf16.msra.mxu0 %v1110_v3 }
  0x90   : > { %688 = vmatmul.mubr.bf16.vlgmr.msra.gmra.mrb[0].mxu0 %v1111_v4 }
 0x163   : > { %v689_v7 = vpop.f32.mrb[0].mxu0  ;;  %709 = sbr.rel (%p961_p5) target bundleno = 374 (0x176), region = 116 }
 0x164   : > { %v698_v9 = vadd.f32 %v689_v7, %v447_v5  ;;  %v691_v10 = vpop.f32.mrb[1].mxu0 }
 0x165   : > { %v699_v12 = vadd.f32 %v691_v10, %v448_v6  ;;  %v693_v13 = vpop.f32.mrb[2].mxu0 }
 0x166   : > { %702 = vst [vmem:[#allocation2] sm:$0xff] %v698_v9  ;;  %v700_v14 = vadd.f32 %v693_v13, %v449_v8  ;;  %v695_v15 = vpop.f32.mrb[3].mxu0 }
 0x167   : > { %703 = vst [vmem:[#allocation2 + $0x8] sm:$0xff] %v699_v12  ;;  %v701_v16 = vadd.f32 %v695_v15, %v450_v11 }
 0x168   : > { %704 = vst [vmem:[#allocation2 + $0x10] sm:$0xff] %v700_v14 }
 0x169   : > { %705 = vst [vmem:[#allocation2 + $0x18] sm:$0xff] %v701_v16 }
 0x16d   : > { %v710_v23 = vld [vmem:[#allocation2] sm:$0xff] }
 0x16e   : > { %v711_v26 = vld [vmem:[#allocation2 + $0x8] sm:$0xff]  ;;  %v735_v31 = vadd.f32 %v730_v29, %v710_v23 }
 0x16f   : > { %v712_v27 = vld [vmem:[#allocation2 + $0x10] sm:$0xff]  ;;  %v736_v32 = vadd.f32 %v734_v30, %v711_v26 }
 0x170   : > { %v713_v28 = vld [vmem:[#allocation2 + $0x18] sm:$0xff]  ;;  %v737_v33 = vadd.f32 %v730_v29, %v712_v27 }
 0x171   : > { %v738_v34 = vadd.f32 %v734_v30, %v713_v28  ;;  %v971_v35 = vpack.c.bf16 %v736_v32, %v735_v31 }
 0x173   : > { %v972_v36 = vpack.c.bf16 %v738_v34, %v737_v33  ;;  %751 = vst [vmem:[%s1422_s16] sm:$0xff] %v971_v35 }
 0x175   : > { %752 = vst [vmem:[%s1422_s16 + $0x8] sm:$0xff] %v972_v36 }
 0x176 PF: > { %759 = sbr.rel (!%p1317_p12) target bundleno = 382 (0x17e), region = 120  ;;  %s973_s18 = sshll.u32 (%p1317_p12), %s1188_s19, 3 }
 0x177   : > { %s765_s25 = scalar_lea.vmem (%p1317_p12), %s1513_s3, %s973_s18 }
 0x17a   : > { %v795_v37 = vld [vmem:[%s1422_s16] sm:$0xff] (%p1317_p12) }
 0x17b   : > { %796 = vst [vmem:[%s765_s25] sm:$0xff] (%p1317_p12), %v795_v37 }
 0x17c   : > { %v797_v38 = vld [vmem:[%s1422_s16 + $0x8] sm:$0xff] (%p1317_p12) }
 0x17d   : > { %798 = vst [vmem:[%s765_s25 + $0x10] sm:$0xff] %v797_v38 }
 0x17e PF: > { %s13_s22 = sadd.s32 1, %s1200_s22   ;;  %s1522_s10 = sld [smem:[#allocation8_spill]] }
 0x17f   : > { %p10_p6 = scmp.ge.s32.totalorder %s13_s22, 18   ;;  %s1523_s30 = sld [smem:[#allocation6_spill]] }
 0x180   : > { %s1524_s27 = sld [smem:[#allocation7_spill]]  ;;  %s1525_s12 = smov %s1164_s13 }
 0x181   : > { %s1526_s13 = smov %s1315_s9  ;;  %s1527_s14 = smov %s1172_s15 }
 0x182   : > { %s1528_s15 = smov %s1312_s8  ;;  %s1529_s16 = smov %s1180_s17 }
 0x183   : > { %s1531_s18 = smov %s1192_s20  ;;  %s1532_s19 = smov %s1196_s21 }
 0x184   : > { %s1530_s17 = smov %s1522_s10  ;;  %12 = sbr.rel (!%p10_p6) target bundleno = 6 (0x6), region = 200 }
 0x185   : > { %s1533_s20 = smov %s1523_s30 }
 0x186   : > { %s1534_s21 = smov %s1524_s27 }

// kernel: no_leaf_forward.10
= control target key start
LH: loop header
LB: loop body
LE: loop exit
PB: predicated region body
PF: predicated region fallthrough
CT: control target
= control target key end

     0   :  { %7 = vsyncpa [#allocation5], 0  ;;  %s1315_s0 = inlined_call_operand.vmem [shape: bf16[16,2048], index: 0, kind: input, shape index: {}]   ;;  %s1316_s1 = inlined_call_operand.hbm [shape: bf16[2048,2048], index: 1, kind: input, shape index: {}]   ;;  %s1317_s2 = inlined_call_operand.vmem [shape: bf16[16,2048], index: 2, kind: output, shape index: {}]  }
   0x1   :  { %9 = vsyncpa [#allocation5 + $0x1], 0  ;;  %s1060_s9 = smov 0   ;;  %s1062_s10 = smov 0  }
   0x2   :  { %s1064_s11 = smov 0   ;;  %s1066_s12 = smov 0  }
   0x3   :  { %s1068_s13 = smov 0   ;;  %s1070_s14 = smov 0  }
   0x4   :  { %s1072_s15 = smov 0   ;;  %s1074_s16 = smov 0  }
   0x5   :  { %s1076_s17 = smov 0   ;;  %s1078_s18 = smov 0  }
   0x6   :  { %s1080_s19 = smov 0   ;;  %s1082_s20 = smov 0  }
   0x7 LB: > { %1321 = sst [smem:[#allocation8_spill]] %s1018_s15  ;;  %s695_s21 = sadd.s32 4294967295, %s1038_s20   ;;  %s1038_s20 = sphi %s1082_s20, %s15_s20   ;;  %s1034_s19 = sphi %s1080_s19, %s1344_s19   ;;  %s1030_s18 = sphi %s1078_s18, %s1343_s18   ;;  %s1026_s17 = sphi %s1076_s17, %s1342_s17   ;;  %s1022_s16 = sphi %s1074_s16, %s1341_s16   ;;  %s1018_s15 = sphi %s1072_s15, %s1333_s15   ;;  %s1014_s14 = sphi %s1070_s14, %s1332_s14   ;;  %s1010_s13 = sphi %s1068_s13, %s1340_s13   ;;  %s1006_s12 = sphi %s1066_s12, %s1339_s12   ;;  %s1002_s11 = sphi %s1064_s11, %s1338_s11   ;;  %s998_s10 = sphi %s1062_s10, %s1337_s10   ;;  %s994_s9 = sphi %s1060_s9, %s1336_s9  }
   0x8   : > { %s27_s22 = sadd.s32 1, %s1030_s18  ;;  %s30_s23 = sadd.s32 1, %s1034_s19 }
   0x9   : > { %p28_p0 = scmp.ge.s32.totalorder %s27_s22, 8  ;;  %s43_s24 = sadd.s32 1, %s1018_s15 }
   0xa   : > { %p50_p1 = scmp.ne.s32.totalorder %s1018_s15, %s1014_s14  ;;  %p51_p2 = scmp.eq.s32.totalorder %s1038_s20, 0 }
   0xb   : > { %s1346_s22 = smov (%p28_p0, %s27_s22), 0  ;;  %s1348_s23 = smov (!%p28_p0, %s30_s23), %s1034_s19 }
   0xc   : > { %1322 = sst [smem:[#allocation9_spill]] %s1346_s22  ;;  %s39_s25 = ssub.s32 %s1030_s18, %s1346_s22 }
   0xd   : > { %p32_p3 = scmp.ge.s32.totalorder %s1348_s23, 8  ;;  %p41_p4 = scmp.eq.s32.totalorder %s39_s25, 0 }
   0xe   : > { %p1132_p5 = por %p51_p2, %p50_p1  ;;  %s71_s27 = sadd.s32 1, %s1010_s13 }
   0xf   : > { %s1350_s23 = smov (%p32_p3, %s1348_s23), 0  ;;  %p78_p6 = scmp.ne.s32.totalorder %s1010_s13, %s1006_s12 }
  0x10   : > { %1324 = sst [smem:[#allocation10_spill]] %s1350_s23  ;;  %s67_s29 = ssub.s32 %s1034_s19, %s1350_s23 }
  0x11   : > { %s1140_s28 = scalar_select %p41_p4, %s1018_s15, %s43_s24  }
  0x12   : > { %s68_s30 = sor.u32 %s67_s29, %s39_s25  ;;  %p84_p7 = scmp.ne.s32.totalorder %s1006_s12, %s1002_s11 }
  0x13   : > { %1325 = sst [smem:[#allocation11_spill]] %s1140_s28  ;;  %p69_p8 = scmp.eq.s32.totalorder %s68_s30, 0 }
  0x14   : > { %p1148_p9 = por %p78_p6, %p51_p2  ;;  %p85_p10 = scmp.eq.s32.totalorder %s695_s21, 0 }
  0x15   : > { %p97_p11 = scmp.eq.s32.totalorder %s67_s29, 0  ;;  %s99_s6 = sadd.s32 1, %s998_s10 }
  0x16   : > { %s1155_s4 = scalar_select %p69_p8, %s1010_s13, %s71_s27  }
  0x17   : > { %p1157_p12 = por %p85_p10, %p84_p7  ;;  %p109_p13 = scmp.ne.s32.totalorder %s998_s10, %s994_s9 }
  0x18   : > { %1327 = sst [smem:[#allocation12_spill]] %s1155_s4  ;;  %p110_p0 = scmp.eq.s32.totalorder %s695_s21, 63 }
  0x19   : > { %s1163_s7 = scalar_select %p97_p11, %s998_s10, %s99_s6  }
  0x1a   : > { %p1169_p1 = por %p110_p0, %p109_p13  ;;  %p698_p2 = scmp.ge.s32.totalorder %s1038_s20, 64 }
  0x1c   : > { %s1329_s8 = scalar_select %p1169_p1, 1, 0 }
  0x1d   : > { %132 = sbr.rel (%p698_p2) target bundleno = 72 (0x48), region = 16 }
  0x24   : > { %135 = sbr.rel (!%p1132_p5) target bundleno = 43 (0x2b), region = 20  ;;  %s137_s11 = sand.u32 (%p1132_p5), 1, %s1018_s15  }
  0x25   : > { %s754_s24 = sshll.u32 (%p1132_p5), %s1030_s18, 3  ;;  %s699_s25 = sshll.u32 (%p1132_p5), %s137_s11, 4 }
  0x26   : > { %s145_s30 = scalar_lea.vmem (%p1132_p5), %s1315_s0, %s754_s24  ;;  %s139_s21 = scalar_lea.vmem (%p1132_p5), [#allocation3], %s699_s25 }
  0x27   : > { %v175_v0 = vld [vmem:[%s145_s30] sm:$0xff] (%p1132_p5) }
  0x28   : > { %v177_v1 = vld [vmem:[%s145_s30 + $0x40] sm:$0xff] (%p1132_p5)  ;;  %176 = vst [vmem:[%s139_s21] sm:$0xff] (%p1132_p5), %v175_v0 }
  0x29   : > { %178 = vst [vmem:[%s139_s21 + $0x8] sm:$0xff] (%p1132_p5), %v177_v1 }
  0x2b PF: > { %s185_s26 = sand.u32 1, %s1010_s13   ;;  %s704_s6 = sshll.u32 %s1034_s19, 1 }
  0x2c   : > { %s702_s23 = sshll.u32 %s185_s26, 8  ;;  %s755_s22 = sshll.u32 %s1030_s18, 9 }
  0x2d   : > { %s196_s28 = sadd.s32 %s755_s22, %s704_s6  ;;  %s189_s11 = scalar_lea.vmem [#allocation4], %s702_s23 }
  0x2e   : > { %s199_s15 = sshll.u32 %s189_s11, 4  ;;  %s706_s4 = sshll.u32 %s196_s28, 6  ;;  %s1184_s15 = int_to_ptr.vmem [resolvable:$true] %s199_s15 }
  0x2f   : > { %s1189_s25 = scalar_lea.hbm %s1316_s1, %s706_s4  ;;  %s1191_s29 = scalar_lea.sflag [#allocation5], %s185_s26 }
  0x30   : > { %s912_s30 = scalar_lea.hbm %s1189_s25, 4096  ;;  %s916_s28 = scalar_lea.hbm %s1316_s1, 262144 }
  0x31   : > { %p913_p3 = scmp.ne.s32.totalorder %s1189_s25, %s912_s30  ;;  %p917_p6 = scmp.lt.u32.totalorder %s1189_s25, %s1316_s1 }
  0x32   : > { %p918_p7 = scmp.lt.u32.totalorder %s916_s28, %s912_s30  ;;  %p920_p10 = scmp.lt.u32.totalorder %s912_s30, %s1189_s25 }
  0x33   : > { %p914_p4 = pnand %p913_p3, %p1148_p9 }
  0x34   : > { %p919_p8 = por %p918_p7, %p917_p6 }
  0x35   : > { %p915_p5 = pneg %p914_p4 }
  0x36   : > { %p921_p11 = por %p920_p10, %p919_p8 }
  0x38   : > { %p922_p13 = pnand %p921_p11, %p915_p5 }
  0x3a   : > { %925 = shalt.err (!%p922_p13)
}
  0x3b   : > { %s926_s4 = scalar_lea.vmem %s1184_s15, 4096  ;;  %s1040_s26 = smov [#allocation4]  }
  0x3c   : > { %p927_p0 = scmp.ne.s32.totalorder %s1184_s15, %s926_s4  ;;  %s930_s11 = sshll.u32 %s1040_s26, 4  ;;  %s931_s11 = int_to_ptr.vmem [resolvable:$false] %s930_s11 }
  0x3d   : > { %s932_s24 = scalar_lea.vmem %s931_s11, 8192  ;;  %p933_p4 = scmp.lt.s32.totalorder %s1184_s15, %s931_s11 }
  0x3e   : > { %p928_p2 = pnand %p927_p0, %p1148_p9  ;;  %p934_p1 = scmp.lt.s32.totalorder %s932_s24, %s926_s4 }
  0x40   : > { %p929_p3 = pneg %p928_p2  ;;  %p935_p6 = por %p934_p1, %p933_p4 }
  0x42   : > { %p936_p7 = pnand %p935_p6, %p929_p3 }
  0x44   : > { %939 = shalt.err (!%p936_p7)
}
  0x45   : > { %s1041_s27 = smov 1024   ;;  %s1042_s30 = smov 128  }
  0x46   : > { %s1043_s22 = smov 8  }
  0x47   : > { %759 = dma.hbm_to_vmem [thread:$0]  (%p1148_p9), %s1189_s25, 4096, %s1184_s15, %s1191_s29, %s1041_s27, %s1042_s30, %s1043_s22  }
  0x48 PF: > { %p707_p5 = scmp.ge.s32.totalorder %s1038_s20, 1  ;;  %p207_p8 = scmp.lt.s32.totalorder %s1038_s20, 65 }
  0x4a   : > { %p208_p10 = pnand %p707_p5, %p207_p8 }
  0x4b   : > { %s214_s23 = sand.u32 (!%p208_p10), 1, %s1014_s14   ;;  %s220_s28 = sand.u32 (!%p208_p10), 1, %s1006_s12  }
  0x4c   : > { %211 = sbr.rel (%p208_p10) target bundleno = 395 (0x18b), region = 62  ;;  %s1219_s21 = sshll.u32 (!%p208_p10), %s214_s23, 4 }
  0x4d   : > { %s709_s6 = sshll.u32 (!%p208_p10), %s220_s28, 8  ;;  %s216_s4 = scalar_lea.vmem (!%p208_p10), [#allocation3], %s1219_s21 }
  0x4e   : > { %s221_s26 = scalar_lea.sflag (!%p208_p10), [#allocation5], %s220_s28  ;;  %s1222_s3 = scalar_lea.vmem (!%p208_p10), [#allocation4], %s709_s6 }
  0x53   : > { %989 = dma.done.wait (%p1157_p12), %s221_s26, 4096  }
  0x54   : > { %991 = vsyncadd (%p1157_p12), %s221_s26, 4294963200  ;;  %s245_s15 = sand.u32 1, %s994_s9   ;;  %p711_p9 = scmp.ne.s32.totalorder %s1022_s16, 0 }
  0x55   : > { %s710_s25 = sshll.u32 %s245_s15, 4  ;;  %v1044_v2 = vmov (!%p711_p9), 0.0  }
  0x56   : > { %s1229_s29 = scalar_lea.vmem [#allocation6], %s710_s25  ;;  %257 = sbr.rel (%p711_p9) target bundleno = 93 (0x5d), region = 74  ;;  %258 = vst [vmem:[#allocation2] sm:$0xff] (!%p711_p9), %v1044_v2  ;;  %259 = vst [vmem:[#allocation2 + $0x8] sm:$0xff] (!%p711_p9), %v1044_v2 }
  0x57   : > { %260 = vst [vmem:[#allocation2 + $0x10] sm:$0xff] (!%p711_p9), %v1044_v2  ;;  %261 = vst [vmem:[#allocation2 + $0x18] sm:$0xff] (!%p711_p9), %v1044_v2 }
  0x5d PF: > { %v861_v3 = vld [vmem:[%s1222_s3 + $0x4] ss:$8 sps:$4 sm:$0xff]   ;;  %v863_v4 = vld [vmem:[%s1222_s3] ss:$8 sps:$4 sm:$0xff]   ;;  %v864_v5 = vld [vmem:[%s1222_s3 + $0x14] ss:$8 sps:$4 sm:$0xff]  }
  0x5e   : > { %470 = vmatprep.subr.bf16.mxu0 %v861_v3  ;;  %v866_v6 = vld [vmem:[%s1222_s3 + $0x10] ss:$8 sps:$4 sm:$0xff]   ;;  %v867_v7 = vld [vmem:[%s1222_s3 + $0x24] ss:$8 sps:$4 sm:$0xff]   ;;  %v869_v8 = vld [vmem:[%s1222_s3 + $0x20] ss:$8 sps:$4 sm:$0xff]  }
  0x5f   : > { %471 = vmatpush1.bf16.msra.mxu0 %v863_v4  ;;  %v870_v9 = vld [vmem:[%s1222_s3 + $0x34] ss:$8 sps:$4 sm:$0xff]   ;;  %v872_v10 = vld [vmem:[%s1222_s3 + $0x30] ss:$8 sps:$4 sm:$0xff]   ;;  %v873_v11 = vld [vmem:[%s1222_s3 + $0x44] ss:$8 sps:$4 sm:$0xff]  }
  0x60   : > { %472 = vmatprep.subr.bf16.mxu0 %v864_v5  ;;  %v875_v12 = vld [vmem:[%s1222_s3 + $0x40] ss:$8 sps:$4 sm:$0xff]   ;;  %v876_v13 = vld [vmem:[%s1222_s3 + $0x54] ss:$8 sps:$4 sm:$0xff]   ;;  %v878_v14 = vld [vmem:[%s1222_s3 + $0x50] ss:$8 sps:$4 sm:$0xff]  }
  0x61   : > { %v879_v15 = vld [vmem:[%s1222_s3 + $0x64] ss:$8 sps:$4 sm:$0xff]   ;;  %v881_v17 = vld [vmem:[%s1222_s3 + $0x60] ss:$8 sps:$4 sm:$0xff]   ;;  %v882_v18 = vld [vmem:[%s1222_s3 + $0x74] ss:$8 sps:$4 sm:$0xff]  }
  0x62   : > { %v911_v16 = vld [vmem:[%s216_s4 + $0x4] ss:$8 sps:$4 sm:$0xff]   ;;  %v884_v19 = vld [vmem:[%s1222_s3 + $0x70] ss:$8 sps:$4 sm:$0xff]   ;;  %v887_v21 = vld [vmem:[%s1222_s3 + $0x80] ss:$8 sps:$4 sm:$0xff]  }
  0x63   : > { %473 = vmatpush1.bf16.msra.mxu0 %v866_v6  ;;  %502 = vmatprep.mubr.bf16.mxu0 %v911_v16  ;;  %v885_v20 = vld [vmem:[%s1222_s3 + $0x84] ss:$8 sps:$4 sm:$0xff]   ;;  %v888_v22 = vld [vmem:[%s1222_s3 + $0x94] ss:$8 sps:$4 sm:$0xff]   ;;  %v890_v23 = vld [vmem:[%s1222_s3 + $0x90] ss:$8 sps:$4 sm:$0xff]  }
  0x64   : > { %474 = vmatprep.subr.bf16.mxu0 %v867_v7  ;;  %v891_v24 = vld [vmem:[%s1222_s3 + $0xa4] ss:$8 sps:$4 sm:$0xff]   ;;  %v893_v25 = vld [vmem:[%s1222_s3 + $0xa0] ss:$8 sps:$4 sm:$0xff]   ;;  %v894_v26 = vld [vmem:[%s1222_s3 + $0xb4] ss:$8 sps:$4 sm:$0xff]  }
  0x65   : > { %v896_v27 = vld [vmem:[%s1222_s3 + $0xb0] ss:$8 sps:$4 sm:$0xff]   ;;  %v897_v28 = vld [vmem:[%s1222_s3 + $0xc4] ss:$8 sps:$4 sm:$0xff]   ;;  %v899_v29 = vld [vmem:[%s1222_s3 + $0xc0] ss:$8 sps:$4 sm:$0xff]  }
  0x66   : > { %v900_v30 = vld [vmem:[%s1222_s3 + $0xd4] ss:$8 sps:$4 sm:$0xff]   ;;  %v902_v31 = vld [vmem:[%s1222_s3 + $0xd0] ss:$8 sps:$4 sm:$0xff]   ;;  %v903_v32 = vld [vmem:[%s1222_s3 + $0xe4] ss:$8 sps:$4 sm:$0xff]  }
  0x67   : > { %475 = vmatpush1.bf16.msra.mxu0 %v869_v8  ;;  %v905_v33 = vld [vmem:[%s1222_s3 + $0xe0] ss:$8 sps:$4 sm:$0xff]   ;;  %v906_v34 = vld [vmem:[%s1222_s3 + $0xf4] ss:$8 sps:$4 sm:$0xff]   ;;  %v908_v35 = vld [vmem:[%s1222_s3 + $0xf0] ss:$8 sps:$4 sm:$0xff]  }
  0x68   : > { %476 = vmatprep.subr.bf16.mxu0 %v870_v9  ;;  %v909_v36 = vld [vmem:[%s216_s4] ss:$8 sps:$4 sm:$0xff]   ;;  %p746_p12 = scmp.ne.s32.totalorder %s1022_s16, 7 }
  0x69   : > { %v262_v37 = vld [vmem:[#allocation2] sm:$0xff]  ;;  %v263_v38 = vld [vmem:[#allocation2 + $0x8] sm:$0xff]  ;;  %v264_v40 = vld [vmem:[#allocation2 + $0x10] sm:$0xff] }
  0x6a   : > { %v265_v43 = vld [vmem:[#allocation2 + $0x18] sm:$0xff] }
  0x6b   : > { %477 = vmatpush1.bf16.msra.mxu0 %v872_v10 }
  0x6c   : > { %478 = vmatprep.subr.bf16.mxu0 %v873_v11 }
  0x6f   : > { %479 = vmatpush1.bf16.msra.mxu0 %v875_v12 }
  0x70   : > { %480 = vmatprep.subr.bf16.mxu0 %v876_v13 }
  0x73   : > { %481 = vmatpush1.bf16.msra.mxu0 %v878_v14 }
  0x74   : > { %482 = vmatprep.subr.bf16.mxu0 %v879_v15 }
  0x77   : > { %483 = vmatpush1.bf16.msra.mxu0 %v881_v17 }
  0x78   : > { %484 = vmatprep.subr.bf16.mxu0 %v882_v18 }
  0x7b   : > { %485 = vmatpush1.bf16.msra.mxu0 %v884_v19 }
  0x7c   : > { %486 = vmatprep.subr.bf16.mxu0 %v885_v20 }
  0x7f   : > { %487 = vmatpush1.bf16.msra.mxu0 %v887_v21 }
  0x80   : > { %488 = vmatprep.subr.bf16.mxu0 %v888_v22 }
  0x83   : > { %489 = vmatpush1.bf16.msra.mxu0 %v890_v23 }
  0x84   : > { %490 = vmatprep.subr.bf16.mxu0 %v891_v24 }
  0x87   : > { %491 = vmatpush1.bf16.msra.mxu0 %v893_v25 }
  0x88   : > { %492 = vmatprep.subr.bf16.mxu0 %v894_v26 }
  0x8b   : > { %493 = vmatpush1.bf16.msra.mxu0 %v896_v27 }
  0x8c   : > { %494 = vmatprep.subr.bf16.mxu0 %v897_v28 }
  0x8f   : > { %495 = vmatpush1.bf16.msra.mxu0 %v899_v29 }
  0x90   : > { %496 = vmatprep.subr.bf16.mxu0 %v900_v30 }
  0x93   : > { %497 = vmatpush1.bf16.msra.mxu0 %v902_v31 }
  0x94   : > { %498 = vmatprep.subr.bf16.mxu0 %v903_v32 }
  0x97   : > { %499 = vmatpush1.bf16.msra.mxu0 %v905_v33 }
  0x98   : > { %500 = vmatprep.subr.bf16.mxu0 %v906_v34 }
  0x9b   : > { %501 = vmatpush1.bf16.msra.mxu0 %v908_v35 }
  0x9e   : > { %503 = vmatmul.mubr.bf16.vlgmr.msra.gmra.mrb[0].mxu0 %v909_v36 }
 0x171   : > { %v504_v39 = vpop.f32.mrb[0].mxu0  ;;  %524 = sbr.rel (%p746_p12) target bundleno = 386 (0x182), region = 78 }
 0x172   : > { %v513_v41 = vadd.f32 %v504_v39, %v262_v37  ;;  %v506_v42 = vpop.f32.mrb[1].mxu0 }
 0x173   : > { %v514_v44 = vadd.f32 %v506_v42, %v263_v38  ;;  %v508_v45 = vpop.f32.mrb[2].mxu0 }
 0x174   : > { %517 = vst [vmem:[#allocation2] sm:$0xff] %v513_v41  ;;  %v515_v46 = vadd.f32 %v508_v45, %v264_v40  ;;  %v510_v47 = vpop.f32.mrb[3].mxu0 }
 0x175   : > { %518 = vst [vmem:[#allocation2 + $0x8] sm:$0xff] %v514_v44  ;;  %v516_v48 = vadd.f32 %v510_v47, %v265_v43 }
 0x176   : > { %519 = vst [vmem:[#allocation2 + $0x10] sm:$0xff] %v515_v46 }
 0x177   : > { %520 = vst [vmem:[#allocation2 + $0x18] sm:$0xff] %v516_v48 }
 0x17b   : > { %v525_v49 = vld [vmem:[#allocation2] sm:$0xff] }
 0x17c   : > { %v526_v50 = vld [vmem:[#allocation2 + $0x8] sm:$0xff] }
 0x17d   : > { %v527_v51 = vld [vmem:[#allocation2 + $0x10] sm:$0xff]  ;;  %v756_v52 = vpack.c.bf16 %v526_v50, %v525_v49 }
 0x17e   : > { %v528_v53 = vld [vmem:[#allocation2 + $0x18] sm:$0xff] }
 0x17f   : > { %v757_v54 = vpack.c.bf16 %v528_v53, %v527_v51  ;;  %541 = vst [vmem:[%s1229_s29] sm:$0xff] %v756_v52 }
 0x181   : > { %542 = vst [vmem:[%s1229_s29 + $0x8] sm:$0xff] %v757_v54 }
 0x182 PF: > { %p1330_p1 = scmp.ne.s32.totalorder %s1329_s8, 0 }
 0x183   : > { %s758_s9 = sshll.u32 (%p1330_p1), %s1026_s17, 3 }
 0x184   : > { %549 = sbr.rel (!%p1330_p1) target bundleno = 395 (0x18b), region = 82  ;;  %s555_s5 = scalar_lea.vmem (%p1330_p1), %s1317_s2, %s758_s9 }
 0x186   : > { %v585_v55 = vld [vmem:[%s1229_s29] sm:$0xff] (%p1330_p1) }
 0x187   : > { %586 = vst [vmem:[%s555_s5] sm:$0xff] (%p1330_p1), %v585_v55 }
 0x188   : > { %v587_v56 = vld [vmem:[%s1229_s29 + $0x8] sm:$0xff] (%p1330_p1) }
 0x189   : > { %588 = vst [vmem:[%s555_s5 + $0x40] sm:$0xff] (%p1330_p1), %v587_v56 }
 0x18b PF: > { %s15_s20 = sadd.s32 1, %s1038_s20   ;;  %s1331_s8 = sld [smem:[#allocation12_spill]] }
 0x18c   : > { %p12_p11 = scmp.ge.s32.totalorder %s15_s20, 66   ;;  %s1332_s14 = sld [smem:[#allocation8_spill]] }
 0x18d   : > { %s1333_s15 = sld [smem:[#allocation11_spill]]  ;;  %s1334_s24 = sld [smem:[#allocation9_spill]] }
 0x18e   : > { %s1335_s27 = sld [smem:[#allocation10_spill]]  ;;  %s1336_s9 = smov %s998_s10 }
 0x18f   : > { %s1337_s10 = smov %s1163_s7  ;;  %s1338_s11 = smov %s1006_s12 }
 0x190   : > { %s1339_s12 = smov %s1010_s13  ;;  %s1341_s16 = smov %s1030_s18 }
 0x191   : > { %s1340_s13 = smov %s1331_s8  ;;  %s1342_s17 = smov %s1034_s19 }
 0x192   :  { %14 = sbr.rel (!%p12_p11) target bundleno = 7 (0x7), region = 160 }
 0x193   : > { %s1343_s18 = smov %s1334_s24 }
 0x194   : > { %s1344_s19 = smov %s1335_s27 }
 0x199   :  { %604 = vsyncpa [#allocation5], 1 }
 0x19a   :  { %606 = vsyncpa [#allocation5 + $0x1], 1 }

// kernel: no_leaf_forward.9
= control target key start
LH: loop header
LB: loop body
LE: loop exit
PB: predicated region body
PF: predicated region fallthrough
CT: control target
= control target key end

     0   :  { %s1551_s0 = inlined_call_operand.vmem [shape: bf16[16,1024], index: 0, kind: input, shape index: {}]   ;;  %s1552_s1 = inlined_call_operand.hbm [shape: bf16[1024,2048], index: 1, kind: input, shape index: {}]   ;;  %s1553_s2 = inlined_call_operand.hbm [shape: bf16[1,2048], index: 2, kind: input, shape index: {}]   ;;  %s1554_s3 = inlined_call_operand.vmem [shape: bf16[16,2048], index: 3, kind: output, shape index: {}]  }
   0x1   :  { %1560 = sst [smem:[#allocation18_spill]] %s1551_s0 }
   0x2   :  { %1561 = sst [smem:[#allocation19_spill]] %s1552_s1 }
   0x3   :  { %1562 = sst [smem:[#allocation20_spill]] %s1554_s3 }
   0x4   :  { %8 = vsyncpa [#allocation5], 0 }
   0x5   :  { %10 = vsyncpa [#allocation5 + $0x1], 0 }
   0x6   :  { %11 = vsyncpa [#allocation7], 0 }
   0x7   :  { %13 = vsyncpa [#allocation7 + $0x1], 0  ;;  %s1235_s12 = smov 0   ;;  %s1237_s13 = smov 0  }
   0x8   :  { %s1239_s14 = smov 0   ;;  %s1241_s15 = smov 0  }
   0x9   :  { %s1243_s16 = smov 0   ;;  %s1245_s17 = smov 0  }
   0xa   :  { %s1247_s18 = smov 0   ;;  %s1249_s19 = smov 0  }
   0xb   :  { %s1251_s20 = smov 0   ;;  %s1253_s21 = smov 0  }
   0xc   :  { %s1255_s22 = smov 0   ;;  %s1257_s23 = smov 0  }
   0xd   :  { %s1259_s24 = smov 0  }
   0xe LB: > { %1563 = sst [smem:[#allocation11_spill]] %s1187_s19  ;;  %s809_s25 = sadd.s32 4294967295, %s1207_s24   ;;  %s1207_s24 = sphi %s1259_s24, %s19_s24   ;;  %s1203_s23 = sphi %s1257_s23, %s1601_s23   ;;  %s1199_s22 = sphi %s1255_s22, %s1600_s22   ;;  %s1195_s21 = sphi %s1253_s21, %s1599_s21   ;;  %s1191_s20 = sphi %s1251_s20, %s1598_s20   ;;  %s1187_s19 = sphi %s1249_s19, %s1597_s19   ;;  %s1183_s18 = sphi %s1247_s18, %s1586_s18   ;;  %s1179_s17 = sphi %s1245_s17, %s1596_s17   ;;  %s1175_s16 = sphi %s1243_s16, %s1595_s16   ;;  %s1171_s15 = sphi %s1241_s15, %s1594_s15   ;;  %s1167_s14 = sphi %s1239_s14, %s1593_s14   ;;  %s1163_s13 = sphi %s1237_s13, %s1592_s13   ;;  %s1159_s12 = sphi %s1235_s12, %s1591_s12  }
   0xf   : > { %1564 = sst [smem:[#allocation12_spill]] %s1195_s21  ;;  %s31_s26 = sadd.s32 1, %s1199_s22 }
  0x10   : > { %p32_p0 = scmp.ge.s32.totalorder %s31_s26, 4  ;;  %s34_s27 = sadd.s32 1, %s1203_s23 }
  0x11   : > { %s47_s28 = sadd.s32 1, %s1187_s19  ;;  %p54_p1 = scmp.ne.s32.totalorder %s1187_s19, %s1183_s18 }
  0x12   : > { %s1603_s26 = smov (%p32_p0, %s31_s26), 0  ;;  %s1605_s27 = smov (!%p32_p0, %s34_s27), %s1203_s23 }
  0x13   : > { %1565 = sst [smem:[#allocation13_spill]] %s1603_s26  ;;  %s43_s29 = ssub.s32 %s1199_s22, %s1603_s26 }
  0x14   : > { %p55_p2 = scmp.eq.s32.totalorder %s1207_s24, 0  ;;  %p36_p3 = scmp.ge.s32.totalorder %s1605_s27, 8 }
  0x15   : > { %p45_p4 = scmp.eq.s32.totalorder %s43_s29, 0  ;;  %s75_s4 = sadd.s32 1, %s1179_s17 }
  0x16   : > { %p1314_p5 = por %p55_p2, %p54_p1  ;;  %s1607_s27 = smov (%p36_p3, %s1605_s27), 0 }
  0x17   : > { %1567 = sst [smem:[#allocation14_spill]] %s1607_s27  ;;  %s71_s6 = ssub.s32 %s1203_s23, %s1607_s27 }
  0x18   : > { %s1322_s5 = scalar_select %p45_p4, %s1187_s19, %s47_s28  }
  0x19   : > { %p82_p6 = scmp.ne.s32.totalorder %s1179_s17, %s1175_s16  ;;  %s72_s7 = sor.u32 %s71_s6, %s43_s29 }
  0x1a   : > { %1568 = sst [smem:[#allocation15_spill]] %s1322_s5  ;;  %p88_p7 = scmp.ne.s32.totalorder %s1175_s16, %s1171_s15 }
  0x1b   : > { %p73_p8 = scmp.eq.s32.totalorder %s72_s7, 0  ;;  %p1332_p9 = por %p82_p6, %p55_p2 }
  0x1c   : > { %p89_p10 = scmp.eq.s32.totalorder %s809_s25, 0  ;;  %p99_p11 = scmp.eq.s32.totalorder %s71_s6, 0 }
  0x1d   : > { %s1339_s9 = scalar_select %p73_p8, %s1179_s17, %s75_s4  }
  0x1e   : > { %p1341_p12 = por %p89_p10, %p88_p7  ;;  %s101_s11 = sadd.s32 1, %s1167_s14 }
  0x1f   : > { %1570 = sst [smem:[#allocation16_spill]] %s1339_s9  ;;  %p108_p13 = scmp.ne.s32.totalorder %s1167_s14, %s1163_s13 }
  0x20   : > { %s1571_s10 = scalar_select %p1341_p12, 1, 0 }
  0x21   : > { %s1347_s28 = scalar_select %p99_p11, %s1167_s14, %s101_s11  }
  0x22   : > { %p114_p0 = scmp.ne.s32.totalorder %s1163_s13, %s1159_s12  ;;  %p140_p1 = scmp.eq.s32.totalorder %s809_s25, 31 }
  0x23   : > { %1572 = sst [smem:[#allocation17_spill]] %s1347_s28  ;;  %p1357_p3 = por %p108_p13, %p55_p2 }
  0x24   : > { %p1361_p4 = por %p114_p0, %p89_p10  ;;  %p1365_p6 = por %p140_p1, %p108_p13 }
  0x25   : > { %p812_p7 = scmp.ge.s32.totalorder %s1207_s24, 32 }
  0x26   : > { %s1574_s29 = scalar_select %p1361_p4, 1, 0 }
  0x27   : > { %s1575_s4 = scalar_select %p1365_p6, 1, 0 }
  0x28   : > { %162 = sbr.rel (%p812_p7) target bundleno = 118 (0x76), region = 16 }
  0x2f   : > { %165 = sbr.rel (!%p1314_p5) target bundleno = 59 (0x3b), region = 20  ;;  %s167_s12 = sand.u32 (%p1314_p5), 1, %s1187_s19  }
  0x30   : > { %s872_s25 = sshll.u32 (%p1314_p5), %s1199_s22, 3  ;;  %s813_s6 = sshll.u32 (%p1314_p5), %s167_s12, 4 }
  0x31   : > { %s1576_s0 = sld [smem:[#allocation18_spill]] (%p1314_p5)  ;;  %s169_s26 = scalar_lea.vmem (%p1314_p5), [#allocation3], %s813_s6 }
  0x37   : > { %s175_s27 = scalar_lea.vmem %s1576_s0, %s872_s25 }
  0x38   : > { %v205_v0 = vld [vmem:[%s175_s27] sm:$0xff] }
  0x39   : > { %v207_v1 = vld [vmem:[%s175_s27 + $0x20] sm:$0xff]  ;;  %206 = vst [vmem:[%s169_s26] sm:$0xff] %v205_v0 }
  0x3a   : > { %208 = vst [vmem:[%s169_s26 + $0x8] sm:$0xff] %v207_v1 }
  0x3b PF: > { %s215_s30 = sand.u32 1, %s1179_s17   ;;  %s818_s5 = sshll.u32 %s1203_s23, 1 }
  0x3c   : > { %s816_s9 = sshll.u32 %s215_s30, 8  ;;  %s873_s19 = sshll.u32 %s1199_s22, 9 }
  0x3d   : > { %s226_s28 = sadd.s32 %s873_s19, %s818_s5  ;;  %s219_s12 = scalar_lea.vmem [#allocation4], %s816_s9 }
  0x3e   : > { %s229_s3 = sshll.u32 %s219_s12, 4  ;;  %s820_s21 = sshll.u32 %s226_s28, 6  ;;  %s1380_s3 = int_to_ptr.vmem [resolvable:$true] %s229_s3 }
  0x3f   : > { %s1577_s1 = sld [smem:[#allocation19_spill]]  ;;  %s1387_s26 = scalar_lea.sflag [#allocation5], %s215_s30 }
  0x45   : > { %s1385_s6 = scalar_lea.hbm %s1577_s1, %s820_s21  ;;  %s1045_s9 = scalar_lea.hbm %s1577_s1, 131072 }
  0x46   : > { %s1041_s7 = scalar_lea.hbm %s1385_s6, 4096  ;;  %p1046_p10 = scmp.lt.u32.totalorder %s1385_s6, %s1577_s1 }
  0x47   : > { %p1042_p2 = scmp.ne.s32.totalorder %s1385_s6, %s1041_s7  ;;  %p1047_p11 = scmp.lt.u32.totalorder %s1045_s9, %s1041_s7 }
  0x48   : > { %p1049_p0 = scmp.lt.u32.totalorder %s1041_s7, %s1385_s6 }
  0x49   : > { %p1043_p5 = pnand %p1042_p2, %p1332_p9  ;;  %p1048_p13 = por %p1047_p11, %p1046_p10 }
  0x4b   : > { %p1044_p8 = pneg %p1043_p5  ;;  %p1050_p1 = por %p1049_p0, %p1048_p13 }
  0x4d   : > { %p1051_p7 = pnand %p1050_p1, %p1044_p8 }
  0x4f   : > { %1054 = shalt.err (!%p1051_p7)
}
  0x50   : > { %s1055_s21 = scalar_lea.vmem %s1380_s3, 4096  ;;  %s1209_s30 = smov [#allocation4]  }
  0x51   : > { %p1056_p2 = scmp.ne.s32.totalorder %s1380_s3, %s1055_s21  ;;  %s1059_s12 = sshll.u32 %s1209_s30, 4  ;;  %s1060_s12 = int_to_ptr.vmem [resolvable:$false] %s1059_s12 }
  0x52   : > { %s1061_s25 = scalar_lea.vmem %s1060_s12, 8192  ;;  %p1062_p4 = scmp.lt.s32.totalorder %s1380_s3, %s1060_s12 }
  0x53   : > { %p1057_p5 = pnand %p1056_p2, %p1332_p9  ;;  %p1063_p12 = scmp.lt.s32.totalorder %s1061_s25, %s1055_s21 }
  0x55   : > { %p1058_p6 = pneg %p1057_p5  ;;  %p1064_p10 = por %p1063_p12, %p1062_p4 }
  0x57   : > { %p1065_p11 = pnand %p1064_p10, %p1058_p6 }
  0x59   : > { %1068 = shalt.err (!%p1065_p11)
}
  0x5a   : > { %s1210_s27 = smov 1024   ;;  %s1211_s7 = smov 128  }
  0x5b   : > { %s1212_s19 = smov 8   ;;  %s239_s5 = sand.u32 1, %s1167_s14  }
  0x5c   : > { %878 = dma.hbm_to_vmem [thread:$0]  (%p1332_p9), %s1385_s6, 4096, %s1380_s3, %s1387_s26, %s1210_s27, %s1211_s7, %s1212_s19  }
  0x5d   : > { %s874_s9 = sshll.u32 %s1203_s23, 5  ;;  %s821_s28 = sshll.u32 %s239_s5, 1 }
  0x5e   : > { %s1416_s30 = scalar_lea.hbm %s1553_s2, %s874_s9  ;;  %s243_s12 = scalar_lea.vmem [#allocation6], %s821_s28 }
  0x5f   : > { %s251_s25 = sshll.u32 %s243_s12, 4  ;;  %s240_s0 = scalar_lea.sflag [#allocation7], %s239_s5  ;;  %s252_s25 = int_to_ptr.vmem [resolvable:$true] %s251_s25 }
  0x60   : > { %s1069_s1 = scalar_lea.hbm %s1416_s30, 32  ;;  %s1073_s6 = scalar_lea.hbm %s1553_s2, 256 }
  0x61   : > { %p1070_p12 = scmp.ne.s32.totalorder %s1416_s30, %s1069_s1  ;;  %p1074_p6 = scmp.lt.u32.totalorder %s1416_s30, %s1553_s2 }
  0x62   : > { %p1075_p8 = scmp.lt.u32.totalorder %s1073_s6, %s1069_s1  ;;  %p1077_p0 = scmp.lt.u32.totalorder %s1069_s1, %s1416_s30 }
  0x63   : > { %p1071_p9 = pnand %p1070_p12, %p1357_p3 }
  0x64   : > { %p1076_p13 = por %p1075_p8, %p1074_p6 }
  0x65   : > { %p1072_p4 = pneg %p1071_p9 }
  0x66   : > { %p1078_p1 = por %p1077_p0, %p1076_p13 }
  0x68   : > { %p1079_p7 = pnand %p1078_p1, %p1072_p4 }
  0x6a   : > { %1082 = shalt.err (!%p1079_p7)
}
  0x6b   : > { %s1083_s7 = scalar_lea.vmem %s252_s25, 32  ;;  %s1213_s19 = smov [#allocation6]  }
  0x6c   : > { %p1084_p2 = scmp.ne.s32.totalorder %s252_s25, %s1083_s7  ;;  %s1087_s5 = sshll.u32 %s1213_s19, 4  ;;  %s1088_s5 = int_to_ptr.vmem [resolvable:$false] %s1087_s5 }
  0x6d   : > { %s1089_s9 = scalar_lea.vmem %s1088_s5, 64  ;;  %p1090_p11 = scmp.lt.s32.totalorder %s252_s25, %s1088_s5 }
  0x6e   : > { %p1085_p5 = pnand %p1084_p2, %p1357_p3  ;;  %p1091_p12 = scmp.lt.s32.totalorder %s1089_s9, %s1083_s7 }
  0x70   : > { %p1086_p10 = pneg %p1085_p5  ;;  %p1092_p9 = por %p1091_p12, %p1090_p11 }
  0x72   : > { %p1093_p6 = pnand %p1092_p9, %p1086_p10 }
  0x74   : > { %1096 = shalt.err (!%p1093_p6)
}
  0x75   : > { %879 = dma.hbm_to_vmem [thread:$0]  (%p1357_p3), %s1416_s30, 32, %s252_s25, %s240_s0  }
  0x76 PF: > { %p824_p4 = scmp.ge.s32.totalorder %s1207_s24, 1  ;;  %p256_p8 = scmp.lt.s32.totalorder %s1207_s24, 33 }
  0x78   : > { %p257_p13 = pnand %p824_p4, %p256_p8 }
  0x79   : > { %s263_s1 = sand.u32 (!%p257_p13), 1, %s1183_s18   ;;  %s269_s28 = sand.u32 (!%p257_p13), 1, %s1175_s16  }
  0x7a   : > { %260 = sbr.rel (%p257_p13) target bundleno = 448 (0x1c0), region = 66  ;;  %s1439_s11 = sshll.u32 (!%p257_p13), %s263_s1, 4 }
  0x7b   : > { %s826_s21 = sshll.u32 (!%p257_p13), %s269_s28, 8  ;;  %s265_s12 = scalar_lea.vmem (!%p257_p13), [#allocation3], %s1439_s11 }
  0x7c   : > { %s270_s15 = scalar_lea.sflag (!%p257_p13), [#allocation5], %s269_s28  ;;  %s1442_s3 = scalar_lea.vmem (!%p257_p13), [#allocation4], %s826_s21 }
  0x7d   : > { %p1578_p3 = scmp.ne.s32.totalorder (!%p257_p13), %s1571_s10, 0 }
  0x81   : > { %1150 = dma.done.wait (%p1578_p3), %s270_s15, 4096  }
  0x82   : > { %1152 = vsyncadd (%p1578_p3), %s270_s15, 4294963200  ;;  %s278_s0 = sand.u32 1, %s1163_s13   ;;  %p1579_p0 = scmp.ne.s32.totalorder %s1574_s29, 0 }
  0x83   : > { %s827_s30 = sshll.u32 %s278_s0, 1  ;;  %s279_s25 = scalar_lea.sflag [#allocation7], %s278_s0 }
  0x84   : > { %s1449_s18 = scalar_lea.vmem [#allocation6], %s827_s30 }
  0x85   : > { %1154 = dma.done.wait (%p1579_p0), %s279_s25, 32  }
  0x86   : > { %1156 = vsyncadd (%p1579_p0), %s279_s25, 4294967264  ;;  %s828_s8 = sshll.u32 %s278_s0, 4  ;;  %p829_p1 = scmp.ne.s32.totalorder %s1191_s20, 0 }
  0x87   : > { %s1455_s6 = scalar_lea.vmem [#allocation8], %s828_s8  ;;  %v1214_v2 = vmov (!%p829_p1), 0.0  }
  0x88   : > { %323 = sbr.rel (%p829_p1) target bundleno = 143 (0x8f), region = 82  ;;  %324 = vst [vmem:[#allocation2] sm:$0xff] (!%p829_p1), %v1214_v2  ;;  %325 = vst [vmem:[#allocation2 + $0x8] sm:$0xff] (!%p829_p1), %v1214_v2 }
  0x89   : > { %326 = vst [vmem:[#allocation2 + $0x10] sm:$0xff] (!%p829_p1), %v1214_v2  ;;  %327 = vst [vmem:[#allocation2 + $0x18] sm:$0xff] (!%p829_p1), %v1214_v2 }
  0x8f PF: > { %v990_v3 = vld [vmem:[%s1442_s3 + $0x4] ss:$8 sps:$4 sm:$0xff]   ;;  %v992_v4 = vld [vmem:[%s1442_s3] ss:$8 sps:$4 sm:$0xff]   ;;  %v993_v5 = vld [vmem:[%s1442_s3 + $0x14] ss:$8 sps:$4 sm:$0xff]  }
  0x90   : > { %536 = vmatprep.subr.bf16.mxu0 %v990_v3  ;;  %v995_v6 = vld [vmem:[%s1442_s3 + $0x10] ss:$8 sps:$4 sm:$0xff]   ;;  %v996_v7 = vld [vmem:[%s1442_s3 + $0x24] ss:$8 sps:$4 sm:$0xff]   ;;  %v998_v8 = vld [vmem:[%s1442_s3 + $0x20] ss:$8 sps:$4 sm:$0xff]  }
  0x91   : > { %537 = vmatpush1.bf16.msra.mxu0 %v992_v4  ;;  %v999_v9 = vld [vmem:[%s1442_s3 + $0x34] ss:$8 sps:$4 sm:$0xff]   ;;  %v1001_v10 = vld [vmem:[%s1442_s3 + $0x30] ss:$8 sps:$4 sm:$0xff]   ;;  %v1002_v11 = vld [vmem:[%s1442_s3 + $0x44] ss:$8 sps:$4 sm:$0xff]  }
  0x92   : > { %538 = vmatprep.subr.bf16.mxu0 %v993_v5  ;;  %v1004_v12 = vld [vmem:[%s1442_s3 + $0x40] ss:$8 sps:$4 sm:$0xff]   ;;  %v1005_v13 = vld [vmem:[%s1442_s3 + $0x54] ss:$8 sps:$4 sm:$0xff]   ;;  %v1007_v14 = vld [vmem:[%s1442_s3 + $0x50] ss:$8 sps:$4 sm:$0xff]  }
  0x93   : > { %v1008_v15 = vld [vmem:[%s1442_s3 + $0x64] ss:$8 sps:$4 sm:$0xff]   ;;  %v1010_v17 = vld [vmem:[%s1442_s3 + $0x60] ss:$8 sps:$4 sm:$0xff]   ;;  %v1011_v18 = vld [vmem:[%s1442_s3 + $0x74] ss:$8 sps:$4 sm:$0xff]  }
  0x94   : > { %v1040_v16 = vld [vmem:[%s265_s12 + $0x4] ss:$8 sps:$4 sm:$0xff]   ;;  %v1013_v19 = vld [vmem:[%s1442_s3 + $0x70] ss:$8 sps:$4 sm:$0xff]   ;;  %v1016_v21 = vld [vmem:[%s1442_s3 + $0x80] ss:$8 sps:$4 sm:$0xff]  }
  0x95   : > { %539 = vmatpush1.bf16.msra.mxu0 %v995_v6  ;;  %568 = vmatprep.mubr.bf16.mxu0 %v1040_v16  ;;  %v1014_v20 = vld [vmem:[%s1442_s3 + $0x84] ss:$8 sps:$4 sm:$0xff]   ;;  %v1017_v22 = vld [vmem:[%s1442_s3 + $0x94] ss:$8 sps:$4 sm:$0xff]   ;;  %v1019_v23 = vld [vmem:[%s1442_s3 + $0x90] ss:$8 sps:$4 sm:$0xff]  }
  0x96   : > { %540 = vmatprep.subr.bf16.mxu0 %v996_v7  ;;  %v1020_v24 = vld [vmem:[%s1442_s3 + $0xa4] ss:$8 sps:$4 sm:$0xff]   ;;  %v1022_v25 = vld [vmem:[%s1442_s3 + $0xa0] ss:$8 sps:$4 sm:$0xff]   ;;  %v1023_v26 = vld [vmem:[%s1442_s3 + $0xb4] ss:$8 sps:$4 sm:$0xff]  }
  0x97   : > { %v1025_v27 = vld [vmem:[%s1442_s3 + $0xb0] ss:$8 sps:$4 sm:$0xff]   ;;  %v1026_v28 = vld [vmem:[%s1442_s3 + $0xc4] ss:$8 sps:$4 sm:$0xff]   ;;  %v1028_v29 = vld [vmem:[%s1442_s3 + $0xc0] ss:$8 sps:$4 sm:$0xff]  }
  0x98   : > { %v1029_v30 = vld [vmem:[%s1442_s3 + $0xd4] ss:$8 sps:$4 sm:$0xff]   ;;  %v1031_v31 = vld [vmem:[%s1442_s3 + $0xd0] ss:$8 sps:$4 sm:$0xff]   ;;  %v1032_v32 = vld [vmem:[%s1442_s3 + $0xe4] ss:$8 sps:$4 sm:$0xff]  }
  0x99   : > { %541 = vmatpush1.bf16.msra.mxu0 %v998_v8  ;;  %v1034_v33 = vld [vmem:[%s1442_s3 + $0xe0] ss:$8 sps:$4 sm:$0xff]   ;;  %v1035_v34 = vld [vmem:[%s1442_s3 + $0xf4] ss:$8 sps:$4 sm:$0xff]   ;;  %v1037_v35 = vld [vmem:[%s1442_s3 + $0xf0] ss:$8 sps:$4 sm:$0xff]  }
  0x9a   : > { %542 = vmatprep.subr.bf16.mxu0 %v999_v9  ;;  %v1038_v36 = vld [vmem:[%s265_s12] ss:$8 sps:$4 sm:$0xff]   ;;  %p864_p7 = scmp.ne.s32.totalorder %s1191_s20, 3 }
  0x9b   : > { %v328_v37 = vld [vmem:[#allocation2] sm:$0xff]  ;;  %v329_v38 = vld [vmem:[#allocation2 + $0x8] sm:$0xff]  ;;  %v330_v40 = vld [vmem:[#allocation2 + $0x10] sm:$0xff]  ;;  %v598_v50 = vlaneseq (!%p864_p7) }
  0x9c   : > { %v331_v43 = vld [vmem:[#allocation2 + $0x18] sm:$0xff]  ;;  %v595_v49 = vld [vmem:[%s1449_s18] sm:$0x3] (!%p864_p7) }
  0x9d   : > { %543 = vmatpush1.bf16.msra.mxu0 %v1001_v10  ;;  %v596_v51 = vunpack.c.l.bf16 (!%p864_p7), %v595_v49  ;;  %v599_v52 = vshrl.u32 (!%p864_p7), %v598_v50, 7 }
  0x9e   : > { %544 = vmatprep.subr.bf16.mxu0 %v1002_v11 }
  0x9f   : > { %v600_v53 = vsub.s32 (!%p864_p7), 0, %v599_v52  ;;  %v604_v54 = vsub.s32 (!%p864_p7), 2, %v599_v52 }
  0xa1   : > { %545 = vmatpush1.bf16.msra.mxu0 %v1004_v12  ;;  %v601_v56 = vrot.slane (!%p864_p7), %v596_v51, %v600_v53  ;;  %v605_v57 = vrot.slane (!%p864_p7), %v596_v51, %v604_v54 }
  0xa2   : > { %546 = vmatprep.subr.bf16.mxu0 %v1005_v13 }
  0xa3   : > { %v611_v61 = vrot.slane (!%p864_p7), %v601_v56, %v600_v53  ;;  %v615_v62 = vrot.slane (!%p864_p7), %v605_v57, %v600_v53 }
  0xa5   : > { %547 = vmatpush1.bf16.msra.mxu0 %v1007_v14 }
  0xa6   : > { %548 = vmatprep.subr.bf16.mxu0 %v1008_v15 }
  0xa9   : > { %549 = vmatpush1.bf16.msra.mxu0 %v1010_v17 }
  0xaa   : > { %550 = vmatprep.subr.bf16.mxu0 %v1011_v18 }
  0xad   : > { %551 = vmatpush1.bf16.msra.mxu0 %v1013_v19 }
  0xae   : > { %552 = vmatprep.subr.bf16.mxu0 %v1014_v20 }
  0xb1   : > { %553 = vmatpush1.bf16.msra.mxu0 %v1016_v21 }
  0xb2   : > { %554 = vmatprep.subr.bf16.mxu0 %v1017_v22 }
  0xb5   : > { %555 = vmatpush1.bf16.msra.mxu0 %v1019_v23 }
  0xb6   : > { %556 = vmatprep.subr.bf16.mxu0 %v1020_v24 }
  0xb9   : > { %557 = vmatpush1.bf16.msra.mxu0 %v1022_v25 }
  0xba   : > { %558 = vmatprep.subr.bf16.mxu0 %v1023_v26 }
  0xbd   : > { %559 = vmatpush1.bf16.msra.mxu0 %v1025_v27 }
  0xbe   : > { %560 = vmatprep.subr.bf16.mxu0 %v1026_v28 }
  0xc1   : > { %561 = vmatpush1.bf16.msra.mxu0 %v1028_v29 }
  0xc2   : > { %562 = vmatprep.subr.bf16.mxu0 %v1029_v30 }
  0xc5   : > { %563 = vmatpush1.bf16.msra.mxu0 %v1031_v31 }
  0xc6   : > { %564 = vmatprep.subr.bf16.mxu0 %v1032_v32 }
  0xc9   : > { %565 = vmatpush1.bf16.msra.mxu0 %v1034_v33 }
  0xca   : > { %566 = vmatprep.subr.bf16.mxu0 %v1035_v34 }
  0xcd   : > { %567 = vmatpush1.bf16.msra.mxu0 %v1037_v35 }
  0xd0   : > { %569 = vmatmul.mubr.bf16.vlgmr.msra.gmra.mrb[0].mxu0 %v1038_v36 }
 0x1a3   : > { %v570_v39 = vpop.f32.mrb[0].mxu0  ;;  %590 = sbr.rel (%p864_p7) target bundleno = 438 (0x1b6), region = 86 }
 0x1a4   : > { %v579_v41 = vadd.f32 %v570_v39, %v328_v37  ;;  %v572_v42 = vpop.f32.mrb[1].mxu0 }
 0x1a5   : > { %v580_v44 = vadd.f32 %v572_v42, %v329_v38  ;;  %v574_v45 = vpop.f32.mrb[2].mxu0 }
 0x1a6   : > { %583 = vst [vmem:[#allocation2] sm:$0xff] %v579_v41  ;;  %v581_v46 = vadd.f32 %v574_v45, %v330_v40  ;;  %v576_v47 = vpop.f32.mrb[3].mxu0 }
 0x1a7   : > { %584 = vst [vmem:[#allocation2 + $0x8] sm:$0xff] %v580_v44  ;;  %v582_v48 = vadd.f32 %v576_v47, %v331_v43 }
 0x1a8   : > { %585 = vst [vmem:[#allocation2 + $0x10] sm:$0xff] %v581_v46 }
 0x1a9   : > { %586 = vst [vmem:[#allocation2 + $0x18] sm:$0xff] %v582_v48 }
 0x1ad   : > { %v591_v55 = vld [vmem:[#allocation2] sm:$0xff] }
 0x1ae   : > { %v592_v58 = vld [vmem:[#allocation2 + $0x8] sm:$0xff]  ;;  %v616_v63 = vadd.f32 %v611_v61, %v591_v55 }
 0x1af   : > { %v593_v59 = vld [vmem:[#allocation2 + $0x10] sm:$0xff]  ;;  %v617_v0 = vadd.f32 %v615_v62, %v592_v58 }
 0x1b0   : > { %v594_v60 = vld [vmem:[#allocation2 + $0x18] sm:$0xff]  ;;  %v618_v1 = vadd.f32 %v611_v61, %v593_v59 }
 0x1b1   : > { %v619_v2 = vadd.f32 %v615_v62, %v594_v60  ;;  %v875_v3 = vpack.c.bf16 %v617_v0, %v616_v63 }
 0x1b3   : > { %v876_v4 = vpack.c.bf16 %v619_v2, %v618_v1  ;;  %632 = vst [vmem:[%s1455_s6] sm:$0xff] %v875_v3 }
 0x1b5   : > { %633 = vst [vmem:[%s1455_s6 + $0x8] sm:$0xff] %v876_v4 }
 0x1b6 PF: > { %p1580_p2 = scmp.ne.s32.totalorder %s1575_s4, 0 }
 0x1b7   : > { %s1581_s20 = sld [smem:[#allocation12_spill]] (%p1580_p2)  ;;  %s1582_s27 = sld [smem:[#allocation20_spill]] (%p1580_p2) }
 0x1b8   : > { %640 = sbr.rel (!%p1580_p2) target bundleno = 448 (0x1c0), region = 90 }
 0x1ba   : > { %v676_v5 = vld [vmem:[%s1455_s6] sm:$0xff] (%p1580_p2) }
 0x1bc   : > { %v678_v6 = vld [vmem:[%s1455_s6 + $0x8] sm:$0xff] (%p1580_p2) }
 0x1bd   : > { %s877_s10 = sshll.u32 (%p1580_p2), %s1581_s20, 3 }
 0x1be   : > { %s646_s7 = scalar_lea.vmem (%p1580_p2), %s1582_s27, %s877_s10 }
 0x1bf   : > { %677 = vst [vmem:[%s646_s7] sm:$0xff] %v676_v5  ;;  %679 = vst [vmem:[%s646_s7 + $0x40] sm:$0xff] %v678_v6 }
 0x1c0 PF: > { %s19_s24 = sadd.s32 1, %s1207_s24   ;;  %s1584_s4 = sld [smem:[#allocation17_spill]] }
 0x1c1   : > { %p1507_p5 = scmp.ge.s32.totalorder %s19_s24, 34   ;;  %s1585_s5 = sld [smem:[#allocation16_spill]] }
 0x1c2   : > { %s1586_s18 = sld [smem:[#allocation11_spill]]  ;;  %s1587_s9 = sld [smem:[#allocation15_spill]] }
 0x1c3   : > { %s1588_s1 = sld [smem:[#allocation13_spill]]  ;;  %s1589_s28 = sld [smem:[#allocation14_spill]] }
 0x1c4   : > { %s1591_s12 = smov %s1163_s13  ;;  %s1592_s13 = smov %s1167_s14 }
 0x1c5   : > { %s1594_s15 = smov %s1175_s16  ;;  %s1595_s16 = smov %s1179_s17 }
 0x1c6   : > { %s1593_s14 = smov %s1584_s4  ;;  %s1598_s20 = smov %s1199_s22 }
 0x1c7   : > { %s1596_s17 = smov %s1585_s5  ;;  %s1599_s21 = smov %s1203_s23 }
 0x1c8   : > { %s1597_s19 = smov %s1587_s9  ;;  %18 = sbr.rel (!%p1507_p5) target bundleno = 14 (0xe), region = 177 }
 0x1c9   : > { %s1600_s22 = smov %s1588_s1  ;;  %s1601_s23 = smov %s1589_s28 }
 0x1cf   :  { %695 = vsyncpa [#allocation5], 1 }
 0x1d0   :  { %697 = vsyncpa [#allocation5 + $0x1], 1 }
 0x1d1   :  { %698 = vsyncpa [#allocation7], 1 }
 0x1d2   :  { %700 = vsyncpa [#allocation7 + $0x1], 1 }

// kernel: no_leaf_forward.12
= control target key start
LH: loop header
LB: loop body
LE: loop exit
PB: predicated region body
PF: predicated region fallthrough
CT: control target
= control target key end

     0   :  { %s1223_s12 = smov 0   ;;  %s1225_s13 = smov 0   ;;  %s1510_s0 = inlined_call_operand.vmem [shape: bf16[16,512], index: 0, kind: input, shape index: {}]   ;;  %s1511_s1 = inlined_call_operand.vmem [shape: bf16[512,2048], index: 1, kind: input, shape index: {}]   ;;  %s1512_s2 = inlined_call_operand.vmem [shape: bf16[1,2048], index: 2, kind: input, shape index: {}]   ;;  %s1513_s3 = inlined_call_operand.vmem [shape: bf16[16,2048], index: 3, kind: output, shape index: {}]  }
   0x1   :  { %s1227_s14 = smov 0   ;;  %s1229_s15 = smov 0  }
   0x2   :  { %s1231_s16 = smov 0   ;;  %s1233_s17 = smov 0  }
   0x3   :  { %s1235_s18 = smov 0   ;;  %s1237_s19 = smov 0  }
   0x4   :  { %s1239_s20 = smov 0   ;;  %s1241_s21 = smov 0  }
   0x5   :  { %s1243_s22 = smov 0  }
   0x6 LB: > { %s909_s23 = sadd.s32 4294967295, %s1200_s22   ;;  %s25_s24 = sadd.s32 1, %s1192_s20  ;;  %s1200_s22 = sphi %s1243_s22, %s13_s22   ;;  %s1196_s21 = sphi %s1241_s21, %s1534_s21   ;;  %s1192_s20 = sphi %s1239_s20, %s1533_s20   ;;  %s1188_s19 = sphi %s1237_s19, %s1532_s19   ;;  %s1184_s18 = sphi %s1235_s18, %s1531_s18   ;;  %s1180_s17 = sphi %s1233_s17, %s1530_s17   ;;  %s1176_s16 = sphi %s1231_s16, %s1529_s16   ;;  %s1172_s15 = sphi %s1229_s15, %s1528_s15   ;;  %s1168_s14 = sphi %s1227_s14, %s1527_s14   ;;  %s1164_s13 = sphi %s1225_s13, %s1526_s13   ;;  %s1160_s12 = sphi %s1223_s12, %s1525_s12  }
   0x7   : > { %p26_p0 = scmp.ge.s32.totalorder %s25_s24, 2  ;;  %s28_s25 = sadd.s32 1, %s1196_s21 }
   0x8   : > { %s41_s26 = sadd.s32 1, %s1180_s17  ;;  %p48_p1 = scmp.ne.s32.totalorder %s1180_s17, %s1176_s16 }
   0x9   : > { %s1536_s24 = smov (%p26_p0, %s25_s24), 0  ;;  %s1538_s25 = smov (!%p26_p0, %s28_s25), %s1196_s21 }
   0xa   : > { %1516 = sst [smem:[#allocation6_spill]] %s1536_s24  ;;  %s37_s27 = ssub.s32 %s1192_s20, %s1536_s24 }
   0xb   : > { %p49_p2 = scmp.eq.s32.totalorder %s1200_s22, 0  ;;  %p30_p3 = scmp.ge.s32.totalorder %s1538_s25, 8 }
   0xc   : > { %p39_p4 = scmp.eq.s32.totalorder %s37_s27, 0  ;;  %s69_s29 = sadd.s32 1, %s1172_s15 }
   0xd   : > { %p1290_p5 = por %p49_p2, %p48_p1  ;;  %s1540_s25 = smov (%p30_p3, %s1538_s25), 0 }
   0xe   : > { %1518 = sst [smem:[#allocation7_spill]] %s1540_s25  ;;  %s65_s4 = ssub.s32 %s1196_s21, %s1540_s25 }
   0xf   : > { %s1298_s30 = scalar_select %p39_p4, %s1180_s17, %s41_s26  }
  0x10   : > { %p76_p6 = scmp.ne.s32.totalorder %s1172_s15, %s1168_s14  ;;  %s66_s5 = sor.u32 %s65_s4, %s37_s27 }
  0x11   : > { %1519 = sst [smem:[#allocation8_spill]] %s1298_s30  ;;  %p121_p7 = scmp.eq.s32.totalorder %s65_s4, 0 }
  0x12   : > { %p67_p8 = scmp.eq.s32.totalorder %s66_s5, 0  ;;  %p1304_p9 = por %p76_p6, %p49_p2 }
  0x13   : > { %s123_s7 = sadd.s32 1, %s1164_s13  ;;  %p133_p10 = scmp.ne.s32.totalorder %s1164_s13, %s1160_s12 }
  0x14   : > { %s1312_s8 = scalar_select %p67_p8, %s1172_s15, %s69_s29  }
  0x15   : > { %s1315_s9 = scalar_select %p121_p7, %s1164_s13, %s123_s7  }
  0x16   : > { %p134_p11 = scmp.eq.s32.totalorder %s909_s23, 15  ;;  %p912_p13 = scmp.ge.s32.totalorder %s1200_s22, 16 }
  0x18   : > { %p1317_p12 = por %p134_p11, %p133_p10  ;;  %156 = sbr.rel (%p912_p13) target bundleno = 77 (0x4d), region = 16 }
  0x1f   : > { %159 = sbr.rel (!%p1290_p5) target bundleno = 38 (0x26), region = 20  ;;  %s161_s11 = sand.u32 (%p1290_p5), 1, %s1180_s17  }
  0x20   : > { %s969_s26 = sshll.u32 (%p1290_p5), %s1192_s20, 3  ;;  %s913_s27 = sshll.u32 (%p1290_p5), %s161_s11, 4 }
  0x21   : > { %s169_s5 = scalar_lea.vmem (%p1290_p5), %s1510_s0, %s969_s26  ;;  %s163_s23 = scalar_lea.vmem (%p1290_p5), [#allocation3], %s913_s27 }
  0x22   : > { %v199_v0 = vld [vmem:[%s169_s5] sm:$0xff] (%p1290_p5)  ;;  %v201_v1 = vld [vmem:[%s169_s5 + $0x10] sm:$0xff] (%p1290_p5) }
  0x23   : > { %200 = vst [vmem:[%s163_s23] sm:$0xff] (%p1290_p5), %v199_v0  ;;  %202 = vst [vmem:[%s163_s23 + $0x8] sm:$0xff] (%p1290_p5), %v201_v1 }
  0x26 PF: > { %208 = sbr.rel (!%p1304_p9) target bundleno = 77 (0x4d), region = 58  ;;  %s210_s28 = sand.u32 (%p1304_p9), 1, %s1172_s15  }
  0x27   : > { %s918_s7 = sshll.u32 (%p1304_p9), %s1196_s21, 1  ;;  %s916_s25 = sshll.u32 (%p1304_p9), %s210_s28, 8 }
  0x28   : > { %s970_s11 = sshll.u32 (%p1304_p9), %s1192_s20, 9  ;;  %s1342_s6 = scalar_lea.vmem (%p1304_p9), [#allocation4], %s916_s25 }
  0x29   : > { %s216_s24 = sadd.s32 (%p1304_p9), %s970_s11, %s918_s7 }
  0x2a   : > { %s920_s30 = sshll.u32 (%p1304_p9), %s216_s24, 2 }
  0x2b   : > { %s1337_s4 = scalar_lea.vmem (%p1304_p9), %s1511_s1, %s920_s30 }
  0x2c   : > { %v308_v2 = vld [vmem:[%s1337_s4] sm:$0xff] (%p1304_p9) }
  0x2d   : > { %v310_v3 = vld [vmem:[%s1337_s4 + $0x40] sm:$0xff]  ;;  %309 = vst [vmem:[%s1342_s6] sm:$0xff] %v308_v2 }
  0x2e   : > { %v312_v4 = vld [vmem:[%s1337_s4 + $0x80] sm:$0xff]  ;;  %311 = vst [vmem:[%s1342_s6 + $0x8] sm:$0xff] %v310_v3 }
  0x2f   : > { %313 = vst [vmem:[%s1342_s6 + $0x10] sm:$0xff] %v312_v4  ;;  %v314_v5 = vld [vmem:[%s1337_s4 + $0xc0] sm:$0xff] }
  0x30   : > { %v316_v6 = vld [vmem:[%s1337_s4 + $0x100] sm:$0xff]  ;;  %315 = vst [vmem:[%s1342_s6 + $0x18] sm:$0xff] %v314_v5 }
  0x31   : > { %v318_v7 = vld [vmem:[%s1337_s4 + $0x140] sm:$0xff]  ;;  %317 = vst [vmem:[%s1342_s6 + $0x20] sm:$0xff] %v316_v6 }
  0x32   : > { %319 = vst [vmem:[%s1342_s6 + $0x28] sm:$0xff] %v318_v7  ;;  %v320_v8 = vld [vmem:[%s1337_s4 + $0x180] sm:$0xff] }
  0x33   : > { %v322_v9 = vld [vmem:[%s1337_s4 + $0x1c0] sm:$0xff]  ;;  %321 = vst [vmem:[%s1342_s6 + $0x30] sm:$0xff] %v320_v8 }
  0x34   : > { %v324_v10 = vld [vmem:[%s1337_s4 + $0x200] sm:$0xff]  ;;  %323 = vst [vmem:[%s1342_s6 + $0x38] sm:$0xff] %v322_v9 }
  0x35   : > { %325 = vst [vmem:[%s1342_s6 + $0x40] sm:$0xff] %v324_v10  ;;  %v326_v11 = vld [vmem:[%s1337_s4 + $0x240] sm:$0xff] }
  0x36   : > { %v328_v12 = vld [vmem:[%s1337_s4 + $0x280] sm:$0xff]  ;;  %327 = vst [vmem:[%s1342_s6 + $0x48] sm:$0xff] %v326_v11 }
  0x37   : > { %v330_v13 = vld [vmem:[%s1337_s4 + $0x2c0] sm:$0xff]  ;;  %329 = vst [vmem:[%s1342_s6 + $0x50] sm:$0xff] %v328_v12 }
  0x38   : > { %331 = vst [vmem:[%s1342_s6 + $0x58] sm:$0xff] %v330_v13  ;;  %v332_v14 = vld [vmem:[%s1337_s4 + $0x300] sm:$0xff] }
  0x39   : > { %v334_v15 = vld [vmem:[%s1337_s4 + $0x340] sm:$0xff]  ;;  %333 = vst [vmem:[%s1342_s6 + $0x60] sm:$0xff] %v332_v14 }
  0x3a   : > { %v336_v16 = vld [vmem:[%s1337_s4 + $0x380] sm:$0xff]  ;;  %335 = vst [vmem:[%s1342_s6 + $0x68] sm:$0xff] %v334_v15 }
  0x3b   : > { %337 = vst [vmem:[%s1342_s6 + $0x70] sm:$0xff] %v336_v16  ;;  %v338_v17 = vld [vmem:[%s1337_s4 + $0x3c0] sm:$0xff] }
  0x3c   : > { %v340_v18 = vld [vmem:[%s1337_s4 + $0x400] sm:$0xff]  ;;  %339 = vst [vmem:[%s1342_s6 + $0x78] sm:$0xff] %v338_v17 }
  0x3d   : > { %v342_v19 = vld [vmem:[%s1337_s4 + $0x440] sm:$0xff]  ;;  %341 = vst [vmem:[%s1342_s6 + $0x80] sm:$0xff] %v340_v18 }
  0x3e   : > { %343 = vst [vmem:[%s1342_s6 + $0x88] sm:$0xff] %v342_v19  ;;  %v344_v20 = vld [vmem:[%s1337_s4 + $0x480] sm:$0xff] }
  0x3f   : > { %v346_v21 = vld [vmem:[%s1337_s4 + $0x4c0] sm:$0xff]  ;;  %345 = vst [vmem:[%s1342_s6 + $0x90] sm:$0xff] %v344_v20 }
  0x40   : > { %v348_v22 = vld [vmem:[%s1337_s4 + $0x500] sm:$0xff]  ;;  %347 = vst [vmem:[%s1342_s6 + $0x98] sm:$0xff] %v346_v21 }
  0x41   : > { %349 = vst [vmem:[%s1342_s6 + $0xa0] sm:$0xff] %v348_v22  ;;  %v350_v23 = vld [vmem:[%s1337_s4 + $0x540] sm:$0xff] }
  0x42   : > { %v352_v24 = vld [vmem:[%s1337_s4 + $0x580] sm:$0xff]  ;;  %351 = vst [vmem:[%s1342_s6 + $0xa8] sm:$0xff] %v350_v23 }
  0x43   : > { %v354_v25 = vld [vmem:[%s1337_s4 + $0x5c0] sm:$0xff]  ;;  %353 = vst [vmem:[%s1342_s6 + $0xb0] sm:$0xff] %v352_v24 }
  0x44   : > { %355 = vst [vmem:[%s1342_s6 + $0xb8] sm:$0xff] %v354_v25  ;;  %v356_v26 = vld [vmem:[%s1337_s4 + $0x600] sm:$0xff] }
  0x45   : > { %v358_v27 = vld [vmem:[%s1337_s4 + $0x640] sm:$0xff]  ;;  %357 = vst [vmem:[%s1342_s6 + $0xc0] sm:$0xff] %v356_v26 }
  0x46   : > { %v360_v28 = vld [vmem:[%s1337_s4 + $0x680] sm:$0xff]  ;;  %359 = vst [vmem:[%s1342_s6 + $0xc8] sm:$0xff] %v358_v27 }
  0x47   : > { %361 = vst [vmem:[%s1342_s6 + $0xd0] sm:$0xff] %v360_v28  ;;  %v362_v29 = vld [vmem:[%s1337_s4 + $0x6c0] sm:$0xff] }
  0x48   : > { %v364_v30 = vld [vmem:[%s1337_s4 + $0x700] sm:$0xff]  ;;  %363 = vst [vmem:[%s1342_s6 + $0xd8] sm:$0xff] %v362_v29 }
  0x49   : > { %v366_v31 = vld [vmem:[%s1337_s4 + $0x740] sm:$0xff]  ;;  %365 = vst [vmem:[%s1342_s6 + $0xe0] sm:$0xff] %v364_v30 }
  0x4a   : > { %367 = vst [vmem:[%s1342_s6 + $0xe8] sm:$0xff] %v366_v31  ;;  %v368_v32 = vld [vmem:[%s1337_s4 + $0x780] sm:$0xff] }
  0x4b   : > { %v370_v33 = vld [vmem:[%s1337_s4 + $0x7c0] sm:$0xff]  ;;  %369 = vst [vmem:[%s1342_s6 + $0xf0] sm:$0xff] %v368_v32 }
  0x4c   : > { %371 = vst [vmem:[%s1342_s6 + $0xf8] sm:$0xff] %v370_v33 }
  0x4d PF: > { %p921_p0 = scmp.ge.s32.totalorder %s1200_s22, 1  ;;  %p384_p1 = scmp.lt.s32.totalorder %s1200_s22, 17 }
  0x4f   : > { %p385_p2 = pnand %p921_p0, %p384_p1 }
  0x50   : > { %s391_s24 = sand.u32 (!%p385_p2), 1, %s1176_s16   ;;  %s398_s25 = sand.u32 (!%p385_p2), 1, %s1168_s14  }
  0x51   : > { %388 = sbr.rel (%p385_p2) target bundleno = 398 (0x18e), region = 100  ;;  %s1409_s30 = sshll.u32 (!%p385_p2), %s391_s24, 4 }
  0x52   : > { %s923_s27 = sshll.u32 (!%p385_p2), %s398_s25, 8  ;;  %s425_s5 = sand.u32 (!%p385_p2), 1, %s1160_s12  }
  0x53   : > { %s925_s23 = sshll.u32 (!%p385_p2), %s1188_s19, 1  ;;  %s924_s28 = sshll.u32 (!%p385_p2), %s425_s5, 4 }
  0x54   : > { %p433_p3 = scmp.lt.s32.totalorder (!%p385_p2), %s925_s23, 15  ;;  %s393_s26 = scalar_lea.vmem (!%p385_p2), [#allocation3], %s1409_s30 }
  0x55   : > { %s1420_s4 = scalar_lea.vmem (!%p385_p2), [#allocation4], %s923_s27  ;;  %s1422_s16 = scalar_lea.vmem (!%p385_p2), [#allocation5], %s924_s28 }
  0x56   : > { %p926_p4 = scmp.ne.s32.totalorder (!%p385_p2), %s1184_s18, 0 }
  0x58   : > { %s1542_s23 = smov (!%p433_p3, %s925_s23), 15  ;;  %442 = sbr.rel (%p926_p4) target bundleno = 95 (0x5f), region = 112 }
  0x59   : > { %s435_s29 = scalar_lea.vmem %s1512_s2, %s1542_s23  ;;  %v1202_v34 = vmov (!%p926_p4), 0.0  }
  0x5a   : > { %443 = vst [vmem:[#allocation2] sm:$0xff] (!%p926_p4), %v1202_v34  ;;  %444 = vst [vmem:[#allocation2 + $0x8] sm:$0xff] (!%p926_p4), %v1202_v34 }
  0x5b   : > { %445 = vst [vmem:[#allocation2 + $0x10] sm:$0xff] (!%p926_p4), %v1202_v34  ;;  %446 = vst [vmem:[#allocation2 + $0x18] sm:$0xff] (!%p926_p4), %v1202_v34 }
  0x5f PF: > { %v1063_v35 = vld [vmem:[%s1420_s4 + $0x4] ss:$8 sps:$4 sm:$0xff]   ;;  %v1065_v36 = vld [vmem:[%s1420_s4] ss:$8 sps:$4 sm:$0xff]   ;;  %v1066_v37 = vld [vmem:[%s1420_s4 + $0x14] ss:$8 sps:$4 sm:$0xff]  }
  0x60   : > { %655 = vmatprep.subr.bf16.mxu0 %v1063_v35  ;;  %v1068_v38 = vld [vmem:[%s1420_s4 + $0x10] ss:$8 sps:$4 sm:$0xff]   ;;  %v1069_v39 = vld [vmem:[%s1420_s4 + $0x24] ss:$8 sps:$4 sm:$0xff]   ;;  %v1071_v40 = vld [vmem:[%s1420_s4 + $0x20] ss:$8 sps:$4 sm:$0xff]  }
  0x61   : > { %656 = vmatpush1.bf16.msra.mxu0 %v1065_v36  ;;  %v1072_v41 = vld [vmem:[%s1420_s4 + $0x34] ss:$8 sps:$4 sm:$0xff]   ;;  %v1074_v42 = vld [vmem:[%s1420_s4 + $0x30] ss:$8 sps:$4 sm:$0xff]   ;;  %v1075_v43 = vld [vmem:[%s1420_s4 + $0x44] ss:$8 sps:$4 sm:$0xff]  }
  0x62   : > { %657 = vmatprep.subr.bf16.mxu0 %v1066_v37  ;;  %v1077_v44 = vld [vmem:[%s1420_s4 + $0x40] ss:$8 sps:$4 sm:$0xff]   ;;  %v1078_v45 = vld [vmem:[%s1420_s4 + $0x54] ss:$8 sps:$4 sm:$0xff]   ;;  %v1080_v46 = vld [vmem:[%s1420_s4 + $0x50] ss:$8 sps:$4 sm:$0xff]  }
  0x63   : > { %v1081_v47 = vld [vmem:[%s1420_s4 + $0x64] ss:$8 sps:$4 sm:$0xff]   ;;  %v1083_v49 = vld [vmem:[%s1420_s4 + $0x60] ss:$8 sps:$4 sm:$0xff]   ;;  %v1084_v50 = vld [vmem:[%s1420_s4 + $0x74] ss:$8 sps:$4 sm:$0xff]  }
  0x64   : > { %v1113_v48 = vld [vmem:[%s393_s26 + $0x4] ss:$8 sps:$4 sm:$0xff]   ;;  %v1086_v51 = vld [vmem:[%s1420_s4 + $0x70] ss:$8 sps:$4 sm:$0xff]   ;;  %v1089_v53 = vld [vmem:[%s1420_s4 + $0x80] ss:$8 sps:$4 sm:$0xff]  }
  0x65   : > { %658 = vmatpush1.bf16.msra.mxu0 %v1068_v38  ;;  %687 = vmatprep.mubr.bf16.mxu0 %v1113_v48  ;;  %v1087_v52 = vld [vmem:[%s1420_s4 + $0x84] ss:$8 sps:$4 sm:$0xff]   ;;  %v1090_v54 = vld [vmem:[%s1420_s4 + $0x94] ss:$8 sps:$4 sm:$0xff]   ;;  %v1092_v55 = vld [vmem:[%s1420_s4 + $0x90] ss:$8 sps:$4 sm:$0xff]  }
  0x66   : > { %659 = vmatprep.subr.bf16.mxu0 %v1069_v39  ;;  %v1093_v56 = vld [vmem:[%s1420_s4 + $0xa4] ss:$8 sps:$4 sm:$0xff]   ;;  %v1095_v57 = vld [vmem:[%s1420_s4 + $0xa0] ss:$8 sps:$4 sm:$0xff]   ;;  %v1096_v58 = vld [vmem:[%s1420_s4 + $0xb4] ss:$8 sps:$4 sm:$0xff]  }
  0x67   : > { %v1098_v59 = vld [vmem:[%s1420_s4 + $0xb0] ss:$8 sps:$4 sm:$0xff]   ;;  %v1099_v60 = vld [vmem:[%s1420_s4 + $0xc4] ss:$8 sps:$4 sm:$0xff]   ;;  %v1101_v61 = vld [vmem:[%s1420_s4 + $0xc0] ss:$8 sps:$4 sm:$0xff]  }
  0x68   : > { %v1102_v62 = vld [vmem:[%s1420_s4 + $0xd4] ss:$8 sps:$4 sm:$0xff]   ;;  %v1104_v63 = vld [vmem:[%s1420_s4 + $0xd0] ss:$8 sps:$4 sm:$0xff]   ;;  %v1105_v0 = vld [vmem:[%s1420_s4 + $0xe4] ss:$8 sps:$4 sm:$0xff]  }
  0x69   : > { %660 = vmatpush1.bf16.msra.mxu0 %v1071_v40  ;;  %v1107_v1 = vld [vmem:[%s1420_s4 + $0xe0] ss:$8 sps:$4 sm:$0xff]   ;;  %v1108_v2 = vld [vmem:[%s1420_s4 + $0xf4] ss:$8 sps:$4 sm:$0xff]   ;;  %v1110_v3 = vld [vmem:[%s1420_s4 + $0xf0] ss:$8 sps:$4 sm:$0xff]  }
  0x6a   : > { %661 = vmatprep.subr.bf16.mxu0 %v1072_v41  ;;  %v1111_v4 = vld [vmem:[%s393_s26] ss:$8 sps:$4 sm:$0xff]   ;;  %p961_p5 = scmp.ne.s32.totalorder %s1184_s18, 1 }
  0x6b   : > { %v447_v5 = vld [vmem:[#allocation2] sm:$0xff]  ;;  %v448_v6 = vld [vmem:[#allocation2 + $0x8] sm:$0xff]  ;;  %v449_v8 = vld [vmem:[#allocation2 + $0x10] sm:$0xff]  ;;  %v717_v18 = vlaneseq (!%p961_p5) }
  0x6c   : > { %v450_v11 = vld [vmem:[#allocation2 + $0x18] sm:$0xff]  ;;  %v714_v17 = vld [vmem:[%s435_s29] sm:$0x3] (!%p961_p5) }
  0x6d   : > { %662 = vmatpush1.bf16.msra.mxu0 %v1074_v42  ;;  %v715_v19 = vunpack.c.l.bf16 (!%p961_p5), %v714_v17  ;;  %v718_v20 = vshrl.u32 (!%p961_p5), %v717_v18, 7 }
  0x6e   : > { %663 = vmatprep.subr.bf16.mxu0 %v1075_v43 }
  0x6f   : > { %v719_v21 = vsub.s32 (!%p961_p5), 0, %v718_v20  ;;  %v723_v22 = vsub.s32 (!%p961_p5), 2, %v718_v20 }
  0x71   : > { %664 = vmatpush1.bf16.msra.mxu0 %v1077_v44  ;;  %v720_v24 = vrot.slane (!%p961_p5), %v715_v19, %v719_v21  ;;  %v724_v25 = vrot.slane (!%p961_p5), %v715_v19, %v723_v22 }
  0x72   : > { %665 = vmatprep.subr.bf16.mxu0 %v1078_v45 }
  0x73   : > { %v730_v29 = vrot.slane (!%p961_p5), %v720_v24, %v719_v21  ;;  %v734_v30 = vrot.slane (!%p961_p5), %v724_v25, %v719_v21 }
  0x75   : > { %666 = vmatpush1.bf16.msra.mxu0 %v1080_v46 }
  0x76   : > { %667 = vmatprep.subr.bf16.mxu0 %v1081_v47 }
  0x79   : > { %668 = vmatpush1.bf16.msra.mxu0 %v1083_v49 }
  0x7a   : > { %669 = vmatprep.subr.bf16.mxu0 %v1084_v50 }
  0x7d   : > { %670 = vmatpush1.bf16.msra.mxu0 %v1086_v51 }
  0x7e   : > { %671 = vmatprep.subr.bf16.mxu0 %v1087_v52 }
  0x81   : > { %672 = vmatpush1.bf16.msra.mxu0 %v1089_v53 }
  0x82   : > { %673 = vmatprep.subr.bf16.mxu0 %v1090_v54 }
  0x85   : > { %674 = vmatpush1.bf16.msra.mxu0 %v1092_v55 }
  0x86   : > { %675 = vmatprep.subr.bf16.mxu0 %v1093_v56 }
  0x89   : > { %676 = vmatpush1.bf16.msra.mxu0 %v1095_v57 }
  0x8a   : > { %677 = vmatprep.subr.bf16.mxu0 %v1096_v58 }
  0x8d   : > { %678 = vmatpush1.bf16.msra.mxu0 %v1098_v59 }
  0x8e   : > { %679 = vmatprep.subr.bf16.mxu0 %v1099_v60 }
  0x91   : > { %680 = vmatpush1.bf16.msra.mxu0 %v1101_v61 }
  0x92   : > { %681 = vmatprep.subr.bf16.mxu0 %v1102_v62 }
  0x95   : > { %682 = vmatpush1.bf16.msra.mxu0 %v1104_v63 }
  0x96   : > { %683 = vmatprep.subr.bf16.mxu0 %v1105_v0 }
  0x99   : > { %684 = vmatpush1.bf16.msra.mxu0 %v1107_v1 }
  0x9a   : > { %685 = vmatprep.subr.bf16.mxu0 %v1108_v2 }
  0x9d   : > { %686 = vmatpush1.bf16.msra.mxu0 %v1110_v3 }
  0xa0   : > { %688 = vmatmul.mubr.bf16.vlgmr.msra.gmra.mrb[0].mxu0 %v1111_v4 }
 0x173   : > { %v689_v7 = vpop.f32.mrb[0].mxu0  ;;  %709 = sbr.rel (%p961_p5) target bundleno = 390 (0x186), region = 116 }
 0x174   : > { %v698_v9 = vadd.f32 %v689_v7, %v447_v5  ;;  %v691_v10 = vpop.f32.mrb[1].mxu0 }
 0x175   : > { %v699_v12 = vadd.f32 %v691_v10, %v448_v6  ;;  %v693_v13 = vpop.f32.mrb[2].mxu0 }
 0x176   : > { %702 = vst [vmem:[#allocation2] sm:$0xff] %v698_v9  ;;  %v700_v14 = vadd.f32 %v693_v13, %v449_v8  ;;  %v695_v15 = vpop.f32.mrb[3].mxu0 }
 0x177   : > { %703 = vst [vmem:[#allocation2 + $0x8] sm:$0xff] %v699_v12  ;;  %v701_v16 = vadd.f32 %v695_v15, %v450_v11 }
 0x178   : > { %704 = vst [vmem:[#allocation2 + $0x10] sm:$0xff] %v700_v14 }
 0x179   : > { %705 = vst [vmem:[#allocation2 + $0x18] sm:$0xff] %v701_v16 }
 0x17d   : > { %v710_v23 = vld [vmem:[#allocation2] sm:$0xff] }
 0x17e   : > { %v711_v26 = vld [vmem:[#allocation2 + $0x8] sm:$0xff]  ;;  %v735_v31 = vadd.f32 %v730_v29, %v710_v23 }
 0x17f   : > { %v712_v27 = vld [vmem:[#allocation2 + $0x10] sm:$0xff]  ;;  %v736_v32 = vadd.f32 %v734_v30, %v711_v26 }
 0x180   : > { %v713_v28 = vld [vmem:[#allocation2 + $0x18] sm:$0xff]  ;;  %v737_v33 = vadd.f32 %v730_v29, %v712_v27 }
 0x181   : > { %v738_v34 = vadd.f32 %v734_v30, %v713_v28  ;;  %v971_v35 = vpack.c.bf16 %v736_v32, %v735_v31 }
 0x183   : > { %v972_v36 = vpack.c.bf16 %v738_v34, %v737_v33  ;;  %751 = vst [vmem:[%s1422_s16] sm:$0xff] %v971_v35 }
 0x185   : > { %752 = vst [vmem:[%s1422_s16 + $0x8] sm:$0xff] %v972_v36 }
 0x186 PF: > { %759 = sbr.rel (!%p1317_p12) target bundleno = 398 (0x18e), region = 120  ;;  %s973_s18 = sshll.u32 (%p1317_p12), %s1188_s19, 3 }
 0x187   : > { %s765_s25 = scalar_lea.vmem (%p1317_p12), %s1513_s3, %s973_s18 }
 0x18a   : > { %v795_v37 = vld [vmem:[%s1422_s16] sm:$0xff] (%p1317_p12) }
 0x18b   : > { %796 = vst [vmem:[%s765_s25] sm:$0xff] (%p1317_p12), %v795_v37 }
 0x18c   : > { %v797_v38 = vld [vmem:[%s1422_s16 + $0x8] sm:$0xff] (%p1317_p12) }
 0x18d   : > { %798 = vst [vmem:[%s765_s25 + $0x40] sm:$0xff] %v797_v38 }
 0x18e PF: > { %s13_s22 = sadd.s32 1, %s1200_s22   ;;  %s1522_s10 = sld [smem:[#allocation8_spill]] }
 0x18f   : > { %p10_p6 = scmp.ge.s32.totalorder %s13_s22, 18   ;;  %s1523_s30 = sld [smem:[#allocation6_spill]] }
 0x190   : > { %s1524_s27 = sld [smem:[#allocation7_spill]]  ;;  %s1525_s12 = smov %s1164_s13 }
 0x191   : > { %s1526_s13 = smov %s1315_s9  ;;  %s1527_s14 = smov %s1172_s15 }
 0x192   : > { %s1528_s15 = smov %s1312_s8  ;;  %s1529_s16 = smov %s1180_s17 }
 0x193   : > { %s1531_s18 = smov %s1192_s20  ;;  %s1532_s19 = smov %s1196_s21 }
 0x194   : > { %s1530_s17 = smov %s1522_s10  ;;  %12 = sbr.rel (!%p10_p6) target bundleno = 6 (0x6), region = 200 }
 0x195   : > { %s1533_s20 = smov %s1523_s30 }
 0x196   : > { %s1534_s21 = smov %s1524_s27 }

// kernel: no_leaf_forward.13
= control target key start
LH: loop header
LB: loop body
LE: loop exit
PB: predicated region body
PF: predicated region fallthrough
CT: control target
= control target key end

     0   :  { %s1137_s9 = smov 0   ;;  %s1139_s10 = smov 0   ;;  %s1412_s0 = inlined_call_operand.vmem [shape: bf16[16,2048], index: 0, kind: input, shape index: {}]   ;;  %s1413_s1 = inlined_call_operand.vmem [shape: bf16[2048,2048], index: 1, kind: input, shape index: {}]   ;;  %s1414_s2 = inlined_call_operand.vmem [shape: bf16[16,2048], index: 2, kind: output, shape index: {}]  }
   0x1   :  { %s1141_s11 = smov 0   ;;  %s1143_s12 = smov 0  }
   0x2   :  { %s1145_s13 = smov 0   ;;  %s1147_s14 = smov 0  }
   0x3   :  { %s1149_s15 = smov 0   ;;  %s1151_s16 = smov 0  }
   0x4   :  { %s1153_s17 = smov 0   ;;  %s1155_s18 = smov 0  }
   0x5   :  { %s1157_s19 = smov 0  }
   0x6 LB: > { %s829_s20 = sadd.s32 4294967295, %s1119_s19   ;;  %s24_s21 = sadd.s32 1, %s1111_s17  ;;  %s1119_s19 = sphi %s1157_s19, %s12_s19   ;;  %s1115_s18 = sphi %s1155_s18, %s1433_s18   ;;  %s1111_s17 = sphi %s1153_s17, %s1432_s17   ;;  %s1107_s16 = sphi %s1151_s16, %s1431_s16   ;;  %s1103_s15 = sphi %s1149_s15, %s1430_s15   ;;  %s1099_s14 = sphi %s1147_s14, %s1429_s14   ;;  %s1095_s13 = sphi %s1145_s13, %s1428_s13   ;;  %s1091_s12 = sphi %s1143_s12, %s1427_s12   ;;  %s1087_s11 = sphi %s1141_s11, %s1426_s11   ;;  %s1083_s10 = sphi %s1139_s10, %s1425_s10   ;;  %s1079_s9 = sphi %s1137_s9, %s1424_s9  }
   0x7   : > { %p25_p0 = scmp.ge.s32.totalorder %s24_s21, 8  ;;  %s27_s22 = sadd.s32 1, %s1115_s18 }
   0x8   : > { %s40_s23 = sadd.s32 1, %s1099_s14  ;;  %p47_p1 = scmp.ne.s32.totalorder %s1099_s14, %s1095_s13 }
   0x9   : > { %s1435_s21 = smov (%p25_p0, %s24_s21), 0  ;;  %s1437_s22 = smov (!%p25_p0, %s27_s22), %s1115_s18 }
   0xa   : > { %1417 = sst [smem:[#allocation6_spill]] %s1435_s21  ;;  %s36_s24 = ssub.s32 %s1111_s17, %s1435_s21 }
   0xb   : > { %p48_p2 = scmp.eq.s32.totalorder %s1119_s19, 0  ;;  %p29_p3 = scmp.ge.s32.totalorder %s1437_s22, 8 }
   0xc   : > { %p38_p4 = scmp.eq.s32.totalorder %s36_s24, 0  ;;  %s68_s26 = sadd.s32 1, %s1091_s12 }
   0xd   : > { %p1204_p5 = por %p48_p2, %p47_p1  ;;  %s1439_s22 = smov (%p29_p3, %s1437_s22), 0 }
   0xe   : > { %1419 = sst [smem:[#allocation7_spill]] %s1439_s22  ;;  %s64_s28 = ssub.s32 %s1115_s18, %s1439_s22 }
   0xf   : > { %s1212_s27 = scalar_select %p38_p4, %s1099_s14, %s40_s23  }
  0x10   : > { %p75_p6 = scmp.ne.s32.totalorder %s1091_s12, %s1087_s11  ;;  %s65_s29 = sor.u32 %s64_s28, %s36_s24 }
  0x11   : > { %p94_p7 = scmp.eq.s32.totalorder %s64_s28, 0  ;;  %p66_p8 = scmp.eq.s32.totalorder %s65_s29, 0 }
  0x12   : > { %p1218_p9 = por %p75_p6, %p48_p2  ;;  %s96_s3 = sadd.s32 1, %s1083_s10 }
  0x13   : > { %p106_p10 = scmp.ne.s32.totalorder %s1083_s10, %s1079_s9  ;;  %p107_p11 = scmp.eq.s32.totalorder %s829_s20, 63 }
  0x14   : > { %s1226_s4 = scalar_select %p66_p8, %s1091_s12, %s68_s26  }
  0x15   : > { %s1229_s5 = scalar_select %p94_p7, %s1083_s10, %s96_s3  }
  0x16   : > { %p1231_p12 = por %p107_p11, %p106_p10  ;;  %p832_p13 = scmp.ge.s32.totalorder %s1119_s19, 64 }
  0x18   : > { %129 = sbr.rel (%p832_p13) target bundleno = 77 (0x4d), region = 16 }
  0x1f   : > { %132 = sbr.rel (!%p1204_p5) target bundleno = 38 (0x26), region = 20  ;;  %s134_s7 = sand.u32 (%p1204_p5), 1, %s1099_s14  }
  0x20   : > { %s888_s8 = sshll.u32 (%p1204_p5), %s1111_s17, 3  ;;  %s833_s23 = sshll.u32 (%p1204_p5), %s134_s7, 4 }
  0x21   : > { %s142_s28 = scalar_lea.vmem (%p1204_p5), %s1412_s0, %s888_s8  ;;  %s136_s20 = scalar_lea.vmem (%p1204_p5), [#allocation3], %s833_s23 }
  0x22   : > { %v172_v0 = vld [vmem:[%s142_s28] sm:$0xff] (%p1204_p5) }
  0x23   : > { %v174_v1 = vld [vmem:[%s142_s28 + $0x40] sm:$0xff] (%p1204_p5)  ;;  %173 = vst [vmem:[%s136_s20] sm:$0xff] (%p1204_p5), %v172_v0 }
  0x24   : > { %175 = vst [vmem:[%s136_s20 + $0x8] sm:$0xff] (%p1204_p5), %v174_v1 }
  0x26 PF: > { %181 = sbr.rel (!%p1218_p9) target bundleno = 77 (0x4d), region = 58  ;;  %s183_s25 = sand.u32 (%p1218_p9), 1, %s1091_s12  }
  0x27   : > { %s838_s29 = sshll.u32 (%p1218_p9), %s1115_s18, 1  ;;  %s836_s3 = sshll.u32 (%p1218_p9), %s183_s25, 8 }
  0x28   : > { %s889_s7 = sshll.u32 (%p1218_p9), %s1111_s17, 9  ;;  %s1256_s30 = scalar_lea.vmem (%p1218_p9), [#allocation4], %s836_s3 }
  0x29   : > { %s189_s22 = sadd.s32 (%p1218_p9), %s889_s7, %s838_s29 }
  0x2a   : > { %s840_s21 = sshll.u32 (%p1218_p9), %s189_s22, 2 }
  0x2b   : > { %s1251_s26 = scalar_lea.vmem (%p1218_p9), %s1413_s1, %s840_s21 }
  0x2c   : > { %v281_v2 = vld [vmem:[%s1251_s26] sm:$0xff] (%p1218_p9) }
  0x2d   : > { %v283_v3 = vld [vmem:[%s1251_s26 + $0x40] sm:$0xff]  ;;  %282 = vst [vmem:[%s1256_s30] sm:$0xff] %v281_v2 }
  0x2e   : > { %v285_v4 = vld [vmem:[%s1251_s26 + $0x80] sm:$0xff]  ;;  %284 = vst [vmem:[%s1256_s30 + $0x8] sm:$0xff] %v283_v3 }
  0x2f   : > { %286 = vst [vmem:[%s1256_s30 + $0x10] sm:$0xff] %v285_v4  ;;  %v287_v5 = vld [vmem:[%s1251_s26 + $0xc0] sm:$0xff] }
  0x30   : > { %v289_v6 = vld [vmem:[%s1251_s26 + $0x100] sm:$0xff]  ;;  %288 = vst [vmem:[%s1256_s30 + $0x18] sm:$0xff] %v287_v5 }
  0x31   : > { %v291_v7 = vld [vmem:[%s1251_s26 + $0x140] sm:$0xff]  ;;  %290 = vst [vmem:[%s1256_s30 + $0x20] sm:$0xff] %v289_v6 }
  0x32   : > { %292 = vst [vmem:[%s1256_s30 + $0x28] sm:$0xff] %v291_v7  ;;  %v293_v8 = vld [vmem:[%s1251_s26 + $0x180] sm:$0xff] }
  0x33   : > { %v295_v9 = vld [vmem:[%s1251_s26 + $0x1c0] sm:$0xff]  ;;  %294 = vst [vmem:[%s1256_s30 + $0x30] sm:$0xff] %v293_v8 }
  0x34   : > { %v297_v10 = vld [vmem:[%s1251_s26 + $0x200] sm:$0xff]  ;;  %296 = vst [vmem:[%s1256_s30 + $0x38] sm:$0xff] %v295_v9 }
  0x35   : > { %298 = vst [vmem:[%s1256_s30 + $0x40] sm:$0xff] %v297_v10  ;;  %v299_v11 = vld [vmem:[%s1251_s26 + $0x240] sm:$0xff] }
  0x36   : > { %v301_v12 = vld [vmem:[%s1251_s26 + $0x280] sm:$0xff]  ;;  %300 = vst [vmem:[%s1256_s30 + $0x48] sm:$0xff] %v299_v11 }
  0x37   : > { %v303_v13 = vld [vmem:[%s1251_s26 + $0x2c0] sm:$0xff]  ;;  %302 = vst [vmem:[%s1256_s30 + $0x50] sm:$0xff] %v301_v12 }
  0x38   : > { %304 = vst [vmem:[%s1256_s30 + $0x58] sm:$0xff] %v303_v13  ;;  %v305_v14 = vld [vmem:[%s1251_s26 + $0x300] sm:$0xff] }
  0x39   : > { %v307_v15 = vld [vmem:[%s1251_s26 + $0x340] sm:$0xff]  ;;  %306 = vst [vmem:[%s1256_s30 + $0x60] sm:$0xff] %v305_v14 }
  0x3a   : > { %v309_v16 = vld [vmem:[%s1251_s26 + $0x380] sm:$0xff]  ;;  %308 = vst [vmem:[%s1256_s30 + $0x68] sm:$0xff] %v307_v15 }
  0x3b   : > { %310 = vst [vmem:[%s1256_s30 + $0x70] sm:$0xff] %v309_v16  ;;  %v311_v17 = vld [vmem:[%s1251_s26 + $0x3c0] sm:$0xff] }
  0x3c   : > { %v313_v18 = vld [vmem:[%s1251_s26 + $0x400] sm:$0xff]  ;;  %312 = vst [vmem:[%s1256_s30 + $0x78] sm:$0xff] %v311_v17 }
  0x3d   : > { %v315_v19 = vld [vmem:[%s1251_s26 + $0x440] sm:$0xff]  ;;  %314 = vst [vmem:[%s1256_s30 + $0x80] sm:$0xff] %v313_v18 }
  0x3e   : > { %316 = vst [vmem:[%s1256_s30 + $0x88] sm:$0xff] %v315_v19  ;;  %v317_v20 = vld [vmem:[%s1251_s26 + $0x480] sm:$0xff] }
  0x3f   : > { %v319_v21 = vld [vmem:[%s1251_s26 + $0x4c0] sm:$0xff]  ;;  %318 = vst [vmem:[%s1256_s30 + $0x90] sm:$0xff] %v317_v20 }
  0x40   : > { %v321_v22 = vld [vmem:[%s1251_s26 + $0x500] sm:$0xff]  ;;  %320 = vst [vmem:[%s1256_s30 + $0x98] sm:$0xff] %v319_v21 }
  0x41   : > { %322 = vst [vmem:[%s1256_s30 + $0xa0] sm:$0xff] %v321_v22  ;;  %v323_v23 = vld [vmem:[%s1251_s26 + $0x540] sm:$0xff] }
  0x42   : > { %v325_v24 = vld [vmem:[%s1251_s26 + $0x580] sm:$0xff]  ;;  %324 = vst [vmem:[%s1256_s30 + $0xa8] sm:$0xff] %v323_v23 }
  0x43   : > { %v327_v25 = vld [vmem:[%s1251_s26 + $0x5c0] sm:$0xff]  ;;  %326 = vst [vmem:[%s1256_s30 + $0xb0] sm:$0xff] %v325_v24 }
  0x44   : > { %328 = vst [vmem:[%s1256_s30 + $0xb8] sm:$0xff] %v327_v25  ;;  %v329_v26 = vld [vmem:[%s1251_s26 + $0x600] sm:$0xff] }
  0x45   : > { %v331_v27 = vld [vmem:[%s1251_s26 + $0x640] sm:$0xff]  ;;  %330 = vst [vmem:[%s1256_s30 + $0xc0] sm:$0xff] %v329_v26 }
  0x46   : > { %v333_v28 = vld [vmem:[%s1251_s26 + $0x680] sm:$0xff]  ;;  %332 = vst [vmem:[%s1256_s30 + $0xc8] sm:$0xff] %v331_v27 }
  0x47   : > { %334 = vst [vmem:[%s1256_s30 + $0xd0] sm:$0xff] %v333_v28  ;;  %v335_v29 = vld [vmem:[%s1251_s26 + $0x6c0] sm:$0xff] }
  0x48   : > { %v337_v30 = vld [vmem:[%s1251_s26 + $0x700] sm:$0xff]  ;;  %336 = vst [vmem:[%s1256_s30 + $0xd8] sm:$0xff] %v335_v29 }
  0x49   : > { %v339_v31 = vld [vmem:[%s1251_s26 + $0x740] sm:$0xff]  ;;  %338 = vst [vmem:[%s1256_s30 + $0xe0] sm:$0xff] %v337_v30 }
  0x4a   : > { %340 = vst [vmem:[%s1256_s30 + $0xe8] sm:$0xff] %v339_v31  ;;  %v341_v32 = vld [vmem:[%s1251_s26 + $0x780] sm:$0xff] }
  0x4b   : > { %v343_v33 = vld [vmem:[%s1251_s26 + $0x7c0] sm:$0xff]  ;;  %342 = vst [vmem:[%s1256_s30 + $0xf0] sm:$0xff] %v341_v32 }
  0x4c   : > { %344 = vst [vmem:[%s1256_s30 + $0xf8] sm:$0xff] %v343_v33 }
  0x4d PF: > { %p841_p0 = scmp.ge.s32.totalorder %s1119_s19, 1  ;;  %p349_p1 = scmp.lt.s32.totalorder %s1119_s19, 65 }
  0x4f   : > { %p350_p2 = pnand %p841_p0, %p349_p1 }
  0x50   : > { %s356_s21 = sand.u32 (!%p350_p2), 1, %s1095_s13   ;;  %s363_s22 = sand.u32 (!%p350_p2), 1, %s1087_s11  }
  0x51   : > { %353 = sbr.rel (%p350_p2) target bundleno = 396 (0x18c), region = 96  ;;  %s1323_s23 = sshll.u32 (!%p350_p2), %s356_s21, 4 }
  0x52   : > { %s843_s28 = sshll.u32 (!%p350_p2), %s363_s22, 8  ;;  %s384_s20 = sand.u32 (!%p350_p2), 1, %s1079_s9  }
  0x53   : > { %s844_s25 = sshll.u32 (!%p350_p2), %s384_s20, 4  ;;  %s358_s29 = scalar_lea.vmem (!%p350_p2), [#allocation3], %s1323_s23 }
  0x54   : > { %s1327_s3 = scalar_lea.vmem (!%p350_p2), [#allocation4], %s843_s28  ;;  %s1329_s7 = scalar_lea.vmem (!%p350_p2), [#allocation5], %s844_s25 }
  0x55   : > { %p845_p3 = scmp.ne.s32.totalorder (!%p350_p2), %s1103_s15, 0 }
  0x58   : > { %396 = sbr.rel (%p845_p3) target bundleno = 95 (0x5f), region = 108  ;;  %v1121_v34 = vmov (!%p845_p3), 0.0  }
  0x59   : > { %397 = vst [vmem:[#allocation2] sm:$0xff] (!%p845_p3), %v1121_v34  ;;  %398 = vst [vmem:[#allocation2 + $0x8] sm:$0xff] (!%p845_p3), %v1121_v34 }
  0x5a   : > { %399 = vst [vmem:[#allocation2 + $0x10] sm:$0xff] (!%p845_p3), %v1121_v34  ;;  %400 = vst [vmem:[#allocation2 + $0x18] sm:$0xff] (!%p845_p3), %v1121_v34 }
  0x5f PF: > { %v982_v35 = vld [vmem:[%s1327_s3 + $0x4] ss:$8 sps:$4 sm:$0xff]   ;;  %v984_v36 = vld [vmem:[%s1327_s3] ss:$8 sps:$4 sm:$0xff]   ;;  %v985_v37 = vld [vmem:[%s1327_s3 + $0x14] ss:$8 sps:$4 sm:$0xff]  }
  0x60   : > { %609 = vmatprep.subr.bf16.mxu0 %v982_v35  ;;  %v987_v38 = vld [vmem:[%s1327_s3 + $0x10] ss:$8 sps:$4 sm:$0xff]   ;;  %v988_v39 = vld [vmem:[%s1327_s3 + $0x24] ss:$8 sps:$4 sm:$0xff]   ;;  %v990_v40 = vld [vmem:[%s1327_s3 + $0x20] ss:$8 sps:$4 sm:$0xff]  }
  0x61   : > { %610 = vmatpush1.bf16.msra.mxu0 %v984_v36  ;;  %v991_v41 = vld [vmem:[%s1327_s3 + $0x34] ss:$8 sps:$4 sm:$0xff]   ;;  %v993_v42 = vld [vmem:[%s1327_s3 + $0x30] ss:$8 sps:$4 sm:$0xff]   ;;  %v994_v43 = vld [vmem:[%s1327_s3 + $0x44] ss:$8 sps:$4 sm:$0xff]  }
  0x62   : > { %611 = vmatprep.subr.bf16.mxu0 %v985_v37  ;;  %v996_v44 = vld [vmem:[%s1327_s3 + $0x40] ss:$8 sps:$4 sm:$0xff]   ;;  %v997_v45 = vld [vmem:[%s1327_s3 + $0x54] ss:$8 sps:$4 sm:$0xff]   ;;  %v999_v46 = vld [vmem:[%s1327_s3 + $0x50] ss:$8 sps:$4 sm:$0xff]  }
  0x63   : > { %v1000_v47 = vld [vmem:[%s1327_s3 + $0x64] ss:$8 sps:$4 sm:$0xff]   ;;  %v1002_v49 = vld [vmem:[%s1327_s3 + $0x60] ss:$8 sps:$4 sm:$0xff]   ;;  %v1003_v50 = vld [vmem:[%s1327_s3 + $0x74] ss:$8 sps:$4 sm:$0xff]  }
  0x64   : > { %v1032_v48 = vld [vmem:[%s358_s29 + $0x4] ss:$8 sps:$4 sm:$0xff]   ;;  %v1005_v51 = vld [vmem:[%s1327_s3 + $0x70] ss:$8 sps:$4 sm:$0xff]   ;;  %v1008_v53 = vld [vmem:[%s1327_s3 + $0x80] ss:$8 sps:$4 sm:$0xff]  }
  0x65   : > { %612 = vmatpush1.bf16.msra.mxu0 %v987_v38  ;;  %641 = vmatprep.mubr.bf16.mxu0 %v1032_v48  ;;  %v1006_v52 = vld [vmem:[%s1327_s3 + $0x84] ss:$8 sps:$4 sm:$0xff]   ;;  %v1009_v54 = vld [vmem:[%s1327_s3 + $0x94] ss:$8 sps:$4 sm:$0xff]   ;;  %v1011_v55 = vld [vmem:[%s1327_s3 + $0x90] ss:$8 sps:$4 sm:$0xff]  }
  0x66   : > { %613 = vmatprep.subr.bf16.mxu0 %v988_v39  ;;  %v1012_v56 = vld [vmem:[%s1327_s3 + $0xa4] ss:$8 sps:$4 sm:$0xff]   ;;  %v1014_v57 = vld [vmem:[%s1327_s3 + $0xa0] ss:$8 sps:$4 sm:$0xff]   ;;  %v1015_v58 = vld [vmem:[%s1327_s3 + $0xb4] ss:$8 sps:$4 sm:$0xff]  }
  0x67   : > { %v1017_v59 = vld [vmem:[%s1327_s3 + $0xb0] ss:$8 sps:$4 sm:$0xff]   ;;  %v1018_v60 = vld [vmem:[%s1327_s3 + $0xc4] ss:$8 sps:$4 sm:$0xff]   ;;  %v1020_v61 = vld [vmem:[%s1327_s3 + $0xc0] ss:$8 sps:$4 sm:$0xff]  }
  0x68   : > { %v1021_v62 = vld [vmem:[%s1327_s3 + $0xd4] ss:$8 sps:$4 sm:$0xff]   ;;  %v1023_v63 = vld [vmem:[%s1327_s3 + $0xd0] ss:$8 sps:$4 sm:$0xff]   ;;  %v1024_v0 = vld [vmem:[%s1327_s3 + $0xe4] ss:$8 sps:$4 sm:$0xff]  }
  0x69   : > { %614 = vmatpush1.bf16.msra.mxu0 %v990_v40  ;;  %v1026_v1 = vld [vmem:[%s1327_s3 + $0xe0] ss:$8 sps:$4 sm:$0xff]   ;;  %v1027_v2 = vld [vmem:[%s1327_s3 + $0xf4] ss:$8 sps:$4 sm:$0xff]   ;;  %v1029_v3 = vld [vmem:[%s1327_s3 + $0xf0] ss:$8 sps:$4 sm:$0xff]  }
  0x6a   : > { %615 = vmatprep.subr.bf16.mxu0 %v991_v41  ;;  %v1030_v4 = vld [vmem:[%s358_s29] ss:$8 sps:$4 sm:$0xff]   ;;  %p880_p4 = scmp.ne.s32.totalorder %s1103_s15, 7 }
  0x6b   : > { %v401_v5 = vld [vmem:[#allocation2] sm:$0xff]  ;;  %v402_v6 = vld [vmem:[#allocation2 + $0x8] sm:$0xff]  ;;  %v403_v8 = vld [vmem:[#allocation2 + $0x10] sm:$0xff] }
  0x6c   : > { %v404_v11 = vld [vmem:[#allocation2 + $0x18] sm:$0xff] }
  0x6d   : > { %616 = vmatpush1.bf16.msra.mxu0 %v993_v42 }
  0x6e   : > { %617 = vmatprep.subr.bf16.mxu0 %v994_v43 }
  0x71   : > { %618 = vmatpush1.bf16.msra.mxu0 %v996_v44 }
  0x72   : > { %619 = vmatprep.subr.bf16.mxu0 %v997_v45 }
  0x75   : > { %620 = vmatpush1.bf16.msra.mxu0 %v999_v46 }
  0x76   : > { %621 = vmatprep.subr.bf16.mxu0 %v1000_v47 }
  0x79   : > { %622 = vmatpush1.bf16.msra.mxu0 %v1002_v49 }
  0x7a   : > { %623 = vmatprep.subr.bf16.mxu0 %v1003_v50 }
  0x7d   : > { %624 = vmatpush1.bf16.msra.mxu0 %v1005_v51 }
  0x7e   : > { %625 = vmatprep.subr.bf16.mxu0 %v1006_v52 }
  0x81   : > { %626 = vmatpush1.bf16.msra.mxu0 %v1008_v53 }
  0x82   : > { %627 = vmatprep.subr.bf16.mxu0 %v1009_v54 }
  0x85   : > { %628 = vmatpush1.bf16.msra.mxu0 %v1011_v55 }
  0x86   : > { %629 = vmatprep.subr.bf16.mxu0 %v1012_v56 }
  0x89   : > { %630 = vmatpush1.bf16.msra.mxu0 %v1014_v57 }
  0x8a   : > { %631 = vmatprep.subr.bf16.mxu0 %v1015_v58 }
  0x8d   : > { %632 = vmatpush1.bf16.msra.mxu0 %v1017_v59 }
  0x8e   : > { %633 = vmatprep.subr.bf16.mxu0 %v1018_v60 }
  0x91   : > { %634 = vmatpush1.bf16.msra.mxu0 %v1020_v61 }
  0x92   : > { %635 = vmatprep.subr.bf16.mxu0 %v1021_v62 }
  0x95   : > { %636 = vmatpush1.bf16.msra.mxu0 %v1023_v63 }
  0x96   : > { %637 = vmatprep.subr.bf16.mxu0 %v1024_v0 }
  0x99   : > { %638 = vmatpush1.bf16.msra.mxu0 %v1026_v1 }
  0x9a   : > { %639 = vmatprep.subr.bf16.mxu0 %v1027_v2 }
  0x9d   : > { %640 = vmatpush1.bf16.msra.mxu0 %v1029_v3 }
  0xa0   : > { %642 = vmatmul.mubr.bf16.vlgmr.msra.gmra.mrb[0].mxu0 %v1030_v4 }
 0x173   : > { %v643_v7 = vpop.f32.mrb[0].mxu0  ;;  %663 = sbr.rel (%p880_p4) target bundleno = 388 (0x184), region = 112 }
 0x174   : > { %v652_v9 = vadd.f32 %v643_v7, %v401_v5  ;;  %v645_v10 = vpop.f32.mrb[1].mxu0 }
 0x175   : > { %v653_v12 = vadd.f32 %v645_v10, %v402_v6  ;;  %v647_v13 = vpop.f32.mrb[2].mxu0 }
 0x176   : > { %656 = vst [vmem:[#allocation2] sm:$0xff] %v652_v9  ;;  %v654_v14 = vadd.f32 %v647_v13, %v403_v8  ;;  %v649_v15 = vpop.f32.mrb[3].mxu0 }
 0x177   : > { %657 = vst [vmem:[#allocation2 + $0x8] sm:$0xff] %v653_v12  ;;  %v655_v16 = vadd.f32 %v649_v15, %v404_v11 }
 0x178   : > { %658 = vst [vmem:[#allocation2 + $0x10] sm:$0xff] %v654_v14 }
 0x179   : > { %659 = vst [vmem:[#allocation2 + $0x18] sm:$0xff] %v655_v16 }
 0x17d   : > { %v664_v17 = vld [vmem:[#allocation2] sm:$0xff] }
 0x17e   : > { %v665_v18 = vld [vmem:[#allocation2 + $0x8] sm:$0xff] }
 0x17f   : > { %v666_v19 = vld [vmem:[#allocation2 + $0x10] sm:$0xff]  ;;  %v890_v20 = vpack.c.bf16 %v665_v18, %v664_v17 }
 0x180   : > { %v667_v21 = vld [vmem:[#allocation2 + $0x18] sm:$0xff] }
 0x181   : > { %v891_v22 = vpack.c.bf16 %v667_v21, %v666_v19  ;;  %680 = vst [vmem:[%s1329_s7] sm:$0xff] %v890_v20 }
 0x183   : > { %681 = vst [vmem:[%s1329_s7 + $0x8] sm:$0xff] %v891_v22 }
 0x184 PF: > { %688 = sbr.rel (!%p1231_p12) target bundleno = 396 (0x18c), region = 116  ;;  %s892_s9 = sshll.u32 (%p1231_p12), %s1107_s16, 3 }
 0x185   : > { %s694_s15 = scalar_lea.vmem (%p1231_p12), %s1414_s2, %s892_s9 }
 0x188   : > { %v724_v23 = vld [vmem:[%s1329_s7] sm:$0xff] (%p1231_p12) }
 0x189   : > { %725 = vst [vmem:[%s694_s15] sm:$0xff] (%p1231_p12), %v724_v23 }
 0x18a   : > { %v726_v24 = vld [vmem:[%s1329_s7 + $0x8] sm:$0xff] (%p1231_p12) }
 0x18b   : > { %727 = vst [vmem:[%s694_s15 + $0x40] sm:$0xff] %v726_v24 }
 0x18c PF: > { %s12_s19 = sadd.s32 1, %s1119_s19   ;;  %s1422_s6 = sld [smem:[#allocation6_spill]] }
 0x18d   : > { %p9_p5 = scmp.ge.s32.totalorder %s12_s19, 66   ;;  %s1423_s24 = sld [smem:[#allocation7_spill]] }
 0x18e   : > { %s1424_s9 = smov %s1083_s10  ;;  %s1425_s10 = smov %s1229_s5 }
 0x18f   : > { %s1426_s11 = smov %s1091_s12  ;;  %s1427_s12 = smov %s1226_s4 }
 0x190   : > { %s1428_s13 = smov %s1099_s14  ;;  %s1429_s14 = smov %s1212_s27 }
 0x191   : > { %s1430_s15 = smov %s1111_s17  ;;  %s1431_s16 = smov %s1115_s18 }
 0x192   : > { %s1432_s17 = smov %s1422_s6  ;;  %11 = sbr.rel (!%p9_p5) target bundleno = 6 (0x6), region = 193 }
 0x193   : > { %s1433_s18 = smov %s1423_s24 }

// kernel: no_leaf_forward.15
= control target key start
LH: loop header
LB: loop body
LE: loop exit
PB: predicated region body
PF: predicated region fallthrough
CT: control target
= control target key end

     0   :  { %s1223_s12 = smov 0   ;;  %s1225_s13 = smov 0   ;;  %s1510_s0 = inlined_call_operand.vmem [shape: bf16[16,1024], index: 0, kind: input, shape index: {}]   ;;  %s1511_s1 = inlined_call_operand.vmem [shape: bf16[1024,1024], index: 1, kind: input, shape index: {}]   ;;  %s1512_s2 = inlined_call_operand.vmem [shape: bf16[1,1024], index: 2, kind: input, shape index: {}]   ;;  %s1513_s3 = inlined_call_operand.vmem [shape: bf16[16,1024], index: 3, kind: output, shape index: {}]  }
   0x1   :  { %s1227_s14 = smov 0   ;;  %s1229_s15 = smov 0  }
   0x2   :  { %s1231_s16 = smov 0   ;;  %s1233_s17 = smov 0  }
   0x3   :  { %s1235_s18 = smov 0   ;;  %s1237_s19 = smov 0  }
   0x4   :  { %s1239_s20 = smov 0   ;;  %s1241_s21 = smov 0  }
   0x5   :  { %s1243_s22 = smov 0  }
   0x6 LB: > { %s909_s23 = sadd.s32 4294967295, %s1200_s22   ;;  %s25_s24 = sadd.s32 1, %s1192_s20  ;;  %s1200_s22 = sphi %s1243_s22, %s13_s22   ;;  %s1196_s21 = sphi %s1241_s21, %s1534_s21   ;;  %s1192_s20 = sphi %s1239_s20, %s1533_s20   ;;  %s1188_s19 = sphi %s1237_s19, %s1532_s19   ;;  %s1184_s18 = sphi %s1235_s18, %s1531_s18   ;;  %s1180_s17 = sphi %s1233_s17, %s1530_s17   ;;  %s1176_s16 = sphi %s1231_s16, %s1529_s16   ;;  %s1172_s15 = sphi %s1229_s15, %s1528_s15   ;;  %s1168_s14 = sphi %s1227_s14, %s1527_s14   ;;  %s1164_s13 = sphi %s1225_s13, %s1526_s13   ;;  %s1160_s12 = sphi %s1223_s12, %s1525_s12  }
   0x7   : > { %p26_p0 = scmp.ge.s32.totalorder %s25_s24, 4  ;;  %s28_s25 = sadd.s32 1, %s1196_s21 }
   0x8   : > { %s41_s26 = sadd.s32 1, %s1180_s17  ;;  %p48_p1 = scmp.ne.s32.totalorder %s1180_s17, %s1176_s16 }
   0x9   : > { %s1536_s24 = smov (%p26_p0, %s25_s24), 0  ;;  %s1538_s25 = smov (!%p26_p0, %s28_s25), %s1196_s21 }
   0xa   : > { %1516 = sst [smem:[#allocation6_spill]] %s1536_s24  ;;  %s37_s27 = ssub.s32 %s1192_s20, %s1536_s24 }
   0xb   : > { %p49_p2 = scmp.eq.s32.totalorder %s1200_s22, 0  ;;  %p30_p3 = scmp.ge.s32.totalorder %s1538_s25, 4 }
   0xc   : > { %p39_p4 = scmp.eq.s32.totalorder %s37_s27, 0  ;;  %s69_s29 = sadd.s32 1, %s1172_s15 }
   0xd   : > { %p1290_p5 = por %p49_p2, %p48_p1  ;;  %s1540_s25 = smov (%p30_p3, %s1538_s25), 0 }
   0xe   : > { %1518 = sst [smem:[#allocation7_spill]] %s1540_s25  ;;  %s65_s4 = ssub.s32 %s1196_s21, %s1540_s25 }
   0xf   : > { %s1298_s30 = scalar_select %p39_p4, %s1180_s17, %s41_s26  }
  0x10   : > { %p76_p6 = scmp.ne.s32.totalorder %s1172_s15, %s1168_s14  ;;  %s66_s5 = sor.u32 %s65_s4, %s37_s27 }
  0x11   : > { %1519 = sst [smem:[#allocation8_spill]] %s1298_s30  ;;  %p121_p7 = scmp.eq.s32.totalorder %s65_s4, 0 }
  0x12   : > { %p67_p8 = scmp.eq.s32.totalorder %s66_s5, 0  ;;  %p1304_p9 = por %p76_p6, %p49_p2 }
  0x13   : > { %s123_s7 = sadd.s32 1, %s1164_s13  ;;  %p133_p10 = scmp.ne.s32.totalorder %s1164_s13, %s1160_s12 }
  0x14   : > { %s1312_s8 = scalar_select %p67_p8, %s1172_s15, %s69_s29  }
  0x15   : > { %s1315_s9 = scalar_select %p121_p7, %s1164_s13, %s123_s7  }
  0x16   : > { %p134_p11 = scmp.eq.s32.totalorder %s909_s23, 15  ;;  %p912_p13 = scmp.ge.s32.totalorder %s1200_s22, 16 }
  0x18   : > { %p1317_p12 = por %p134_p11, %p133_p10  ;;  %156 = sbr.rel (%p912_p13) target bundleno = 77 (0x4d), region = 16 }
  0x1f   : > { %159 = sbr.rel (!%p1290_p5) target bundleno = 38 (0x26), region = 20  ;;  %s161_s11 = sand.u32 (%p1290_p5), 1, %s1180_s17  }
  0x20   : > { %s969_s26 = sshll.u32 (%p1290_p5), %s1192_s20, 3  ;;  %s913_s27 = sshll.u32 (%p1290_p5), %s161_s11, 4 }
  0x21   : > { %s169_s5 = scalar_lea.vmem (%p1290_p5), %s1510_s0, %s969_s26  ;;  %s163_s23 = scalar_lea.vmem (%p1290_p5), [#allocation3], %s913_s27 }
  0x22   : > { %v199_v0 = vld [vmem:[%s169_s5] sm:$0xff] (%p1290_p5) }
  0x23   : > { %v201_v1 = vld [vmem:[%s169_s5 + $0x20] sm:$0xff] (%p1290_p5)  ;;  %200 = vst [vmem:[%s163_s23] sm:$0xff] (%p1290_p5), %v199_v0 }
  0x24   : > { %202 = vst [vmem:[%s163_s23 + $0x8] sm:$0xff] (%p1290_p5), %v201_v1 }
  0x26 PF: > { %208 = sbr.rel (!%p1304_p9) target bundleno = 77 (0x4d), region = 58  ;;  %s210_s28 = sand.u32 (%p1304_p9), 1, %s1172_s15  }
  0x27   : > { %s918_s7 = sshll.u32 (%p1304_p9), %s1196_s21, 1  ;;  %s916_s25 = sshll.u32 (%p1304_p9), %s210_s28, 8 }
  0x28   : > { %s970_s11 = sshll.u32 (%p1304_p9), %s1192_s20, 8  ;;  %s1342_s6 = scalar_lea.vmem (%p1304_p9), [#allocation4], %s916_s25 }
  0x29   : > { %s216_s24 = sadd.s32 (%p1304_p9), %s970_s11, %s918_s7 }
  0x2a   : > { %s920_s30 = sshll.u32 (%p1304_p9), %s216_s24, 2 }
  0x2b   : > { %s1337_s4 = scalar_lea.vmem (%p1304_p9), %s1511_s1, %s920_s30 }
  0x2c   : > { %v308_v2 = vld [vmem:[%s1337_s4] sm:$0xff] (%p1304_p9) }
  0x2d   : > { %v310_v3 = vld [vmem:[%s1337_s4 + $0x20] sm:$0xff]  ;;  %309 = vst [vmem:[%s1342_s6] sm:$0xff] %v308_v2 }
  0x2e   : > { %v312_v4 = vld [vmem:[%s1337_s4 + $0x40] sm:$0xff]  ;;  %311 = vst [vmem:[%s1342_s6 + $0x8] sm:$0xff] %v310_v3 }
  0x2f   : > { %313 = vst [vmem:[%s1342_s6 + $0x10] sm:$0xff] %v312_v4  ;;  %v314_v5 = vld [vmem:[%s1337_s4 + $0x60] sm:$0xff] }
  0x30   : > { %v316_v6 = vld [vmem:[%s1337_s4 + $0x80] sm:$0xff]  ;;  %315 = vst [vmem:[%s1342_s6 + $0x18] sm:$0xff] %v314_v5 }
  0x31   : > { %v318_v7 = vld [vmem:[%s1337_s4 + $0xa0] sm:$0xff]  ;;  %317 = vst [vmem:[%s1342_s6 + $0x20] sm:$0xff] %v316_v6 }
  0x32   : > { %319 = vst [vmem:[%s1342_s6 + $0x28] sm:$0xff] %v318_v7  ;;  %v320_v8 = vld [vmem:[%s1337_s4 + $0xc0] sm:$0xff] }
  0x33   : > { %v322_v9 = vld [vmem:[%s1337_s4 + $0xe0] sm:$0xff]  ;;  %321 = vst [vmem:[%s1342_s6 + $0x30] sm:$0xff] %v320_v8 }
  0x34   : > { %v324_v10 = vld [vmem:[%s1337_s4 + $0x100] sm:$0xff]  ;;  %323 = vst [vmem:[%s1342_s6 + $0x38] sm:$0xff] %v322_v9 }
  0x35   : > { %325 = vst [vmem:[%s1342_s6 + $0x40] sm:$0xff] %v324_v10  ;;  %v326_v11 = vld [vmem:[%s1337_s4 + $0x120] sm:$0xff] }
  0x36   : > { %v328_v12 = vld [vmem:[%s1337_s4 + $0x140] sm:$0xff]  ;;  %327 = vst [vmem:[%s1342_s6 + $0x48] sm:$0xff] %v326_v11 }
  0x37   : > { %v330_v13 = vld [vmem:[%s1337_s4 + $0x160] sm:$0xff]  ;;  %329 = vst [vmem:[%s1342_s6 + $0x50] sm:$0xff] %v328_v12 }
  0x38   : > { %331 = vst [vmem:[%s1342_s6 + $0x58] sm:$0xff] %v330_v13  ;;  %v332_v14 = vld [vmem:[%s1337_s4 + $0x180] sm:$0xff] }
  0x39   : > { %v334_v15 = vld [vmem:[%s1337_s4 + $0x1a0] sm:$0xff]  ;;  %333 = vst [vmem:[%s1342_s6 + $0x60] sm:$0xff] %v332_v14 }
  0x3a   : > { %v336_v16 = vld [vmem:[%s1337_s4 + $0x1c0] sm:$0xff]  ;;  %335 = vst [vmem:[%s1342_s6 + $0x68] sm:$0xff] %v334_v15 }
  0x3b   : > { %337 = vst [vmem:[%s1342_s6 + $0x70] sm:$0xff] %v336_v16  ;;  %v338_v17 = vld [vmem:[%s1337_s4 + $0x1e0] sm:$0xff] }
  0x3c   : > { %v340_v18 = vld [vmem:[%s1337_s4 + $0x200] sm:$0xff]  ;;  %339 = vst [vmem:[%s1342_s6 + $0x78] sm:$0xff] %v338_v17 }
  0x3d   : > { %v342_v19 = vld [vmem:[%s1337_s4 + $0x220] sm:$0xff]  ;;  %341 = vst [vmem:[%s1342_s6 + $0x80] sm:$0xff] %v340_v18 }
  0x3e   : > { %343 = vst [vmem:[%s1342_s6 + $0x88] sm:$0xff] %v342_v19  ;;  %v344_v20 = vld [vmem:[%s1337_s4 + $0x240] sm:$0xff] }
  0x3f   : > { %v346_v21 = vld [vmem:[%s1337_s4 + $0x260] sm:$0xff]  ;;  %345 = vst [vmem:[%s1342_s6 + $0x90] sm:$0xff] %v344_v20 }
  0x40   : > { %v348_v22 = vld [vmem:[%s1337_s4 + $0x280] sm:$0xff]  ;;  %347 = vst [vmem:[%s1342_s6 + $0x98] sm:$0xff] %v346_v21 }
  0x41   : > { %349 = vst [vmem:[%s1342_s6 + $0xa0] sm:$0xff] %v348_v22  ;;  %v350_v23 = vld [vmem:[%s1337_s4 + $0x2a0] sm:$0xff] }
  0x42   : > { %v352_v24 = vld [vmem:[%s1337_s4 + $0x2c0] sm:$0xff]  ;;  %351 = vst [vmem:[%s1342_s6 + $0xa8] sm:$0xff] %v350_v23 }
  0x43   : > { %v354_v25 = vld [vmem:[%s1337_s4 + $0x2e0] sm:$0xff]  ;;  %353 = vst [vmem:[%s1342_s6 + $0xb0] sm:$0xff] %v352_v24 }
  0x44   : > { %355 = vst [vmem:[%s1342_s6 + $0xb8] sm:$0xff] %v354_v25  ;;  %v356_v26 = vld [vmem:[%s1337_s4 + $0x300] sm:$0xff] }
  0x45   : > { %v358_v27 = vld [vmem:[%s1337_s4 + $0x320] sm:$0xff]  ;;  %357 = vst [vmem:[%s1342_s6 + $0xc0] sm:$0xff] %v356_v26 }
  0x46   : > { %v360_v28 = vld [vmem:[%s1337_s4 + $0x340] sm:$0xff]  ;;  %359 = vst [vmem:[%s1342_s6 + $0xc8] sm:$0xff] %v358_v27 }
  0x47   : > { %361 = vst [vmem:[%s1342_s6 + $0xd0] sm:$0xff] %v360_v28  ;;  %v362_v29 = vld [vmem:[%s1337_s4 + $0x360] sm:$0xff] }
  0x48   : > { %v364_v30 = vld [vmem:[%s1337_s4 + $0x380] sm:$0xff]  ;;  %363 = vst [vmem:[%s1342_s6 + $0xd8] sm:$0xff] %v362_v29 }
  0x49   : > { %v366_v31 = vld [vmem:[%s1337_s4 + $0x3a0] sm:$0xff]  ;;  %365 = vst [vmem:[%s1342_s6 + $0xe0] sm:$0xff] %v364_v30 }
  0x4a   : > { %367 = vst [vmem:[%s1342_s6 + $0xe8] sm:$0xff] %v366_v31  ;;  %v368_v32 = vld [vmem:[%s1337_s4 + $0x3c0] sm:$0xff] }
  0x4b   : > { %v370_v33 = vld [vmem:[%s1337_s4 + $0x3e0] sm:$0xff]  ;;  %369 = vst [vmem:[%s1342_s6 + $0xf0] sm:$0xff] %v368_v32 }
  0x4c   : > { %371 = vst [vmem:[%s1342_s6 + $0xf8] sm:$0xff] %v370_v33 }
  0x4d PF: > { %p921_p0 = scmp.ge.s32.totalorder %s1200_s22, 1  ;;  %p384_p1 = scmp.lt.s32.totalorder %s1200_s22, 17 }
  0x4f   : > { %p385_p2 = pnand %p921_p0, %p384_p1 }
  0x50   : > { %s391_s24 = sand.u32 (!%p385_p2), 1, %s1176_s16   ;;  %s398_s25 = sand.u32 (!%p385_p2), 1, %s1168_s14  }
  0x51   : > { %388 = sbr.rel (%p385_p2) target bundleno = 398 (0x18e), region = 100  ;;  %s1409_s30 = sshll.u32 (!%p385_p2), %s391_s24, 4 }
  0x52   : > { %s923_s27 = sshll.u32 (!%p385_p2), %s398_s25, 8  ;;  %s425_s5 = sand.u32 (!%p385_p2), 1, %s1160_s12  }
  0x53   : > { %s925_s23 = sshll.u32 (!%p385_p2), %s1188_s19, 1  ;;  %s924_s28 = sshll.u32 (!%p385_p2), %s425_s5, 4 }
  0x54   : > { %p433_p3 = scmp.lt.s32.totalorder (!%p385_p2), %s925_s23, 7  ;;  %s393_s26 = scalar_lea.vmem (!%p385_p2), [#allocation3], %s1409_s30 }
  0x55   : > { %s1420_s4 = scalar_lea.vmem (!%p385_p2), [#allocation4], %s923_s27  ;;  %s1422_s16 = scalar_lea.vmem (!%p385_p2), [#allocation5], %s924_s28 }
  0x56   : > { %p926_p4 = scmp.ne.s32.totalorder (!%p385_p2), %s1184_s18, 0 }
  0x58   : > { %s1542_s23 = smov (!%p433_p3, %s925_s23), 7  ;;  %442 = sbr.rel (%p926_p4) target bundleno = 95 (0x5f), region = 112 }
  0x59   : > { %s435_s29 = scalar_lea.vmem %s1512_s2, %s1542_s23  ;;  %v1202_v34 = vmov (!%p926_p4), 0.0  }
  0x5a   : > { %443 = vst [vmem:[#allocation2] sm:$0xff] (!%p926_p4), %v1202_v34  ;;  %444 = vst [vmem:[#allocation2 + $0x8] sm:$0xff] (!%p926_p4), %v1202_v34 }
  0x5b   : > { %445 = vst [vmem:[#allocation2 + $0x10] sm:$0xff] (!%p926_p4), %v1202_v34  ;;  %446 = vst [vmem:[#allocation2 + $0x18] sm:$0xff] (!%p926_p4), %v1202_v34 }
  0x5f PF: > { %v1063_v35 = vld [vmem:[%s1420_s4 + $0x4] ss:$8 sps:$4 sm:$0xff]   ;;  %v1065_v36 = vld [vmem:[%s1420_s4] ss:$8 sps:$4 sm:$0xff]   ;;  %v1066_v37 = vld [vmem:[%s1420_s4 + $0x14] ss:$8 sps:$4 sm:$0xff]  }
  0x60   : > { %655 = vmatprep.subr.bf16.mxu0 %v1063_v35  ;;  %v1068_v38 = vld [vmem:[%s1420_s4 + $0x10] ss:$8 sps:$4 sm:$0xff]   ;;  %v1069_v39 = vld [vmem:[%s1420_s4 + $0x24] ss:$8 sps:$4 sm:$0xff]   ;;  %v1071_v40 = vld [vmem:[%s1420_s4 + $0x20] ss:$8 sps:$4 sm:$0xff]  }
  0x61   : > { %656 = vmatpush1.bf16.msra.mxu0 %v1065_v36  ;;  %v1072_v41 = vld [vmem:[%s1420_s4 + $0x34] ss:$8 sps:$4 sm:$0xff]   ;;  %v1074_v42 = vld [vmem:[%s1420_s4 + $0x30] ss:$8 sps:$4 sm:$0xff]   ;;  %v1075_v43 = vld [vmem:[%s1420_s4 + $0x44] ss:$8 sps:$4 sm:$0xff]  }
  0x62   : > { %657 = vmatprep.subr.bf16.mxu0 %v1066_v37  ;;  %v1077_v44 = vld [vmem:[%s1420_s4 + $0x40] ss:$8 sps:$4 sm:$0xff]   ;;  %v1078_v45 = vld [vmem:[%s1420_s4 + $0x54] ss:$8 sps:$4 sm:$0xff]   ;;  %v1080_v46 = vld [vmem:[%s1420_s4 + $0x50] ss:$8 sps:$4 sm:$0xff]  }
  0x63   : > { %v1081_v47 = vld [vmem:[%s1420_s4 + $0x64] ss:$8 sps:$4 sm:$0xff]   ;;  %v1083_v49 = vld [vmem:[%s1420_s4 + $0x60] ss:$8 sps:$4 sm:$0xff]   ;;  %v1084_v50 = vld [vmem:[%s1420_s4 + $0x74] ss:$8 sps:$4 sm:$0xff]  }
  0x64   : > { %v1113_v48 = vld [vmem:[%s393_s26 + $0x4] ss:$8 sps:$4 sm:$0xff]   ;;  %v1086_v51 = vld [vmem:[%s1420_s4 + $0x70] ss:$8 sps:$4 sm:$0xff]   ;;  %v1089_v53 = vld [vmem:[%s1420_s4 + $0x80] ss:$8 sps:$4 sm:$0xff]  }
  0x65   : > { %658 = vmatpush1.bf16.msra.mxu0 %v1068_v38  ;;  %687 = vmatprep.mubr.bf16.mxu0 %v1113_v48  ;;  %v1087_v52 = vld [vmem:[%s1420_s4 + $0x84] ss:$8 sps:$4 sm:$0xff]   ;;  %v1090_v54 = vld [vmem:[%s1420_s4 + $0x94] ss:$8 sps:$4 sm:$0xff]   ;;  %v1092_v55 = vld [vmem:[%s1420_s4 + $0x90] ss:$8 sps:$4 sm:$0xff]  }
  0x66   : > { %659 = vmatprep.subr.bf16.mxu0 %v1069_v39  ;;  %v1093_v56 = vld [vmem:[%s1420_s4 + $0xa4] ss:$8 sps:$4 sm:$0xff]   ;;  %v1095_v57 = vld [vmem:[%s1420_s4 + $0xa0] ss:$8 sps:$4 sm:$0xff]   ;;  %v1096_v58 = vld [vmem:[%s1420_s4 + $0xb4] ss:$8 sps:$4 sm:$0xff]  }
  0x67   : > { %v1098_v59 = vld [vmem:[%s1420_s4 + $0xb0] ss:$8 sps:$4 sm:$0xff]   ;;  %v1099_v60 = vld [vmem:[%s1420_s4 + $0xc4] ss:$8 sps:$4 sm:$0xff]   ;;  %v1101_v61 = vld [vmem:[%s1420_s4 + $0xc0] ss:$8 sps:$4 sm:$0xff]  }
  0x68   : > { %v1102_v62 = vld [vmem:[%s1420_s4 + $0xd4] ss:$8 sps:$4 sm:$0xff]   ;;  %v1104_v63 = vld [vmem:[%s1420_s4 + $0xd0] ss:$8 sps:$4 sm:$0xff]   ;;  %v1105_v0 = vld [vmem:[%s1420_s4 + $0xe4] ss:$8 sps:$4 sm:$0xff]  }
  0x69   : > { %660 = vmatpush1.bf16.msra.mxu0 %v1071_v40  ;;  %v1107_v1 = vld [vmem:[%s1420_s4 + $0xe0] ss:$8 sps:$4 sm:$0xff]   ;;  %v1108_v2 = vld [vmem:[%s1420_s4 + $0xf4] ss:$8 sps:$4 sm:$0xff]   ;;  %v1110_v3 = vld [vmem:[%s1420_s4 + $0xf0] ss:$8 sps:$4 sm:$0xff]  }
  0x6a   : > { %661 = vmatprep.subr.bf16.mxu0 %v1072_v41  ;;  %v1111_v4 = vld [vmem:[%s393_s26] ss:$8 sps:$4 sm:$0xff]   ;;  %p961_p5 = scmp.ne.s32.totalorder %s1184_s18, 3 }
  0x6b   : > { %v447_v5 = vld [vmem:[#allocation2] sm:$0xff]  ;;  %v448_v6 = vld [vmem:[#allocation2 + $0x8] sm:$0xff]  ;;  %v449_v8 = vld [vmem:[#allocation2 + $0x10] sm:$0xff]  ;;  %v717_v18 = vlaneseq (!%p961_p5) }
  0x6c   : > { %v450_v11 = vld [vmem:[#allocation2 + $0x18] sm:$0xff]  ;;  %v714_v17 = vld [vmem:[%s435_s29] sm:$0x3] (!%p961_p5) }
  0x6d   : > { %662 = vmatpush1.bf16.msra.mxu0 %v1074_v42  ;;  %v715_v19 = vunpack.c.l.bf16 (!%p961_p5), %v714_v17  ;;  %v718_v20 = vshrl.u32 (!%p961_p5), %v717_v18, 7 }
  0x6e   : > { %663 = vmatprep.subr.bf16.mxu0 %v1075_v43 }
  0x6f   : > { %v719_v21 = vsub.s32 (!%p961_p5), 0, %v718_v20  ;;  %v723_v22 = vsub.s32 (!%p961_p5), 2, %v718_v20 }
  0x71   : > { %664 = vmatpush1.bf16.msra.mxu0 %v1077_v44  ;;  %v720_v24 = vrot.slane (!%p961_p5), %v715_v19, %v719_v21  ;;  %v724_v25 = vrot.slane (!%p961_p5), %v715_v19, %v723_v22 }
  0x72   : > { %665 = vmatprep.subr.bf16.mxu0 %v1078_v45 }
  0x73   : > { %v730_v29 = vrot.slane (!%p961_p5), %v720_v24, %v719_v21  ;;  %v734_v30 = vrot.slane (!%p961_p5), %v724_v25, %v719_v21 }
  0x75   : > { %666 = vmatpush1.bf16.msra.mxu0 %v1080_v46 }
  0x76   : > { %667 = vmatprep.subr.bf16.mxu0 %v1081_v47 }
  0x79   : > { %668 = vmatpush1.bf16.msra.mxu0 %v1083_v49 }
  0x7a   : > { %669 = vmatprep.subr.bf16.mxu0 %v1084_v50 }
  0x7d   : > { %670 = vmatpush1.bf16.msra.mxu0 %v1086_v51 }
  0x7e   : > { %671 = vmatprep.subr.bf16.mxu0 %v1087_v52 }
  0x81   : > { %672 = vmatpush1.bf16.msra.mxu0 %v1089_v53 }
  0x82   : > { %673 = vmatprep.subr.bf16.mxu0 %v1090_v54 }
  0x85   : > { %674 = vmatpush1.bf16.msra.mxu0 %v1092_v55 }
  0x86   : > { %675 = vmatprep.subr.bf16.mxu0 %v1093_v56 }
  0x89   : > { %676 = vmatpush1.bf16.msra.mxu0 %v1095_v57 }
  0x8a   : > { %677 = vmatprep.subr.bf16.mxu0 %v1096_v58 }
  0x8d   : > { %678 = vmatpush1.bf16.msra.mxu0 %v1098_v59 }
  0x8e   : > { %679 = vmatprep.subr.bf16.mxu0 %v1099_v60 }
  0x91   : > { %680 = vmatpush1.bf16.msra.mxu0 %v1101_v61 }
  0x92   : > { %681 = vmatprep.subr.bf16.mxu0 %v1102_v62 }
  0x95   : > { %682 = vmatpush1.bf16.msra.mxu0 %v1104_v63 }
  0x96   : > { %683 = vmatprep.subr.bf16.mxu0 %v1105_v0 }
  0x99   : > { %684 = vmatpush1.bf16.msra.mxu0 %v1107_v1 }
  0x9a   : > { %685 = vmatprep.subr.bf16.mxu0 %v1108_v2 }
  0x9d   : > { %686 = vmatpush1.bf16.msra.mxu0 %v1110_v3 }
  0xa0   : > { %688 = vmatmul.mubr.bf16.vlgmr.msra.gmra.mrb[0].mxu0 %v1111_v4 }
 0x173   : > { %v689_v7 = vpop.f32.mrb[0].mxu0  ;;  %709 = sbr.rel (%p961_p5) target bundleno = 390 (0x186), region = 116 }
 0x174   : > { %v698_v9 = vadd.f32 %v689_v7, %v447_v5  ;;  %v691_v10 = vpop.f32.mrb[1].mxu0 }
 0x175   : > { %v699_v12 = vadd.f32 %v691_v10, %v448_v6  ;;  %v693_v13 = vpop.f32.mrb[2].mxu0 }
 0x176   : > { %702 = vst [vmem:[#allocation2] sm:$0xff] %v698_v9  ;;  %v700_v14 = vadd.f32 %v693_v13, %v449_v8  ;;  %v695_v15 = vpop.f32.mrb[3].mxu0 }
 0x177   : > { %703 = vst [vmem:[#allocation2 + $0x8] sm:$0xff] %v699_v12  ;;  %v701_v16 = vadd.f32 %v695_v15, %v450_v11 }
 0x178   : > { %704 = vst [vmem:[#allocation2 + $0x10] sm:$0xff] %v700_v14 }
 0x179   : > { %705 = vst [vmem:[#allocation2 + $0x18] sm:$0xff] %v701_v16 }
 0x17d   : > { %v710_v23 = vld [vmem:[#allocation2] sm:$0xff] }
 0x17e   : > { %v711_v26 = vld [vmem:[#allocation2 + $0x8] sm:$0xff]  ;;  %v735_v31 = vadd.f32 %v730_v29, %v710_v23 }
 0x17f   : > { %v712_v27 = vld [vmem:[#allocation2 + $0x10] sm:$0xff]  ;;  %v736_v32 = vadd.f32 %v734_v30, %v711_v26 }
 0x180   : > { %v713_v28 = vld [vmem:[#allocation2 + $0x18] sm:$0xff]  ;;  %v737_v33 = vadd.f32 %v730_v29, %v712_v27 }
 0x181   : > { %v738_v34 = vadd.f32 %v734_v30, %v713_v28  ;;  %v971_v35 = vpack.c.bf16 %v736_v32, %v735_v31 }
 0x183   : > { %v972_v36 = vpack.c.bf16 %v738_v34, %v737_v33  ;;  %751 = vst [vmem:[%s1422_s16] sm:$0xff] %v971_v35 }
 0x185   : > { %752 = vst [vmem:[%s1422_s16 + $0x8] sm:$0xff] %v972_v36 }
 0x186 PF: > { %759 = sbr.rel (!%p1317_p12) target bundleno = 398 (0x18e), region = 120  ;;  %s973_s18 = sshll.u32 (%p1317_p12), %s1188_s19, 3 }
 0x187   : > { %s765_s25 = scalar_lea.vmem (%p1317_p12), %s1513_s3, %s973_s18 }
 0x18a   : > { %v795_v37 = vld [vmem:[%s1422_s16] sm:$0xff] (%p1317_p12) }
 0x18b   : > { %796 = vst [vmem:[%s765_s25] sm:$0xff] (%p1317_p12), %v795_v37 }
 0x18c   : > { %v797_v38 = vld [vmem:[%s1422_s16 + $0x8] sm:$0xff] (%p1317_p12) }
 0x18d   : > { %798 = vst [vmem:[%s765_s25 + $0x20] sm:$0xff] %v797_v38 }
 0x18e PF: > { %s13_s22 = sadd.s32 1, %s1200_s22   ;;  %s1522_s10 = sld [smem:[#allocation8_spill]] }
 0x18f   : > { %p10_p6 = scmp.ge.s32.totalorder %s13_s22, 18   ;;  %s1523_s30 = sld [smem:[#allocation6_spill]] }
 0x190   : > { %s1524_s27 = sld [smem:[#allocation7_spill]]  ;;  %s1525_s12 = smov %s1164_s13 }
 0x191   : > { %s1526_s13 = smov %s1315_s9  ;;  %s1527_s14 = smov %s1172_s15 }
 0x192   : > { %s1528_s15 = smov %s1312_s8  ;;  %s1529_s16 = smov %s1180_s17 }
 0x193   : > { %s1531_s18 = smov %s1192_s20  ;;  %s1532_s19 = smov %s1196_s21 }
 0x194   : > { %s1530_s17 = smov %s1522_s10  ;;  %12 = sbr.rel (!%p10_p6) target bundleno = 6 (0x6), region = 200 }
 0x195   : > { %s1533_s20 = smov %s1523_s30 }
 0x196   : > { %s1534_s21 = smov %s1524_s27 }

// kernel: no_leaf_forward.14
= control target key start
LH: loop header
LB: loop body
LE: loop exit
PB: predicated region body
PF: predicated region fallthrough
CT: control target
= control target key end

     0   :  { %s1223_s12 = smov 0   ;;  %s1225_s13 = smov 0   ;;  %s1510_s0 = inlined_call_operand.vmem [shape: bf16[16,2048], index: 0, kind: input, shape index: {}]   ;;  %s1511_s1 = inlined_call_operand.vmem [shape: bf16[2048,1024], index: 1, kind: input, shape index: {}]   ;;  %s1512_s2 = inlined_call_operand.vmem [shape: bf16[1,1024], index: 2, kind: input, shape index: {}]   ;;  %s1513_s3 = inlined_call_operand.vmem [shape: bf16[16,1024], index: 3, kind: output, shape index: {}]  }
   0x1   :  { %s1227_s14 = smov 0   ;;  %s1229_s15 = smov 0  }
   0x2   :  { %s1231_s16 = smov 0   ;;  %s1233_s17 = smov 0  }
   0x3   :  { %s1235_s18 = smov 0   ;;  %s1237_s19 = smov 0  }
   0x4   :  { %s1239_s20 = smov 0   ;;  %s1241_s21 = smov 0  }
   0x5   :  { %s1243_s22 = smov 0  }
   0x6 LB: > { %s909_s23 = sadd.s32 4294967295, %s1200_s22   ;;  %s25_s24 = sadd.s32 1, %s1192_s20  ;;  %s1200_s22 = sphi %s1243_s22, %s13_s22   ;;  %s1196_s21 = sphi %s1241_s21, %s1534_s21   ;;  %s1192_s20 = sphi %s1239_s20, %s1533_s20   ;;  %s1188_s19 = sphi %s1237_s19, %s1532_s19   ;;  %s1184_s18 = sphi %s1235_s18, %s1531_s18   ;;  %s1180_s17 = sphi %s1233_s17, %s1530_s17   ;;  %s1176_s16 = sphi %s1231_s16, %s1529_s16   ;;  %s1172_s15 = sphi %s1229_s15, %s1528_s15   ;;  %s1168_s14 = sphi %s1227_s14, %s1527_s14   ;;  %s1164_s13 = sphi %s1225_s13, %s1526_s13   ;;  %s1160_s12 = sphi %s1223_s12, %s1525_s12  }
   0x7   : > { %p26_p0 = scmp.ge.s32.totalorder %s25_s24, 8  ;;  %s28_s25 = sadd.s32 1, %s1196_s21 }
   0x8   : > { %s41_s26 = sadd.s32 1, %s1180_s17  ;;  %p48_p1 = scmp.ne.s32.totalorder %s1180_s17, %s1176_s16 }
   0x9   : > { %s1536_s24 = smov (%p26_p0, %s25_s24), 0  ;;  %s1538_s25 = smov (!%p26_p0, %s28_s25), %s1196_s21 }
   0xa   : > { %1516 = sst [smem:[#allocation6_spill]] %s1536_s24  ;;  %s37_s27 = ssub.s32 %s1192_s20, %s1536_s24 }
   0xb   : > { %p49_p2 = scmp.eq.s32.totalorder %s1200_s22, 0  ;;  %p30_p3 = scmp.ge.s32.totalorder %s1538_s25, 4 }
   0xc   : > { %p39_p4 = scmp.eq.s32.totalorder %s37_s27, 0  ;;  %s69_s29 = sadd.s32 1, %s1172_s15 }
   0xd   : > { %p1290_p5 = por %p49_p2, %p48_p1  ;;  %s1540_s25 = smov (%p30_p3, %s1538_s25), 0 }
   0xe   : > { %1518 = sst [smem:[#allocation7_spill]] %s1540_s25  ;;  %s65_s4 = ssub.s32 %s1196_s21, %s1540_s25 }
   0xf   : > { %s1298_s30 = scalar_select %p39_p4, %s1180_s17, %s41_s26  }
  0x10   : > { %p76_p6 = scmp.ne.s32.totalorder %s1172_s15, %s1168_s14  ;;  %s66_s5 = sor.u32 %s65_s4, %s37_s27 }
  0x11   : > { %1519 = sst [smem:[#allocation8_spill]] %s1298_s30  ;;  %p121_p7 = scmp.eq.s32.totalorder %s65_s4, 0 }
  0x12   : > { %p67_p8 = scmp.eq.s32.totalorder %s66_s5, 0  ;;  %p1304_p9 = por %p76_p6, %p49_p2 }
  0x13   : > { %s123_s7 = sadd.s32 1, %s1164_s13  ;;  %p133_p10 = scmp.ne.s32.totalorder %s1164_s13, %s1160_s12 }
  0x14   : > { %s1312_s8 = scalar_select %p67_p8, %s1172_s15, %s69_s29  }
  0x15   : > { %s1315_s9 = scalar_select %p121_p7, %s1164_s13, %s123_s7  }
  0x16   : > { %p134_p11 = scmp.eq.s32.totalorder %s909_s23, 31  ;;  %p912_p13 = scmp.ge.s32.totalorder %s1200_s22, 32 }
  0x18   : > { %p1317_p12 = por %p134_p11, %p133_p10  ;;  %156 = sbr.rel (%p912_p13) target bundleno = 77 (0x4d), region = 16 }
  0x1f   : > { %159 = sbr.rel (!%p1290_p5) target bundleno = 38 (0x26), region = 20  ;;  %s161_s11 = sand.u32 (%p1290_p5), 1, %s1180_s17  }
  0x20   : > { %s969_s26 = sshll.u32 (%p1290_p5), %s1192_s20, 3  ;;  %s913_s27 = sshll.u32 (%p1290_p5), %s161_s11, 4 }
  0x21   : > { %s169_s5 = scalar_lea.vmem (%p1290_p5), %s1510_s0, %s969_s26  ;;  %s163_s23 = scalar_lea.vmem (%p1290_p5), [#allocation3], %s913_s27 }
  0x22   : > { %v199_v0 = vld [vmem:[%s169_s5] sm:$0xff] (%p1290_p5) }
  0x23   : > { %v201_v1 = vld [vmem:[%s169_s5 + $0x40] sm:$0xff] (%p1290_p5)  ;;  %200 = vst [vmem:[%s163_s23] sm:$0xff] (%p1290_p5), %v199_v0 }
  0x24   : > { %202 = vst [vmem:[%s163_s23 + $0x8] sm:$0xff] (%p1290_p5), %v201_v1 }
  0x26 PF: > { %208 = sbr.rel (!%p1304_p9) target bundleno = 77 (0x4d), region = 58  ;;  %s210_s28 = sand.u32 (%p1304_p9), 1, %s1172_s15  }
  0x27   : > { %s918_s7 = sshll.u32 (%p1304_p9), %s1196_s21, 1  ;;  %s916_s25 = sshll.u32 (%p1304_p9), %s210_s28, 8 }
  0x28   : > { %s970_s11 = sshll.u32 (%p1304_p9), %s1192_s20, 8  ;;  %s1342_s6 = scalar_lea.vmem (%p1304_p9), [#allocation4], %s916_s25 }
  0x29   : > { %s216_s24 = sadd.s32 (%p1304_p9), %s970_s11, %s918_s7 }
  0x2a   : > { %s920_s30 = sshll.u32 (%p1304_p9), %s216_s24, 2 }
  0x2b   : > { %s1337_s4 = scalar_lea.vmem (%p1304_p9), %s1511_s1, %s920_s30 }
  0x2c   : > { %v308_v2 = vld [vmem:[%s1337_s4] sm:$0xff] (%p1304_p9) }
  0x2d   : > { %v310_v3 = vld [vmem:[%s1337_s4 + $0x20] sm:$0xff]  ;;  %309 = vst [vmem:[%s1342_s6] sm:$0xff] %v308_v2 }
  0x2e   : > { %v312_v4 = vld [vmem:[%s1337_s4 + $0x40] sm:$0xff]  ;;  %311 = vst [vmem:[%s1342_s6 + $0x8] sm:$0xff] %v310_v3 }
  0x2f   : > { %313 = vst [vmem:[%s1342_s6 + $0x10] sm:$0xff] %v312_v4  ;;  %v314_v5 = vld [vmem:[%s1337_s4 + $0x60] sm:$0xff] }
  0x30   : > { %v316_v6 = vld [vmem:[%s1337_s4 + $0x80] sm:$0xff]  ;;  %315 = vst [vmem:[%s1342_s6 + $0x18] sm:$0xff] %v314_v5 }
  0x31   : > { %v318_v7 = vld [vmem:[%s1337_s4 + $0xa0] sm:$0xff]  ;;  %317 = vst [vmem:[%s1342_s6 + $0x20] sm:$0xff] %v316_v6 }
  0x32   : > { %319 = vst [vmem:[%s1342_s6 + $0x28] sm:$0xff] %v318_v7  ;;  %v320_v8 = vld [vmem:[%s1337_s4 + $0xc0] sm:$0xff] }
  0x33   : > { %v322_v9 = vld [vmem:[%s1337_s4 + $0xe0] sm:$0xff]  ;;  %321 = vst [vmem:[%s1342_s6 + $0x30] sm:$0xff] %v320_v8 }
  0x34   : > { %v324_v10 = vld [vmem:[%s1337_s4 + $0x100] sm:$0xff]  ;;  %323 = vst [vmem:[%s1342_s6 + $0x38] sm:$0xff] %v322_v9 }
  0x35   : > { %325 = vst [vmem:[%s1342_s6 + $0x40] sm:$0xff] %v324_v10  ;;  %v326_v11 = vld [vmem:[%s1337_s4 + $0x120] sm:$0xff] }
  0x36   : > { %v328_v12 = vld [vmem:[%s1337_s4 + $0x140] sm:$0xff]  ;;  %327 = vst [vmem:[%s1342_s6 + $0x48] sm:$0xff] %v326_v11 }
  0x37   : > { %v330_v13 = vld [vmem:[%s1337_s4 + $0x160] sm:$0xff]  ;;  %329 = vst [vmem:[%s1342_s6 + $0x50] sm:$0xff] %v328_v12 }
  0x38   : > { %331 = vst [vmem:[%s1342_s6 + $0x58] sm:$0xff] %v330_v13  ;;  %v332_v14 = vld [vmem:[%s1337_s4 + $0x180] sm:$0xff] }
  0x39   : > { %v334_v15 = vld [vmem:[%s1337_s4 + $0x1a0] sm:$0xff]  ;;  %333 = vst [vmem:[%s1342_s6 + $0x60] sm:$0xff] %v332_v14 }
  0x3a   : > { %v336_v16 = vld [vmem:[%s1337_s4 + $0x1c0] sm:$0xff]  ;;  %335 = vst [vmem:[%s1342_s6 + $0x68] sm:$0xff] %v334_v15 }
  0x3b   : > { %337 = vst [vmem:[%s1342_s6 + $0x70] sm:$0xff] %v336_v16  ;;  %v338_v17 = vld [vmem:[%s1337_s4 + $0x1e0] sm:$0xff] }
  0x3c   : > { %v340_v18 = vld [vmem:[%s1337_s4 + $0x200] sm:$0xff]  ;;  %339 = vst [vmem:[%s1342_s6 + $0x78] sm:$0xff] %v338_v17 }
  0x3d   : > { %v342_v19 = vld [vmem:[%s1337_s4 + $0x220] sm:$0xff]  ;;  %341 = vst [vmem:[%s1342_s6 + $0x80] sm:$0xff] %v340_v18 }
  0x3e   : > { %343 = vst [vmem:[%s1342_s6 + $0x88] sm:$0xff] %v342_v19  ;;  %v344_v20 = vld [vmem:[%s1337_s4 + $0x240] sm:$0xff] }
  0x3f   : > { %v346_v21 = vld [vmem:[%s1337_s4 + $0x260] sm:$0xff]  ;;  %345 = vst [vmem:[%s1342_s6 + $0x90] sm:$0xff] %v344_v20 }
  0x40   : > { %v348_v22 = vld [vmem:[%s1337_s4 + $0x280] sm:$0xff]  ;;  %347 = vst [vmem:[%s1342_s6 + $0x98] sm:$0xff] %v346_v21 }
  0x41   : > { %349 = vst [vmem:[%s1342_s6 + $0xa0] sm:$0xff] %v348_v22  ;;  %v350_v23 = vld [vmem:[%s1337_s4 + $0x2a0] sm:$0xff] }
  0x42   : > { %v352_v24 = vld [vmem:[%s1337_s4 + $0x2c0] sm:$0xff]  ;;  %351 = vst [vmem:[%s1342_s6 + $0xa8] sm:$0xff] %v350_v23 }
  0x43   : > { %v354_v25 = vld [vmem:[%s1337_s4 + $0x2e0] sm:$0xff]  ;;  %353 = vst [vmem:[%s1342_s6 + $0xb0] sm:$0xff] %v352_v24 }
  0x44   : > { %355 = vst [vmem:[%s1342_s6 + $0xb8] sm:$0xff] %v354_v25  ;;  %v356_v26 = vld [vmem:[%s1337_s4 + $0x300] sm:$0xff] }
  0x45   : > { %v358_v27 = vld [vmem:[%s1337_s4 + $0x320] sm:$0xff]  ;;  %357 = vst [vmem:[%s1342_s6 + $0xc0] sm:$0xff] %v356_v26 }
  0x46   : > { %v360_v28 = vld [vmem:[%s1337_s4 + $0x340] sm:$0xff]  ;;  %359 = vst [vmem:[%s1342_s6 + $0xc8] sm:$0xff] %v358_v27 }
  0x47   : > { %361 = vst [vmem:[%s1342_s6 + $0xd0] sm:$0xff] %v360_v28  ;;  %v362_v29 = vld [vmem:[%s1337_s4 + $0x360] sm:$0xff] }
  0x48   : > { %v364_v30 = vld [vmem:[%s1337_s4 + $0x380] sm:$0xff]  ;;  %363 = vst [vmem:[%s1342_s6 + $0xd8] sm:$0xff] %v362_v29 }
  0x49   : > { %v366_v31 = vld [vmem:[%s1337_s4 + $0x3a0] sm:$0xff]  ;;  %365 = vst [vmem:[%s1342_s6 + $0xe0] sm:$0xff] %v364_v30 }
  0x4a   : > { %367 = vst [vmem:[%s1342_s6 + $0xe8] sm:$0xff] %v366_v31  ;;  %v368_v32 = vld [vmem:[%s1337_s4 + $0x3c0] sm:$0xff] }
  0x4b   : > { %v370_v33 = vld [vmem:[%s1337_s4 + $0x3e0] sm:$0xff]  ;;  %369 = vst [vmem:[%s1342_s6 + $0xf0] sm:$0xff] %v368_v32 }
  0x4c   : > { %371 = vst [vmem:[%s1342_s6 + $0xf8] sm:$0xff] %v370_v33 }
  0x4d PF: > { %p921_p0 = scmp.ge.s32.totalorder %s1200_s22, 1  ;;  %p384_p1 = scmp.lt.s32.totalorder %s1200_s22, 33 }
  0x4f   : > { %p385_p2 = pnand %p921_p0, %p384_p1 }
  0x50   : > { %s391_s24 = sand.u32 (!%p385_p2), 1, %s1176_s16   ;;  %s398_s25 = sand.u32 (!%p385_p2), 1, %s1168_s14  }
  0x51   : > { %388 = sbr.rel (%p385_p2) target bundleno = 398 (0x18e), region = 100  ;;  %s1409_s30 = sshll.u32 (!%p385_p2), %s391_s24, 4 }
  0x52   : > { %s923_s27 = sshll.u32 (!%p385_p2), %s398_s25, 8  ;;  %s425_s5 = sand.u32 (!%p385_p2), 1, %s1160_s12  }
  0x53   : > { %s925_s23 = sshll.u32 (!%p385_p2), %s1188_s19, 1  ;;  %s924_s28 = sshll.u32 (!%p385_p2), %s425_s5, 4 }
  0x54   : > { %p433_p3 = scmp.lt.s32.totalorder (!%p385_p2), %s925_s23, 7  ;;  %s393_s26 = scalar_lea.vmem (!%p385_p2), [#allocation3], %s1409_s30 }
  0x55   : > { %s1420_s4 = scalar_lea.vmem (!%p385_p2), [#allocation4], %s923_s27  ;;  %s1422_s16 = scalar_lea.vmem (!%p385_p2), [#allocation5], %s924_s28 }
  0x56   : > { %p926_p4 = scmp.ne.s32.totalorder (!%p385_p2), %s1184_s18, 0 }
  0x58   : > { %s1542_s23 = smov (!%p433_p3, %s925_s23), 7  ;;  %442 = sbr.rel (%p926_p4) target bundleno = 95 (0x5f), region = 112 }
  0x59   : > { %s435_s29 = scalar_lea.vmem %s1512_s2, %s1542_s23  ;;  %v1202_v34 = vmov (!%p926_p4), 0.0  }
  0x5a   : > { %443 = vst [vmem:[#allocation2] sm:$0xff] (!%p926_p4), %v1202_v34  ;;  %444 = vst [vmem:[#allocation2 + $0x8] sm:$0xff] (!%p926_p4), %v1202_v34 }
  0x5b   : > { %445 = vst [vmem:[#allocation2 + $0x10] sm:$0xff] (!%p926_p4), %v1202_v34  ;;  %446 = vst [vmem:[#allocation2 + $0x18] sm:$0xff] (!%p926_p4), %v1202_v34 }
  0x5f PF: > { %v1063_v35 = vld [vmem:[%s1420_s4 + $0x4] ss:$8 sps:$4 sm:$0xff]   ;;  %v1065_v36 = vld [vmem:[%s1420_s4] ss:$8 sps:$4 sm:$0xff]   ;;  %v1066_v37 = vld [vmem:[%s1420_s4 + $0x14] ss:$8 sps:$4 sm:$0xff]  }
  0x60   : > { %655 = vmatprep.subr.bf16.mxu0 %v1063_v35  ;;  %v1068_v38 = vld [vmem:[%s1420_s4 + $0x10] ss:$8 sps:$4 sm:$0xff]   ;;  %v1069_v39 = vld [vmem:[%s1420_s4 + $0x24] ss:$8 sps:$4 sm:$0xff]   ;;  %v1071_v40 = vld [vmem:[%s1420_s4 + $0x20] ss:$8 sps:$4 sm:$0xff]  }
  0x61   : > { %656 = vmatpush1.bf16.msra.mxu0 %v1065_v36  ;;  %v1072_v41 = vld [vmem:[%s1420_s4 + $0x34] ss:$8 sps:$4 sm:$0xff]   ;;  %v1074_v42 = vld [vmem:[%s1420_s4 + $0x30] ss:$8 sps:$4 sm:$0xff]   ;;  %v1075_v43 = vld [vmem:[%s1420_s4 + $0x44] ss:$8 sps:$4 sm:$0xff]  }
  0x62   : > { %657 = vmatprep.subr.bf16.mxu0 %v1066_v37  ;;  %v1077_v44 = vld [vmem:[%s1420_s4 + $0x40] ss:$8 sps:$4 sm:$0xff]   ;;  %v1078_v45 = vld [vmem:[%s1420_s4 + $0x54] ss:$8 sps:$4 sm:$0xff]   ;;  %v1080_v46 = vld [vmem:[%s1420_s4 + $0x50] ss:$8 sps:$4 sm:$0xff]  }
  0x63   : > { %v1081_v47 = vld [vmem:[%s1420_s4 + $0x64] ss:$8 sps:$4 sm:$0xff]   ;;  %v1083_v49 = vld [vmem:[%s1420_s4 + $0x60] ss:$8 sps:$4 sm:$0xff]   ;;  %v1084_v50 = vld [vmem:[%s1420_s4 + $0x74] ss:$8 sps:$4 sm:$0xff]  }
  0x64   : > { %v1113_v48 = vld [vmem:[%s393_s26 + $0x4] ss:$8 sps:$4 sm:$0xff]   ;;  %v1086_v51 = vld [vmem:[%s1420_s4 + $0x70] ss:$8 sps:$4 sm:$0xff]   ;;  %v1089_v53 = vld [vmem:[%s1420_s4 + $0x80] ss:$8 sps:$4 sm:$0xff]  }
  0x65   : > { %658 = vmatpush1.bf16.msra.mxu0 %v1068_v38  ;;  %687 = vmatprep.mubr.bf16.mxu0 %v1113_v48  ;;  %v1087_v52 = vld [vmem:[%s1420_s4 + $0x84] ss:$8 sps:$4 sm:$0xff]   ;;  %v1090_v54 = vld [vmem:[%s1420_s4 + $0x94] ss:$8 sps:$4 sm:$0xff]   ;;  %v1092_v55 = vld [vmem:[%s1420_s4 + $0x90] ss:$8 sps:$4 sm:$0xff]  }
  0x66   : > { %659 = vmatprep.subr.bf16.mxu0 %v1069_v39  ;;  %v1093_v56 = vld [vmem:[%s1420_s4 + $0xa4] ss:$8 sps:$4 sm:$0xff]   ;;  %v1095_v57 = vld [vmem:[%s1420_s4 + $0xa0] ss:$8 sps:$4 sm:$0xff]   ;;  %v1096_v58 = vld [vmem:[%s1420_s4 + $0xb4] ss:$8 sps:$4 sm:$0xff]  }
  0x67   : > { %v1098_v59 = vld [vmem:[%s1420_s4 + $0xb0] ss:$8 sps:$4 sm:$0xff]   ;;  %v1099_v60 = vld [vmem:[%s1420_s4 + $0xc4] ss:$8 sps:$4 sm:$0xff]   ;;  %v1101_v61 = vld [vmem:[%s1420_s4 + $0xc0] ss:$8 sps:$4 sm:$0xff]  }
  0x68   : > { %v1102_v62 = vld [vmem:[%s1420_s4 + $0xd4] ss:$8 sps:$4 sm:$0xff]   ;;  %v1104_v63 = vld [vmem:[%s1420_s4 + $0xd0] ss:$8 sps:$4 sm:$0xff]   ;;  %v1105_v0 = vld [vmem:[%s1420_s4 + $0xe4] ss:$8 sps:$4 sm:$0xff]  }
  0x69   : > { %660 = vmatpush1.bf16.msra.mxu0 %v1071_v40  ;;  %v1107_v1 = vld [vmem:[%s1420_s4 + $0xe0] ss:$8 sps:$4 sm:$0xff]   ;;  %v1108_v2 = vld [vmem:[%s1420_s4 + $0xf4] ss:$8 sps:$4 sm:$0xff]   ;;  %v1110_v3 = vld [vmem:[%s1420_s4 + $0xf0] ss:$8 sps:$4 sm:$0xff]  }
  0x6a   : > { %661 = vmatprep.subr.bf16.mxu0 %v1072_v41  ;;  %v1111_v4 = vld [vmem:[%s393_s26] ss:$8 sps:$4 sm:$0xff]   ;;  %p961_p5 = scmp.ne.s32.totalorder %s1184_s18, 7 }
  0x6b   : > { %v447_v5 = vld [vmem:[#allocation2] sm:$0xff]  ;;  %v448_v6 = vld [vmem:[#allocation2 + $0x8] sm:$0xff]  ;;  %v449_v8 = vld [vmem:[#allocation2 + $0x10] sm:$0xff]  ;;  %v717_v18 = vlaneseq (!%p961_p5) }
  0x6c   : > { %v450_v11 = vld [vmem:[#allocation2 + $0x18] sm:$0xff]  ;;  %v714_v17 = vld [vmem:[%s435_s29] sm:$0x3] (!%p961_p5) }
  0x6d   : > { %662 = vmatpush1.bf16.msra.mxu0 %v1074_v42  ;;  %v715_v19 = vunpack.c.l.bf16 (!%p961_p5), %v714_v17  ;;  %v718_v20 = vshrl.u32 (!%p961_p5), %v717_v18, 7 }
  0x6e   : > { %663 = vmatprep.subr.bf16.mxu0 %v1075_v43 }
  0x6f   : > { %v719_v21 = vsub.s32 (!%p961_p5), 0, %v718_v20  ;;  %v723_v22 = vsub.s32 (!%p961_p5), 2, %v718_v20 }
  0x71   : > { %664 = vmatpush1.bf16.msra.mxu0 %v1077_v44  ;;  %v720_v24 = vrot.slane (!%p961_p5), %v715_v19, %v719_v21  ;;  %v724_v25 = vrot.slane (!%p961_p5), %v715_v19, %v723_v22 }
  0x72   : > { %665 = vmatprep.subr.bf16.mxu0 %v1078_v45 }
  0x73   : > { %v730_v29 = vrot.slane (!%p961_p5), %v720_v24, %v719_v21  ;;  %v734_v30 = vrot.slane (!%p961_p5), %v724_v25, %v719_v21 }
  0x75   : > { %666 = vmatpush1.bf16.msra.mxu0 %v1080_v46 }
  0x76   : > { %667 = vmatprep.subr.bf16.mxu0 %v1081_v47 }
  0x79   : > { %668 = vmatpush1.bf16.msra.mxu0 %v1083_v49 }
  0x7a   : > { %669 = vmatprep.subr.bf16.mxu0 %v1084_v50 }
  0x7d   : > { %670 = vmatpush1.bf16.msra.mxu0 %v1086_v51 }
  0x7e   : > { %671 = vmatprep.subr.bf16.mxu0 %v1087_v52 }
  0x81   : > { %672 = vmatpush1.bf16.msra.mxu0 %v1089_v53 }
  0x82   : > { %673 = vmatprep.subr.bf16.mxu0 %v1090_v54 }
  0x85   : > { %674 = vmatpush1.bf16.msra.mxu0 %v1092_v55 }
  0x86   : > { %675 = vmatprep.subr.bf16.mxu0 %v1093_v56 }
  0x89   : > { %676 = vmatpush1.bf16.msra.mxu0 %v1095_v57 }
  0x8a   : > { %677 = vmatprep.subr.bf16.mxu0 %v1096_v58 }
  0x8d   : > { %678 = vmatpush1.bf16.msra.mxu0 %v1098_v59 }
  0x8e   : > { %679 = vmatprep.subr.bf16.mxu0 %v1099_v60 }
  0x91   : > { %680 = vmatpush1.bf16.msra.mxu0 %v1101_v61 }
  0x92   : > { %681 = vmatprep.subr.bf16.mxu0 %v1102_v62 }
  0x95   : > { %682 = vmatpush1.bf16.msra.mxu0 %v1104_v63 }
  0x96   : > { %683 = vmatprep.subr.bf16.mxu0 %v1105_v0 }
  0x99   : > { %684 = vmatpush1.bf16.msra.mxu0 %v1107_v1 }
  0x9a   : > { %685 = vmatprep.subr.bf16.mxu0 %v1108_v2 }
  0x9d   : > { %686 = vmatpush1.bf16.msra.mxu0 %v1110_v3 }
  0xa0   : > { %688 = vmatmul.mubr.bf16.vlgmr.msra.gmra.mrb[0].mxu0 %v1111_v4 }
 0x173   : > { %v689_v7 = vpop.f32.mrb[0].mxu0  ;;  %709 = sbr.rel (%p961_p5) target bundleno = 390 (0x186), region = 116 }
 0x174   : > { %v698_v9 = vadd.f32 %v689_v7, %v447_v5  ;;  %v691_v10 = vpop.f32.mrb[1].mxu0 }
 0x175   : > { %v699_v12 = vadd.f32 %v691_v10, %v448_v6  ;;  %v693_v13 = vpop.f32.mrb[2].mxu0 }
 0x176   : > { %702 = vst [vmem:[#allocation2] sm:$0xff] %v698_v9  ;;  %v700_v14 = vadd.f32 %v693_v13, %v449_v8  ;;  %v695_v15 = vpop.f32.mrb[3].mxu0 }
 0x177   : > { %703 = vst [vmem:[#allocation2 + $0x8] sm:$0xff] %v699_v12  ;;  %v701_v16 = vadd.f32 %v695_v15, %v450_v11 }
 0x178   : > { %704 = vst [vmem:[#allocation2 + $0x10] sm:$0xff] %v700_v14 }
 0x179   : > { %705 = vst [vmem:[#allocation2 + $0x18] sm:$0xff] %v701_v16 }
 0x17d   : > { %v710_v23 = vld [vmem:[#allocation2] sm:$0xff] }
 0x17e   : > { %v711_v26 = vld [vmem:[#allocation2 + $0x8] sm:$0xff]  ;;  %v735_v31 = vadd.f32 %v730_v29, %v710_v23 }
 0x17f   : > { %v712_v27 = vld [vmem:[#allocation2 + $0x10] sm:$0xff]  ;;  %v736_v32 = vadd.f32 %v734_v30, %v711_v26 }
 0x180   : > { %v713_v28 = vld [vmem:[#allocation2 + $0x18] sm:$0xff]  ;;  %v737_v33 = vadd.f32 %v730_v29, %v712_v27 }
 0x181   : > { %v738_v34 = vadd.f32 %v734_v30, %v713_v28  ;;  %v971_v35 = vpack.c.bf16 %v736_v32, %v735_v31 }
 0x183   : > { %v972_v36 = vpack.c.bf16 %v738_v34, %v737_v33  ;;  %751 = vst [vmem:[%s1422_s16] sm:$0xff] %v971_v35 }
 0x185   : > { %752 = vst [vmem:[%s1422_s16 + $0x8] sm:$0xff] %v972_v36 }
 0x186 PF: > { %759 = sbr.rel (!%p1317_p12) target bundleno = 398 (0x18e), region = 120  ;;  %s973_s18 = sshll.u32 (%p1317_p12), %s1188_s19, 3 }
 0x187   : > { %s765_s25 = scalar_lea.vmem (%p1317_p12), %s1513_s3, %s973_s18 }
 0x18a   : > { %v795_v37 = vld [vmem:[%s1422_s16] sm:$0xff] (%p1317_p12) }
 0x18b   : > { %796 = vst [vmem:[%s765_s25] sm:$0xff] (%p1317_p12), %v795_v37 }
 0x18c   : > { %v797_v38 = vld [vmem:[%s1422_s16 + $0x8] sm:$0xff] (%p1317_p12) }
 0x18d   : > { %798 = vst [vmem:[%s765_s25 + $0x20] sm:$0xff] %v797_v38 }
 0x18e PF: > { %s13_s22 = sadd.s32 1, %s1200_s22   ;;  %s1522_s10 = sld [smem:[#allocation8_spill]] }
 0x18f   : > { %p10_p6 = scmp.ge.s32.totalorder %s13_s22, 34   ;;  %s1523_s30 = sld [smem:[#allocation6_spill]] }
 0x190   : > { %s1524_s27 = sld [smem:[#allocation7_spill]]  ;;  %s1525_s12 = smov %s1164_s13 }
 0x191   : > { %s1526_s13 = smov %s1315_s9  ;;  %s1527_s14 = smov %s1172_s15 }
 0x192   : > { %s1528_s15 = smov %s1312_s8  ;;  %s1529_s16 = smov %s1180_s17 }
 0x193   : > { %s1531_s18 = smov %s1192_s20  ;;  %s1532_s19 = smov %s1196_s21 }
 0x194   : > { %s1530_s17 = smov %s1522_s10  ;;  %12 = sbr.rel (!%p10_p6) target bundleno = 6 (0x6), region = 200 }
 0x195   : > { %s1533_s20 = smov %s1523_s30 }
 0x196   : > { %s1534_s21 = smov %s1524_s27 }

// kernel: no_leaf_forward.16
= control target key start
LH: loop header
LB: loop body
LE: loop exit
PB: predicated region body
PF: predicated region fallthrough
CT: control target
= control target key end

     0   :  { %s1137_s9 = smov 0   ;;  %s1139_s10 = smov 0   ;;  %s1412_s0 = inlined_call_operand.vmem [shape: bf16[16,1024], index: 0, kind: input, shape index: {}]   ;;  %s1413_s1 = inlined_call_operand.vmem [shape: bf16[1024,1024], index: 1, kind: input, shape index: {}]   ;;  %s1414_s2 = inlined_call_operand.vmem [shape: bf16[16,1024], index: 2, kind: output, shape index: {}]  }
   0x1   :  { %s1141_s11 = smov 0   ;;  %s1143_s12 = smov 0  }
   0x2   :  { %s1145_s13 = smov 0   ;;  %s1147_s14 = smov 0  }
   0x3   :  { %s1149_s15 = smov 0   ;;  %s1151_s16 = smov 0  }
   0x4   :  { %s1153_s17 = smov 0   ;;  %s1155_s18 = smov 0  }
   0x5   :  { %s1157_s19 = smov 0  }
   0x6 LB: > { %s829_s20 = sadd.s32 4294967295, %s1119_s19   ;;  %s24_s21 = sadd.s32 1, %s1111_s17  ;;  %s1119_s19 = sphi %s1157_s19, %s12_s19   ;;  %s1115_s18 = sphi %s1155_s18, %s1433_s18   ;;  %s1111_s17 = sphi %s1153_s17, %s1432_s17   ;;  %s1107_s16 = sphi %s1151_s16, %s1431_s16   ;;  %s1103_s15 = sphi %s1149_s15, %s1430_s15   ;;  %s1099_s14 = sphi %s1147_s14, %s1429_s14   ;;  %s1095_s13 = sphi %s1145_s13, %s1428_s13   ;;  %s1091_s12 = sphi %s1143_s12, %s1427_s12   ;;  %s1087_s11 = sphi %s1141_s11, %s1426_s11   ;;  %s1083_s10 = sphi %s1139_s10, %s1425_s10   ;;  %s1079_s9 = sphi %s1137_s9, %s1424_s9  }
   0x7   : > { %p25_p0 = scmp.ge.s32.totalorder %s24_s21, 4  ;;  %s27_s22 = sadd.s32 1, %s1115_s18 }
   0x8   : > { %s40_s23 = sadd.s32 1, %s1099_s14  ;;  %p47_p1 = scmp.ne.s32.totalorder %s1099_s14, %s1095_s13 }
   0x9   : > { %s1435_s21 = smov (%p25_p0, %s24_s21), 0  ;;  %s1437_s22 = smov (!%p25_p0, %s27_s22), %s1115_s18 }
   0xa   : > { %1417 = sst [smem:[#allocation6_spill]] %s1435_s21  ;;  %s36_s24 = ssub.s32 %s1111_s17, %s1435_s21 }
   0xb   : > { %p48_p2 = scmp.eq.s32.totalorder %s1119_s19, 0  ;;  %p29_p3 = scmp.ge.s32.totalorder %s1437_s22, 4 }
   0xc   : > { %p38_p4 = scmp.eq.s32.totalorder %s36_s24, 0  ;;  %s68_s26 = sadd.s32 1, %s1091_s12 }
   0xd   : > { %p1204_p5 = por %p48_p2, %p47_p1  ;;  %s1439_s22 = smov (%p29_p3, %s1437_s22), 0 }
   0xe   : > { %1419 = sst [smem:[#allocation7_spill]] %s1439_s22  ;;  %s64_s28 = ssub.s32 %s1115_s18, %s1439_s22 }
   0xf   : > { %s1212_s27 = scalar_select %p38_p4, %s1099_s14, %s40_s23  }
  0x10   : > { %p75_p6 = scmp.ne.s32.totalorder %s1091_s12, %s1087_s11  ;;  %s65_s29 = sor.u32 %s64_s28, %s36_s24 }
  0x11   : > { %p94_p7 = scmp.eq.s32.totalorder %s64_s28, 0  ;;  %p66_p8 = scmp.eq.s32.totalorder %s65_s29, 0 }
  0x12   : > { %p1218_p9 = por %p75_p6, %p48_p2  ;;  %s96_s3 = sadd.s32 1, %s1083_s10 }
  0x13   : > { %p106_p10 = scmp.ne.s32.totalorder %s1083_s10, %s1079_s9  ;;  %p107_p11 = scmp.eq.s32.totalorder %s829_s20, 15 }
  0x14   : > { %s1226_s4 = scalar_select %p66_p8, %s1091_s12, %s68_s26  }
  0x15   : > { %s1229_s5 = scalar_select %p94_p7, %s1083_s10, %s96_s3  }
  0x16   : > { %p1231_p12 = por %p107_p11, %p106_p10  ;;  %p832_p13 = scmp.ge.s32.totalorder %s1119_s19, 16 }
  0x18   : > { %129 = sbr.rel (%p832_p13) target bundleno = 77 (0x4d), region = 16 }
  0x1f   : > { %132 = sbr.rel (!%p1204_p5) target bundleno = 38 (0x26), region = 20  ;;  %s134_s7 = sand.u32 (%p1204_p5), 1, %s1099_s14  }
  0x20   : > { %s888_s8 = sshll.u32 (%p1204_p5), %s1111_s17, 3  ;;  %s833_s23 = sshll.u32 (%p1204_p5), %s134_s7, 4 }
  0x21   : > { %s142_s28 = scalar_lea.vmem (%p1204_p5), %s1412_s0, %s888_s8  ;;  %s136_s20 = scalar_lea.vmem (%p1204_p5), [#allocation3], %s833_s23 }
  0x22   : > { %v172_v0 = vld [vmem:[%s142_s28] sm:$0xff] (%p1204_p5) }
  0x23   : > { %v174_v1 = vld [vmem:[%s142_s28 + $0x20] sm:$0xff] (%p1204_p5)  ;;  %173 = vst [vmem:[%s136_s20] sm:$0xff] (%p1204_p5), %v172_v0 }
  0x24   : > { %175 = vst [vmem:[%s136_s20 + $0x8] sm:$0xff] (%p1204_p5), %v174_v1 }
  0x26 PF: > { %181 = sbr.rel (!%p1218_p9) target bundleno = 77 (0x4d), region = 58  ;;  %s183_s25 = sand.u32 (%p1218_p9), 1, %s1091_s12  }
  0x27   : > { %s838_s29 = sshll.u32 (%p1218_p9), %s1115_s18, 1  ;;  %s836_s3 = sshll.u32 (%p1218_p9), %s183_s25, 8 }
  0x28   : > { %s889_s7 = sshll.u32 (%p1218_p9), %s1111_s17, 8  ;;  %s1256_s30 = scalar_lea.vmem (%p1218_p9), [#allocation4], %s836_s3 }
  0x29   : > { %s189_s22 = sadd.s32 (%p1218_p9), %s889_s7, %s838_s29 }
  0x2a   : > { %s840_s21 = sshll.u32 (%p1218_p9), %s189_s22, 2 }
  0x2b   : > { %s1251_s26 = scalar_lea.vmem (%p1218_p9), %s1413_s1, %s840_s21 }
  0x2c   : > { %v281_v2 = vld [vmem:[%s1251_s26] sm:$0xff] (%p1218_p9) }
  0x2d   : > { %v283_v3 = vld [vmem:[%s1251_s26 + $0x20] sm:$0xff]  ;;  %282 = vst [vmem:[%s1256_s30] sm:$0xff] %v281_v2 }
  0x2e   : > { %v285_v4 = vld [vmem:[%s1251_s26 + $0x40] sm:$0xff]  ;;  %284 = vst [vmem:[%s1256_s30 + $0x8] sm:$0xff] %v283_v3 }
  0x2f   : > { %286 = vst [vmem:[%s1256_s30 + $0x10] sm:$0xff] %v285_v4  ;;  %v287_v5 = vld [vmem:[%s1251_s26 + $0x60] sm:$0xff] }
  0x30   : > { %v289_v6 = vld [vmem:[%s1251_s26 + $0x80] sm:$0xff]  ;;  %288 = vst [vmem:[%s1256_s30 + $0x18] sm:$0xff] %v287_v5 }
  0x31   : > { %v291_v7 = vld [vmem:[%s1251_s26 + $0xa0] sm:$0xff]  ;;  %290 = vst [vmem:[%s1256_s30 + $0x20] sm:$0xff] %v289_v6 }
  0x32   : > { %292 = vst [vmem:[%s1256_s30 + $0x28] sm:$0xff] %v291_v7  ;;  %v293_v8 = vld [vmem:[%s1251_s26 + $0xc0] sm:$0xff] }
  0x33   : > { %v295_v9 = vld [vmem:[%s1251_s26 + $0xe0] sm:$0xff]  ;;  %294 = vst [vmem:[%s1256_s30 + $0x30] sm:$0xff] %v293_v8 }
  0x34   : > { %v297_v10 = vld [vmem:[%s1251_s26 + $0x100] sm:$0xff]  ;;  %296 = vst [vmem:[%s1256_s30 + $0x38] sm:$0xff] %v295_v9 }
  0x35   : > { %298 = vst [vmem:[%s1256_s30 + $0x40] sm:$0xff] %v297_v10  ;;  %v299_v11 = vld [vmem:[%s1251_s26 + $0x120] sm:$0xff] }
  0x36   : > { %v301_v12 = vld [vmem:[%s1251_s26 + $0x140] sm:$0xff]  ;;  %300 = vst [vmem:[%s1256_s30 + $0x48] sm:$0xff] %v299_v11 }
  0x37   : > { %v303_v13 = vld [vmem:[%s1251_s26 + $0x160] sm:$0xff]  ;;  %302 = vst [vmem:[%s1256_s30 + $0x50] sm:$0xff] %v301_v12 }
  0x38   : > { %304 = vst [vmem:[%s1256_s30 + $0x58] sm:$0xff] %v303_v13  ;;  %v305_v14 = vld [vmem:[%s1251_s26 + $0x180] sm:$0xff] }
  0x39   : > { %v307_v15 = vld [vmem:[%s1251_s26 + $0x1a0] sm:$0xff]  ;;  %306 = vst [vmem:[%s1256_s30 + $0x60] sm:$0xff] %v305_v14 }
  0x3a   : > { %v309_v16 = vld [vmem:[%s1251_s26 + $0x1c0] sm:$0xff]  ;;  %308 = vst [vmem:[%s1256_s30 + $0x68] sm:$0xff] %v307_v15 }
  0x3b   : > { %310 = vst [vmem:[%s1256_s30 + $0x70] sm:$0xff] %v309_v16  ;;  %v311_v17 = vld [vmem:[%s1251_s26 + $0x1e0] sm:$0xff] }
  0x3c   : > { %v313_v18 = vld [vmem:[%s1251_s26 + $0x200] sm:$0xff]  ;;  %312 = vst [vmem:[%s1256_s30 + $0x78] sm:$0xff] %v311_v17 }
  0x3d   : > { %v315_v19 = vld [vmem:[%s1251_s26 + $0x220] sm:$0xff]  ;;  %314 = vst [vmem:[%s1256_s30 + $0x80] sm:$0xff] %v313_v18 }
  0x3e   : > { %316 = vst [vmem:[%s1256_s30 + $0x88] sm:$0xff] %v315_v19  ;;  %v317_v20 = vld [vmem:[%s1251_s26 + $0x240] sm:$0xff] }
  0x3f   : > { %v319_v21 = vld [vmem:[%s1251_s26 + $0x260] sm:$0xff]  ;;  %318 = vst [vmem:[%s1256_s30 + $0x90] sm:$0xff] %v317_v20 }
  0x40   : > { %v321_v22 = vld [vmem:[%s1251_s26 + $0x280] sm:$0xff]  ;;  %320 = vst [vmem:[%s1256_s30 + $0x98] sm:$0xff] %v319_v21 }
  0x41   : > { %322 = vst [vmem:[%s1256_s30 + $0xa0] sm:$0xff] %v321_v22  ;;  %v323_v23 = vld [vmem:[%s1251_s26 + $0x2a0] sm:$0xff] }
  0x42   : > { %v325_v24 = vld [vmem:[%s1251_s26 + $0x2c0] sm:$0xff]  ;;  %324 = vst [vmem:[%s1256_s30 + $0xa8] sm:$0xff] %v323_v23 }
  0x43   : > { %v327_v25 = vld [vmem:[%s1251_s26 + $0x2e0] sm:$0xff]  ;;  %326 = vst [vmem:[%s1256_s30 + $0xb0] sm:$0xff] %v325_v24 }
  0x44   : > { %328 = vst [vmem:[%s1256_s30 + $0xb8] sm:$0xff] %v327_v25  ;;  %v329_v26 = vld [vmem:[%s1251_s26 + $0x300] sm:$0xff] }
  0x45   : > { %v331_v27 = vld [vmem:[%s1251_s26 + $0x320] sm:$0xff]  ;;  %330 = vst [vmem:[%s1256_s30 + $0xc0] sm:$0xff] %v329_v26 }
  0x46   : > { %v333_v28 = vld [vmem:[%s1251_s26 + $0x340] sm:$0xff]  ;;  %332 = vst [vmem:[%s1256_s30 + $0xc8] sm:$0xff] %v331_v27 }
  0x47   : > { %334 = vst [vmem:[%s1256_s30 + $0xd0] sm:$0xff] %v333_v28  ;;  %v335_v29 = vld [vmem:[%s1251_s26 + $0x360] sm:$0xff] }
  0x48   : > { %v337_v30 = vld [vmem:[%s1251_s26 + $0x380] sm:$0xff]  ;;  %336 = vst [vmem:[%s1256_s30 + $0xd8] sm:$0xff] %v335_v29 }
  0x49   : > { %v339_v31 = vld [vmem:[%s1251_s26 + $0x3a0] sm:$0xff]  ;;  %338 = vst [vmem:[%s1256_s30 + $0xe0] sm:$0xff] %v337_v30 }
  0x4a   : > { %340 = vst [vmem:[%s1256_s30 + $0xe8] sm:$0xff] %v339_v31  ;;  %v341_v32 = vld [vmem:[%s1251_s26 + $0x3c0] sm:$0xff] }
  0x4b   : > { %v343_v33 = vld [vmem:[%s1251_s26 + $0x3e0] sm:$0xff]  ;;  %342 = vst [vmem:[%s1256_s30 + $0xf0] sm:$0xff] %v341_v32 }
  0x4c   : > { %344 = vst [vmem:[%s1256_s30 + $0xf8] sm:$0xff] %v343_v33 }
  0x4d PF: > { %p841_p0 = scmp.ge.s32.totalorder %s1119_s19, 1  ;;  %p349_p1 = scmp.lt.s32.totalorder %s1119_s19, 17 }
  0x4f   : > { %p350_p2 = pnand %p841_p0, %p349_p1 }
  0x50   : > { %s356_s21 = sand.u32 (!%p350_p2), 1, %s1095_s13   ;;  %s363_s22 = sand.u32 (!%p350_p2), 1, %s1087_s11  }
  0x51   : > { %353 = sbr.rel (%p350_p2) target bundleno = 396 (0x18c), region = 96  ;;  %s1323_s23 = sshll.u32 (!%p350_p2), %s356_s21, 4 }
  0x52   : > { %s843_s28 = sshll.u32 (!%p350_p2), %s363_s22, 8  ;;  %s384_s20 = sand.u32 (!%p350_p2), 1, %s1079_s9  }
  0x53   : > { %s844_s25 = sshll.u32 (!%p350_p2), %s384_s20, 4  ;;  %s358_s29 = scalar_lea.vmem (!%p350_p2), [#allocation3], %s1323_s23 }
  0x54   : > { %s1327_s3 = scalar_lea.vmem (!%p350_p2), [#allocation4], %s843_s28  ;;  %s1329_s7 = scalar_lea.vmem (!%p350_p2), [#allocation5], %s844_s25 }
  0x55   : > { %p845_p3 = scmp.ne.s32.totalorder (!%p350_p2), %s1103_s15, 0 }
  0x58   : > { %396 = sbr.rel (%p845_p3) target bundleno = 95 (0x5f), region = 108  ;;  %v1121_v34 = vmov (!%p845_p3), 0.0  }
  0x59   : > { %397 = vst [vmem:[#allocation2] sm:$0xff] (!%p845_p3), %v1121_v34  ;;  %398 = vst [vmem:[#allocation2 + $0x8] sm:$0xff] (!%p845_p3), %v1121_v34 }
  0x5a   : > { %399 = vst [vmem:[#allocation2 + $0x10] sm:$0xff] (!%p845_p3), %v1121_v34  ;;  %400 = vst [vmem:[#allocation2 + $0x18] sm:$0xff] (!%p845_p3), %v1121_v34 }
  0x5f PF: > { %v982_v35 = vld [vmem:[%s1327_s3 + $0x4] ss:$8 sps:$4 sm:$0xff]   ;;  %v984_v36 = vld [vmem:[%s1327_s3] ss:$8 sps:$4 sm:$0xff]   ;;  %v985_v37 = vld [vmem:[%s1327_s3 + $0x14] ss:$8 sps:$4 sm:$0xff]  }
  0x60   : > { %609 = vmatprep.subr.bf16.mxu0 %v982_v35  ;;  %v987_v38 = vld [vmem:[%s1327_s3 + $0x10] ss:$8 sps:$4 sm:$0xff]   ;;  %v988_v39 = vld [vmem:[%s1327_s3 + $0x24] ss:$8 sps:$4 sm:$0xff]   ;;  %v990_v40 = vld [vmem:[%s1327_s3 + $0x20] ss:$8 sps:$4 sm:$0xff]  }
  0x61   : > { %610 = vmatpush1.bf16.msra.mxu0 %v984_v36  ;;  %v991_v41 = vld [vmem:[%s1327_s3 + $0x34] ss:$8 sps:$4 sm:$0xff]   ;;  %v993_v42 = vld [vmem:[%s1327_s3 + $0x30] ss:$8 sps:$4 sm:$0xff]   ;;  %v994_v43 = vld [vmem:[%s1327_s3 + $0x44] ss:$8 sps:$4 sm:$0xff]  }
  0x62   : > { %611 = vmatprep.subr.bf16.mxu0 %v985_v37  ;;  %v996_v44 = vld [vmem:[%s1327_s3 + $0x40] ss:$8 sps:$4 sm:$0xff]   ;;  %v997_v45 = vld [vmem:[%s1327_s3 + $0x54] ss:$8 sps:$4 sm:$0xff]   ;;  %v999_v46 = vld [vmem:[%s1327_s3 + $0x50] ss:$8 sps:$4 sm:$0xff]  }
  0x63   : > { %v1000_v47 = vld [vmem:[%s1327_s3 + $0x64] ss:$8 sps:$4 sm:$0xff]   ;;  %v1002_v49 = vld [vmem:[%s1327_s3 + $0x60] ss:$8 sps:$4 sm:$0xff]   ;;  %v1003_v50 = vld [vmem:[%s1327_s3 + $0x74] ss:$8 sps:$4 sm:$0xff]  }
  0x64   : > { %v1032_v48 = vld [vmem:[%s358_s29 + $0x4] ss:$8 sps:$4 sm:$0xff]   ;;  %v1005_v51 = vld [vmem:[%s1327_s3 + $0x70] ss:$8 sps:$4 sm:$0xff]   ;;  %v1008_v53 = vld [vmem:[%s1327_s3 + $0x80] ss:$8 sps:$4 sm:$0xff]  }
  0x65   : > { %612 = vmatpush1.bf16.msra.mxu0 %v987_v38  ;;  %641 = vmatprep.mubr.bf16.mxu0 %v1032_v48  ;;  %v1006_v52 = vld [vmem:[%s1327_s3 + $0x84] ss:$8 sps:$4 sm:$0xff]   ;;  %v1009_v54 = vld [vmem:[%s1327_s3 + $0x94] ss:$8 sps:$4 sm:$0xff]   ;;  %v1011_v55 = vld [vmem:[%s1327_s3 + $0x90] ss:$8 sps:$4 sm:$0xff]  }
  0x66   : > { %613 = vmatprep.subr.bf16.mxu0 %v988_v39  ;;  %v1012_v56 = vld [vmem:[%s1327_s3 + $0xa4] ss:$8 sps:$4 sm:$0xff]   ;;  %v1014_v57 = vld [vmem:[%s1327_s3 + $0xa0] ss:$8 sps:$4 sm:$0xff]   ;;  %v1015_v58 = vld [vmem:[%s1327_s3 + $0xb4] ss:$8 sps:$4 sm:$0xff]  }
  0x67   : > { %v1017_v59 = vld [vmem:[%s1327_s3 + $0xb0] ss:$8 sps:$4 sm:$0xff]   ;;  %v1018_v60 = vld [vmem:[%s1327_s3 + $0xc4] ss:$8 sps:$4 sm:$0xff]   ;;  %v1020_v61 = vld [vmem:[%s1327_s3 + $0xc0] ss:$8 sps:$4 sm:$0xff]  }
  0x68   : > { %v1021_v62 = vld [vmem:[%s1327_s3 + $0xd4] ss:$8 sps:$4 sm:$0xff]   ;;  %v1023_v63 = vld [vmem:[%s1327_s3 + $0xd0] ss:$8 sps:$4 sm:$0xff]   ;;  %v1024_v0 = vld [vmem:[%s1327_s3 + $0xe4] ss:$8 sps:$4 sm:$0xff]  }
  0x69   : > { %614 = vmatpush1.bf16.msra.mxu0 %v990_v40  ;;  %v1026_v1 = vld [vmem:[%s1327_s3 + $0xe0] ss:$8 sps:$4 sm:$0xff]   ;;  %v1027_v2 = vld [vmem:[%s1327_s3 + $0xf4] ss:$8 sps:$4 sm:$0xff]   ;;  %v1029_v3 = vld [vmem:[%s1327_s3 + $0xf0] ss:$8 sps:$4 sm:$0xff]  }
  0x6a   : > { %615 = vmatprep.subr.bf16.mxu0 %v991_v41  ;;  %v1030_v4 = vld [vmem:[%s358_s29] ss:$8 sps:$4 sm:$0xff]   ;;  %p880_p4 = scmp.ne.s32.totalorder %s1103_s15, 3 }
  0x6b   : > { %v401_v5 = vld [vmem:[#allocation2] sm:$0xff]  ;;  %v402_v6 = vld [vmem:[#allocation2 + $0x8] sm:$0xff]  ;;  %v403_v8 = vld [vmem:[#allocation2 + $0x10] sm:$0xff] }
  0x6c   : > { %v404_v11 = vld [vmem:[#allocation2 + $0x18] sm:$0xff] }
  0x6d   : > { %616 = vmatpush1.bf16.msra.mxu0 %v993_v42 }
  0x6e   : > { %617 = vmatprep.subr.bf16.mxu0 %v994_v43 }
  0x71   : > { %618 = vmatpush1.bf16.msra.mxu0 %v996_v44 }
  0x72   : > { %619 = vmatprep.subr.bf16.mxu0 %v997_v45 }
  0x75   : > { %620 = vmatpush1.bf16.msra.mxu0 %v999_v46 }
  0x76   : > { %621 = vmatprep.subr.bf16.mxu0 %v1000_v47 }
  0x79   : > { %622 = vmatpush1.bf16.msra.mxu0 %v1002_v49 }
  0x7a   : > { %623 = vmatprep.subr.bf16.mxu0 %v1003_v50 }
  0x7d   : > { %624 = vmatpush1.bf16.msra.mxu0 %v1005_v51 }
  0x7e   : > { %625 = vmatprep.subr.bf16.mxu0 %v1006_v52 }
  0x81   : > { %626 = vmatpush1.bf16.msra.mxu0 %v1008_v53 }
  0x82   : > { %627 = vmatprep.subr.bf16.mxu0 %v1009_v54 }
  0x85   : > { %628 = vmatpush1.bf16.msra.mxu0 %v1011_v55 }
  0x86   : > { %629 = vmatprep.subr.bf16.mxu0 %v1012_v56 }
  0x89   : > { %630 = vmatpush1.bf16.msra.mxu0 %v1014_v57 }
  0x8a   : > { %631 = vmatprep.subr.bf16.mxu0 %v1015_v58 }
  0x8d   : > { %632 = vmatpush1.bf16.msra.mxu0 %v1017_v59 }
  0x8e   : > { %633 = vmatprep.subr.bf16.mxu0 %v1018_v60 }
  0x91   : > { %634 = vmatpush1.bf16.msra.mxu0 %v1020_v61 }
  0x92   : > { %635 = vmatprep.subr.bf16.mxu0 %v1021_v62 }
  0x95   : > { %636 = vmatpush1.bf16.msra.mxu0 %v1023_v63 }
  0x96   : > { %637 = vmatprep.subr.bf16.mxu0 %v1024_v0 }
  0x99   : > { %638 = vmatpush1.bf16.msra.mxu0 %v1026_v1 }
  0x9a   : > { %639 = vmatprep.subr.bf16.mxu0 %v1027_v2 }
  0x9d   : > { %640 = vmatpush1.bf16.msra.mxu0 %v1029_v3 }
  0xa0   : > { %642 = vmatmul.mubr.bf16.vlgmr.msra.gmra.mrb[0].mxu0 %v1030_v4 }
 0x173   : > { %v643_v7 = vpop.f32.mrb[0].mxu0  ;;  %663 = sbr.rel (%p880_p4) target bundleno = 388 (0x184), region = 112 }
 0x174   : > { %v652_v9 = vadd.f32 %v643_v7, %v401_v5  ;;  %v645_v10 = vpop.f32.mrb[1].mxu0 }
 0x175   : > { %v653_v12 = vadd.f32 %v645_v10, %v402_v6  ;;  %v647_v13 = vpop.f32.mrb[2].mxu0 }
 0x176   : > { %656 = vst [vmem:[#allocation2] sm:$0xff] %v652_v9  ;;  %v654_v14 = vadd.f32 %v647_v13, %v403_v8  ;;  %v649_v15 = vpop.f32.mrb[3].mxu0 }
 0x177   : > { %657 = vst [vmem:[#allocation2 + $0x8] sm:$0xff] %v653_v12  ;;  %v655_v16 = vadd.f32 %v649_v15, %v404_v11 }
 0x178   : > { %658 = vst [vmem:[#allocation2 + $0x10] sm:$0xff] %v654_v14 }
 0x179   : > { %659 = vst [vmem:[#allocation2 + $0x18] sm:$0xff] %v655_v16 }
 0x17d   : > { %v664_v17 = vld [vmem:[#allocation2] sm:$0xff] }
 0x17e   : > { %v665_v18 = vld [vmem:[#allocation2 + $0x8] sm:$0xff] }
 0x17f   : > { %v666_v19 = vld [vmem:[#allocation2 + $0x10] sm:$0xff]  ;;  %v890_v20 = vpack.c.bf16 %v665_v18, %v664_v17 }
 0x180   : > { %v667_v21 = vld [vmem:[#allocation2 + $0x18] sm:$0xff] }
 0x181   : > { %v891_v22 = vpack.c.bf16 %v667_v21, %v666_v19  ;;  %680 = vst [vmem:[%s1329_s7] sm:$0xff] %v890_v20 }
 0x183   : > { %681 = vst [vmem:[%s1329_s7 + $0x8] sm:$0xff] %v891_v22 }
 0x184 PF: > { %688 = sbr.rel (!%p1231_p12) target bundleno = 396 (0x18c), region = 116  ;;  %s892_s9 = sshll.u32 (%p1231_p12), %s1107_s16, 3 }
 0x185   : > { %s694_s15 = scalar_lea.vmem (%p1231_p12), %s1414_s2, %s892_s9 }
 0x188   : > { %v724_v23 = vld [vmem:[%s1329_s7] sm:$0xff] (%p1231_p12) }
 0x189   : > { %725 = vst [vmem:[%s694_s15] sm:$0xff] (%p1231_p12), %v724_v23 }
 0x18a   : > { %v726_v24 = vld [vmem:[%s1329_s7 + $0x8] sm:$0xff] (%p1231_p12) }
 0x18b   : > { %727 = vst [vmem:[%s694_s15 + $0x20] sm:$0xff] %v726_v24 }
 0x18c PF: > { %s12_s19 = sadd.s32 1, %s1119_s19   ;;  %s1422_s6 = sld [smem:[#allocation6_spill]] }
 0x18d   : > { %p9_p5 = scmp.ge.s32.totalorder %s12_s19, 18   ;;  %s1423_s24 = sld [smem:[#allocation7_spill]] }
 0x18e   : > { %s1424_s9 = smov %s1083_s10  ;;  %s1425_s10 = smov %s1229_s5 }
 0x18f   : > { %s1426_s11 = smov %s1091_s12  ;;  %s1427_s12 = smov %s1226_s4 }
 0x190   : > { %s1428_s13 = smov %s1099_s14  ;;  %s1429_s14 = smov %s1212_s27 }
 0x191   : > { %s1430_s15 = smov %s1111_s17  ;;  %s1431_s16 = smov %s1115_s18 }
 0x192   : > { %s1432_s17 = smov %s1422_s6  ;;  %11 = sbr.rel (!%p9_p5) target bundleno = 6 (0x6), region = 193 }
 0x193   : > { %s1433_s18 = smov %s1423_s24 }

// kernel: no_leaf_forward.17
= control target key start
LH: loop header
LB: loop body
LE: loop exit
PB: predicated region body
PF: predicated region fallthrough
CT: control target
= control target key end

     0   :  { %8 = vsyncpa [#allocation6], 0  ;;  %s1603_s0 = inlined_call_operand.vmem [shape: bf16[16,1024], index: 0, kind: input, shape index: {}]   ;;  %s1604_s1 = inlined_call_operand.vmem [shape: bf16[1024,512], index: 1, kind: input, shape index: {}]   ;;  %s1605_s2 = inlined_call_operand.vmem [shape: bf16[1,512], index: 2, kind: input, shape index: {}]   ;;  %s1606_s3 = inlined_call_operand.hbm [shape: bf16[16,512], index: 3, kind: output, shape index: {}]  }
   0x1   :  { %10 = vsyncpa [#allocation6 + $0x1], 0  ;;  %s1268_s12 = smov 0   ;;  %s1270_s13 = smov 0  }
   0x2   :  { %s1272_s14 = smov 0   ;;  %s1274_s15 = smov 0  }
   0x3   :  { %s1276_s16 = smov 0   ;;  %s1278_s17 = smov 0  }
   0x4   :  { %s1280_s18 = smov 0   ;;  %s1282_s19 = smov 0  }
   0x5   :  { %s1284_s20 = smov 0   ;;  %s1286_s21 = smov 0  }
   0x6   :  { %s1288_s22 = smov 0   ;;  %s1290_s23 = smov 0  }
   0x7 LB: > { %1610 = sst [smem:[#allocation8_spill]] %s1221_s18  ;;  %s892_s24 = sadd.s32 4294967295, %s1241_s23   ;;  %s1241_s23 = sphi %s1290_s23, %s16_s23   ;;  %s1237_s22 = sphi %s1288_s22, %s1632_s22   ;;  %s1233_s21 = sphi %s1286_s21, %s1631_s21   ;;  %s1229_s20 = sphi %s1284_s20, %s1630_s20   ;;  %s1225_s19 = sphi %s1282_s19, %s1629_s19   ;;  %s1221_s18 = sphi %s1280_s18, %s1621_s18   ;;  %s1217_s17 = sphi %s1278_s17, %s1620_s17   ;;  %s1213_s16 = sphi %s1276_s16, %s1628_s16   ;;  %s1209_s15 = sphi %s1274_s15, %s1627_s15   ;;  %s1205_s14 = sphi %s1272_s14, %s1626_s14   ;;  %s1201_s13 = sphi %s1270_s13, %s1625_s13   ;;  %s1197_s12 = sphi %s1268_s12, %s1624_s12  }
   0x8   : > { %s893_s25 = sadd.s32 4294967294, %s1241_s23   ;;  %s28_s26 = sadd.s32 1, %s1233_s21 }
   0x9   : > { %s31_s27 = sadd.s32 1, %s1237_s22  ;;  %p29_p0 = scmp.ge.s32.totalorder %s28_s26, 4 }
   0xa   : > { %s44_s28 = sadd.s32 1, %s1221_s18  ;;  %p51_p1 = scmp.ne.s32.totalorder %s1221_s18, %s1217_s17 }
   0xb   : > { %p52_p2 = scmp.eq.s32.totalorder %s1241_s23, 0  ;;  %s1634_s26 = smov (%p29_p0, %s28_s26), 0 }
   0xc   : > { %1611 = sst [smem:[#allocation9_spill]] %s1634_s26  ;;  %s1636_s27 = smov (!%p29_p0, %s31_s27), %s1237_s22 }
   0xd   : > { %s40_s29 = ssub.s32 %s1233_s21, %s1634_s26  ;;  %p1341_p3 = por %p52_p2, %p51_p1 }
   0xe   : > { %p33_p4 = scmp.ge.s32.totalorder %s1636_s27, 2  ;;  %p42_p5 = scmp.eq.s32.totalorder %s40_s29, 0 }
   0xf   : > { %s72_s4 = sadd.s32 1, %s1213_s16  ;;  %p79_p6 = scmp.ne.s32.totalorder %s1213_s16, %s1209_s15 }
  0x10   : > { %s1638_s27 = smov (%p33_p4, %s1636_s27), 0  ;;  %s126_s9 = sadd.s32 1, %s1205_s14 }
  0x11   : > { %1613 = sst [smem:[#allocation10_spill]] %s1638_s27  ;;  %s68_s6 = ssub.s32 %s1237_s22, %s1638_s27 }
  0x12   : > { %s1351_s5 = scalar_select %p42_p5, %s1221_s18, %s44_s28  }
  0x13   : > { %p1355_p7 = por %p79_p6, %p52_p2  ;;  %s69_s8 = sor.u32 %s68_s6, %s40_s29 }
  0x14   : > { %1614 = sst [smem:[#allocation11_spill]] %s1351_s5  ;;  %p124_p8 = scmp.eq.s32.totalorder %s68_s6, 0 }
  0x15   : > { %p70_p9 = scmp.eq.s32.totalorder %s69_s8, 0  ;;  %p136_p10 = scmp.ne.s32.totalorder %s1205_s14, %s1201_s13 }
  0x16   : > { %s1361_s10 = scalar_select %p124_p8, %s1205_s14, %s126_s9  }
  0x17   : > { %s1364_s11 = scalar_select %p70_p9, %s1213_s16, %s72_s4  }
  0x18   : > { %p137_p11 = scmp.eq.s32.totalorder %s892_s24, 7  ;;  %p142_p12 = scmp.ne.s32.totalorder %s1201_s13, %s1197_s12 }
  0x19   : > { %1616 = sst [smem:[#allocation12_spill]] %s1364_s11  ;;  %p143_p13 = scmp.eq.s32.totalorder %s893_s25, 7 }
  0x1a   : > { %p1370_p0 = por %p137_p11, %p136_p10  ;;  %p895_p2 = scmp.ge.s32.totalorder %s1241_s23, 8 }
  0x1b   : > { %p1374_p1 = por %p143_p13, %p142_p12 }
  0x1c   : > { %159 = sbr.rel (%p895_p2) target bundleno = 65 (0x41), region = 16 }
  0x23   : > { %162 = sbr.rel (!%p1341_p3) target bundleno = 42 (0x2a), region = 20  ;;  %s164_s29 = sand.u32 (%p1341_p3), 1, %s1221_s18  }
  0x24   : > { %s952_s24 = sshll.u32 (%p1341_p3), %s1233_s21, 3  ;;  %s896_s4 = sshll.u32 (%p1341_p3), %s164_s29, 4 }
  0x25   : > { %s172_s8 = scalar_lea.vmem (%p1341_p3), %s1603_s0, %s952_s24  ;;  %s166_s9 = scalar_lea.vmem (%p1341_p3), [#allocation3], %s896_s4 }
  0x26   : > { %v202_v0 = vld [vmem:[%s172_s8] sm:$0xff] (%p1341_p3) }
  0x27   : > { %v204_v1 = vld [vmem:[%s172_s8 + $0x20] sm:$0xff] (%p1341_p3)  ;;  %203 = vst [vmem:[%s166_s9] sm:$0xff] (%p1341_p3), %v202_v0 }
  0x28   : > { %205 = vst [vmem:[%s166_s9 + $0x8] sm:$0xff] (%p1341_p3), %v204_v1 }
  0x2a PF: > { %211 = sbr.rel (!%p1355_p7) target bundleno = 65 (0x41), region = 58  ;;  %s213_s30 = sand.u32 (%p1355_p7), 1, %s1213_s16  }
  0x2b   : > { %s901_s26 = sshll.u32 (%p1355_p7), %s1237_s22, 1  ;;  %s899_s5 = sshll.u32 (%p1355_p7), %s213_s30, 8 }
  0x2c   : > { %s953_s29 = sshll.u32 (%p1355_p7), %s1233_s21, 7  ;;  %s1399_s7 = scalar_lea.vmem (%p1355_p7), [#allocation4], %s899_s5 }
  0x2d   : > { %s219_s18 = sadd.s32 (%p1355_p7), %s953_s29, %s901_s26 }
  0x2e   : > { %s903_s11 = sshll.u32 (%p1355_p7), %s219_s18, 2 }
  0x2f   : > { %s1394_s6 = scalar_lea.vmem (%p1355_p7), %s1604_s1, %s903_s11 }
  0x30   : > { %v311_v2 = vld [vmem:[%s1394_s6] sm:$0xff] (%p1355_p7)  ;;  %v313_v3 = vld [vmem:[%s1394_s6 + $0x10] sm:$0xff] (%p1355_p7) }
  0x31   : > { %v315_v4 = vld [vmem:[%s1394_s6 + $0x20] sm:$0xff]  ;;  %312 = vst [vmem:[%s1399_s7] sm:$0xff] %v311_v2  ;;  %314 = vst [vmem:[%s1399_s7 + $0x8] sm:$0xff] %v313_v3  ;;  %v317_v5 = vld [vmem:[%s1394_s6 + $0x30] sm:$0xff] }
  0x32   : > { %316 = vst [vmem:[%s1399_s7 + $0x10] sm:$0xff] %v315_v4  ;;  %v319_v6 = vld [vmem:[%s1394_s6 + $0x40] sm:$0xff]  ;;  %v321_v7 = vld [vmem:[%s1394_s6 + $0x50] sm:$0xff]  ;;  %318 = vst [vmem:[%s1399_s7 + $0x18] sm:$0xff] %v317_v5 }
  0x33   : > { %320 = vst [vmem:[%s1399_s7 + $0x20] sm:$0xff] %v319_v6  ;;  %322 = vst [vmem:[%s1399_s7 + $0x28] sm:$0xff] %v321_v7  ;;  %v323_v8 = vld [vmem:[%s1394_s6 + $0x60] sm:$0xff]  ;;  %v325_v9 = vld [vmem:[%s1394_s6 + $0x70] sm:$0xff] }
  0x34   : > { %v327_v10 = vld [vmem:[%s1394_s6 + $0x80] sm:$0xff]  ;;  %324 = vst [vmem:[%s1399_s7 + $0x30] sm:$0xff] %v323_v8  ;;  %326 = vst [vmem:[%s1399_s7 + $0x38] sm:$0xff] %v325_v9  ;;  %v329_v11 = vld [vmem:[%s1394_s6 + $0x90] sm:$0xff] }
  0x35   : > { %328 = vst [vmem:[%s1399_s7 + $0x40] sm:$0xff] %v327_v10  ;;  %v331_v12 = vld [vmem:[%s1394_s6 + $0xa0] sm:$0xff]  ;;  %v333_v13 = vld [vmem:[%s1394_s6 + $0xb0] sm:$0xff]  ;;  %330 = vst [vmem:[%s1399_s7 + $0x48] sm:$0xff] %v329_v11 }
  0x36   : > { %332 = vst [vmem:[%s1399_s7 + $0x50] sm:$0xff] %v331_v12  ;;  %334 = vst [vmem:[%s1399_s7 + $0x58] sm:$0xff] %v333_v13  ;;  %v335_v14 = vld [vmem:[%s1394_s6 + $0xc0] sm:$0xff]  ;;  %v337_v15 = vld [vmem:[%s1394_s6 + $0xd0] sm:$0xff] }
  0x37   : > { %v339_v16 = vld [vmem:[%s1394_s6 + $0xe0] sm:$0xff]  ;;  %336 = vst [vmem:[%s1399_s7 + $0x60] sm:$0xff] %v335_v14  ;;  %338 = vst [vmem:[%s1399_s7 + $0x68] sm:$0xff] %v337_v15  ;;  %v341_v17 = vld [vmem:[%s1394_s6 + $0xf0] sm:$0xff] }
  0x38   : > { %340 = vst [vmem:[%s1399_s7 + $0x70] sm:$0xff] %v339_v16  ;;  %v343_v18 = vld [vmem:[%s1394_s6 + $0x100] sm:$0xff]  ;;  %v345_v19 = vld [vmem:[%s1394_s6 + $0x110] sm:$0xff]  ;;  %342 = vst [vmem:[%s1399_s7 + $0x78] sm:$0xff] %v341_v17 }
  0x39   : > { %344 = vst [vmem:[%s1399_s7 + $0x80] sm:$0xff] %v343_v18  ;;  %346 = vst [vmem:[%s1399_s7 + $0x88] sm:$0xff] %v345_v19  ;;  %v347_v20 = vld [vmem:[%s1394_s6 + $0x120] sm:$0xff]  ;;  %v349_v21 = vld [vmem:[%s1394_s6 + $0x130] sm:$0xff] }
  0x3a   : > { %v351_v22 = vld [vmem:[%s1394_s6 + $0x140] sm:$0xff]  ;;  %348 = vst [vmem:[%s1399_s7 + $0x90] sm:$0xff] %v347_v20  ;;  %350 = vst [vmem:[%s1399_s7 + $0x98] sm:$0xff] %v349_v21  ;;  %v353_v23 = vld [vmem:[%s1394_s6 + $0x150] sm:$0xff] }
  0x3b   : > { %352 = vst [vmem:[%s1399_s7 + $0xa0] sm:$0xff] %v351_v22  ;;  %v355_v24 = vld [vmem:[%s1394_s6 + $0x160] sm:$0xff]  ;;  %v357_v25 = vld [vmem:[%s1394_s6 + $0x170] sm:$0xff]  ;;  %354 = vst [vmem:[%s1399_s7 + $0xa8] sm:$0xff] %v353_v23 }
  0x3c   : > { %356 = vst [vmem:[%s1399_s7 + $0xb0] sm:$0xff] %v355_v24  ;;  %358 = vst [vmem:[%s1399_s7 + $0xb8] sm:$0xff] %v357_v25  ;;  %v359_v26 = vld [vmem:[%s1394_s6 + $0x180] sm:$0xff]  ;;  %v361_v27 = vld [vmem:[%s1394_s6 + $0x190] sm:$0xff] }
  0x3d   : > { %v363_v28 = vld [vmem:[%s1394_s6 + $0x1a0] sm:$0xff]  ;;  %360 = vst [vmem:[%s1399_s7 + $0xc0] sm:$0xff] %v359_v26  ;;  %362 = vst [vmem:[%s1399_s7 + $0xc8] sm:$0xff] %v361_v27  ;;  %v365_v29 = vld [vmem:[%s1394_s6 + $0x1b0] sm:$0xff] }
  0x3e   : > { %364 = vst [vmem:[%s1399_s7 + $0xd0] sm:$0xff] %v363_v28  ;;  %v367_v30 = vld [vmem:[%s1394_s6 + $0x1c0] sm:$0xff]  ;;  %v369_v31 = vld [vmem:[%s1394_s6 + $0x1d0] sm:$0xff]  ;;  %366 = vst [vmem:[%s1399_s7 + $0xd8] sm:$0xff] %v365_v29 }
  0x3f   : > { %368 = vst [vmem:[%s1399_s7 + $0xe0] sm:$0xff] %v367_v30  ;;  %370 = vst [vmem:[%s1399_s7 + $0xe8] sm:$0xff] %v369_v31  ;;  %v371_v32 = vld [vmem:[%s1394_s6 + $0x1e0] sm:$0xff]  ;;  %v373_v33 = vld [vmem:[%s1394_s6 + $0x1f0] sm:$0xff] }
  0x40   : > { %372 = vst [vmem:[%s1399_s7 + $0xf0] sm:$0xff] %v371_v32  ;;  %374 = vst [vmem:[%s1399_s7 + $0xf8] sm:$0xff] %v373_v33 }
  0x41 PF: > { %p904_p3 = scmp.ge.s32.totalorder %s1241_s23, 1  ;;  %p387_p4 = scmp.lt.s32.totalorder %s1241_s23, 9 }
  0x43   : > { %p388_p5 = pnand %p904_p3, %p387_p4 }
  0x44   : > { %s394_s18 = sand.u32 (!%p388_p5), 1, %s1217_s17   ;;  %s401_s26 = sand.u32 (!%p388_p5), 1, %s1209_s15  }
  0x45   : > { %391 = sbr.rel (%p388_p5) target bundleno = 404 (0x194), region = 100  ;;  %s1466_s5 = sshll.u32 (!%p388_p5), %s394_s18, 4 }
  0x46   : > { %s906_s11 = sshll.u32 (!%p388_p5), %s401_s26, 8  ;;  %s429_s4 = sand.u32 (!%p388_p5), 1, %s1201_s13  }
  0x47   : > { %s908_s8 = sshll.u32 (!%p388_p5), %s1229_s20, 1  ;;  %s907_s9 = sshll.u32 (!%p388_p5), %s429_s4, 4 }
  0x48   : > { %p437_p6 = scmp.lt.s32.totalorder (!%p388_p5), %s908_s8, 3  ;;  %s396_s24 = scalar_lea.vmem (!%p388_p5), [#allocation3], %s1466_s5 }
  0x49   : > { %s1479_s6 = scalar_lea.vmem (!%p388_p5), [#allocation4], %s906_s11  ;;  %s1481_s15 = scalar_lea.vmem (!%p388_p5), [#allocation5], %s907_s9 }
  0x4a   : > { %p909_p7 = scmp.ne.s32.totalorder (!%p388_p5), %s1225_s19, 0 }
  0x4c   : > { %s1640_s8 = smov (!%p437_p6, %s908_s8), 3  ;;  %446 = sbr.rel (%p909_p7) target bundleno = 83 (0x53), region = 112 }
  0x4d   : > { %s439_s25 = scalar_lea.vmem %s1605_s2, %s1640_s8  ;;  %v1243_v34 = vmov (!%p909_p7), 0.0  }
  0x4e   : > { %447 = vst [vmem:[#allocation2] sm:$0xff] (!%p909_p7), %v1243_v34  ;;  %448 = vst [vmem:[#allocation2 + $0x8] sm:$0xff] (!%p909_p7), %v1243_v34 }
  0x4f   : > { %449 = vst [vmem:[#allocation2 + $0x10] sm:$0xff] (!%p909_p7), %v1243_v34  ;;  %450 = vst [vmem:[#allocation2 + $0x18] sm:$0xff] (!%p909_p7), %v1243_v34 }
  0x53 PF: > { %v1064_v35 = vld [vmem:[%s1479_s6 + $0x4] ss:$8 sps:$4 sm:$0xff]   ;;  %v1066_v36 = vld [vmem:[%s1479_s6] ss:$8 sps:$4 sm:$0xff]   ;;  %v1067_v37 = vld [vmem:[%s1479_s6 + $0x14] ss:$8 sps:$4 sm:$0xff]  }
  0x54   : > { %659 = vmatprep.subr.bf16.mxu0 %v1064_v35  ;;  %v1069_v38 = vld [vmem:[%s1479_s6 + $0x10] ss:$8 sps:$4 sm:$0xff]   ;;  %v1070_v39 = vld [vmem:[%s1479_s6 + $0x24] ss:$8 sps:$4 sm:$0xff]   ;;  %v1072_v40 = vld [vmem:[%s1479_s6 + $0x20] ss:$8 sps:$4 sm:$0xff]  }
  0x55   : > { %660 = vmatpush1.bf16.msra.mxu0 %v1066_v36  ;;  %v1073_v41 = vld [vmem:[%s1479_s6 + $0x34] ss:$8 sps:$4 sm:$0xff]   ;;  %v1075_v42 = vld [vmem:[%s1479_s6 + $0x30] ss:$8 sps:$4 sm:$0xff]   ;;  %v1076_v43 = vld [vmem:[%s1479_s6 + $0x44] ss:$8 sps:$4 sm:$0xff]  }
  0x56   : > { %661 = vmatprep.subr.bf16.mxu0 %v1067_v37  ;;  %v1078_v44 = vld [vmem:[%s1479_s6 + $0x40] ss:$8 sps:$4 sm:$0xff]   ;;  %v1079_v45 = vld [vmem:[%s1479_s6 + $0x54] ss:$8 sps:$4 sm:$0xff]   ;;  %v1081_v46 = vld [vmem:[%s1479_s6 + $0x50] ss:$8 sps:$4 sm:$0xff]  }
  0x57   : > { %v1082_v47 = vld [vmem:[%s1479_s6 + $0x64] ss:$8 sps:$4 sm:$0xff]   ;;  %v1084_v49 = vld [vmem:[%s1479_s6 + $0x60] ss:$8 sps:$4 sm:$0xff]   ;;  %v1085_v50 = vld [vmem:[%s1479_s6 + $0x74] ss:$8 sps:$4 sm:$0xff]  }
  0x58   : > { %v1114_v48 = vld [vmem:[%s396_s24 + $0x4] ss:$8 sps:$4 sm:$0xff]   ;;  %v1087_v51 = vld [vmem:[%s1479_s6 + $0x70] ss:$8 sps:$4 sm:$0xff]   ;;  %v1090_v53 = vld [vmem:[%s1479_s6 + $0x80] ss:$8 sps:$4 sm:$0xff]  }
  0x59   : > { %662 = vmatpush1.bf16.msra.mxu0 %v1069_v38  ;;  %691 = vmatprep.mubr.bf16.mxu0 %v1114_v48  ;;  %v1088_v52 = vld [vmem:[%s1479_s6 + $0x84] ss:$8 sps:$4 sm:$0xff]   ;;  %v1091_v54 = vld [vmem:[%s1479_s6 + $0x94] ss:$8 sps:$4 sm:$0xff]   ;;  %v1093_v55 = vld [vmem:[%s1479_s6 + $0x90] ss:$8 sps:$4 sm:$0xff]  }
  0x5a   : > { %663 = vmatprep.subr.bf16.mxu0 %v1070_v39  ;;  %v1094_v56 = vld [vmem:[%s1479_s6 + $0xa4] ss:$8 sps:$4 sm:$0xff]   ;;  %v1096_v57 = vld [vmem:[%s1479_s6 + $0xa0] ss:$8 sps:$4 sm:$0xff]   ;;  %v1097_v58 = vld [vmem:[%s1479_s6 + $0xb4] ss:$8 sps:$4 sm:$0xff]  }
  0x5b   : > { %v1099_v59 = vld [vmem:[%s1479_s6 + $0xb0] ss:$8 sps:$4 sm:$0xff]   ;;  %v1100_v60 = vld [vmem:[%s1479_s6 + $0xc4] ss:$8 sps:$4 sm:$0xff]   ;;  %v1102_v61 = vld [vmem:[%s1479_s6 + $0xc0] ss:$8 sps:$4 sm:$0xff]  }
  0x5c   : > { %v1103_v62 = vld [vmem:[%s1479_s6 + $0xd4] ss:$8 sps:$4 sm:$0xff]   ;;  %v1105_v63 = vld [vmem:[%s1479_s6 + $0xd0] ss:$8 sps:$4 sm:$0xff]   ;;  %v1106_v0 = vld [vmem:[%s1479_s6 + $0xe4] ss:$8 sps:$4 sm:$0xff]  }
  0x5d   : > { %664 = vmatpush1.bf16.msra.mxu0 %v1072_v40  ;;  %v1108_v1 = vld [vmem:[%s1479_s6 + $0xe0] ss:$8 sps:$4 sm:$0xff]   ;;  %v1109_v2 = vld [vmem:[%s1479_s6 + $0xf4] ss:$8 sps:$4 sm:$0xff]   ;;  %v1111_v3 = vld [vmem:[%s1479_s6 + $0xf0] ss:$8 sps:$4 sm:$0xff]  }
  0x5e   : > { %665 = vmatprep.subr.bf16.mxu0 %v1073_v41  ;;  %v1112_v4 = vld [vmem:[%s396_s24] ss:$8 sps:$4 sm:$0xff]   ;;  %p944_p8 = scmp.ne.s32.totalorder %s1225_s19, 3 }
  0x5f   : > { %v451_v5 = vld [vmem:[#allocation2] sm:$0xff]  ;;  %v452_v6 = vld [vmem:[#allocation2 + $0x8] sm:$0xff]  ;;  %v453_v8 = vld [vmem:[#allocation2 + $0x10] sm:$0xff]  ;;  %v721_v18 = vlaneseq (!%p944_p8) }
  0x60   : > { %v454_v11 = vld [vmem:[#allocation2 + $0x18] sm:$0xff]  ;;  %v718_v17 = vld [vmem:[%s439_s25] sm:$0x3] (!%p944_p8) }
  0x61   : > { %666 = vmatpush1.bf16.msra.mxu0 %v1075_v42  ;;  %v719_v19 = vunpack.c.l.bf16 (!%p944_p8), %v718_v17  ;;  %v722_v20 = vshrl.u32 (!%p944_p8), %v721_v18, 7 }
  0x62   : > { %667 = vmatprep.subr.bf16.mxu0 %v1076_v43 }
  0x63   : > { %v723_v21 = vsub.s32 (!%p944_p8), 0, %v722_v20  ;;  %v727_v22 = vsub.s32 (!%p944_p8), 2, %v722_v20 }
  0x65   : > { %668 = vmatpush1.bf16.msra.mxu0 %v1078_v44  ;;  %v724_v24 = vrot.slane (!%p944_p8), %v719_v19, %v723_v21  ;;  %v728_v25 = vrot.slane (!%p944_p8), %v719_v19, %v727_v22 }
  0x66   : > { %669 = vmatprep.subr.bf16.mxu0 %v1079_v45 }
  0x67   : > { %v734_v29 = vrot.slane (!%p944_p8), %v724_v24, %v723_v21  ;;  %v738_v30 = vrot.slane (!%p944_p8), %v728_v25, %v723_v21 }
  0x69   : > { %670 = vmatpush1.bf16.msra.mxu0 %v1081_v46 }
  0x6a   : > { %671 = vmatprep.subr.bf16.mxu0 %v1082_v47 }
  0x6d   : > { %672 = vmatpush1.bf16.msra.mxu0 %v1084_v49 }
  0x6e   : > { %673 = vmatprep.subr.bf16.mxu0 %v1085_v50 }
  0x71   : > { %674 = vmatpush1.bf16.msra.mxu0 %v1087_v51 }
  0x72   : > { %675 = vmatprep.subr.bf16.mxu0 %v1088_v52 }
  0x75   : > { %676 = vmatpush1.bf16.msra.mxu0 %v1090_v53 }
  0x76   : > { %677 = vmatprep.subr.bf16.mxu0 %v1091_v54 }
  0x79   : > { %678 = vmatpush1.bf16.msra.mxu0 %v1093_v55 }
  0x7a   : > { %679 = vmatprep.subr.bf16.mxu0 %v1094_v56 }
  0x7d   : > { %680 = vmatpush1.bf16.msra.mxu0 %v1096_v57 }
  0x7e   : > { %681 = vmatprep.subr.bf16.mxu0 %v1097_v58 }
  0x81   : > { %682 = vmatpush1.bf16.msra.mxu0 %v1099_v59 }
  0x82   : > { %683 = vmatprep.subr.bf16.mxu0 %v1100_v60 }
  0x85   : > { %684 = vmatpush1.bf16.msra.mxu0 %v1102_v61 }
  0x86   : > { %685 = vmatprep.subr.bf16.mxu0 %v1103_v62 }
  0x89   : > { %686 = vmatpush1.bf16.msra.mxu0 %v1105_v63 }
  0x8a   : > { %687 = vmatprep.subr.bf16.mxu0 %v1106_v0 }
  0x8d   : > { %688 = vmatpush1.bf16.msra.mxu0 %v1108_v1 }
  0x8e   : > { %689 = vmatprep.subr.bf16.mxu0 %v1109_v2 }
  0x91   : > { %690 = vmatpush1.bf16.msra.mxu0 %v1111_v3 }
  0x94   : > { %692 = vmatmul.mubr.bf16.vlgmr.msra.gmra.mrb[0].mxu0 %v1112_v4 }
 0x167   : > { %v693_v7 = vpop.f32.mrb[0].mxu0  ;;  %713 = sbr.rel (%p944_p8) target bundleno = 378 (0x17a), region = 116 }
 0x168   : > { %v702_v9 = vadd.f32 %v693_v7, %v451_v5  ;;  %v695_v10 = vpop.f32.mrb[1].mxu0 }
 0x169   : > { %v703_v12 = vadd.f32 %v695_v10, %v452_v6  ;;  %v697_v13 = vpop.f32.mrb[2].mxu0 }
 0x16a   : > { %706 = vst [vmem:[#allocation2] sm:$0xff] %v702_v9  ;;  %v704_v14 = vadd.f32 %v697_v13, %v453_v8  ;;  %v699_v15 = vpop.f32.mrb[3].mxu0 }
 0x16b   : > { %707 = vst [vmem:[#allocation2 + $0x8] sm:$0xff] %v703_v12  ;;  %v705_v16 = vadd.f32 %v699_v15, %v454_v11 }
 0x16c   : > { %708 = vst [vmem:[#allocation2 + $0x10] sm:$0xff] %v704_v14 }
 0x16d   : > { %709 = vst [vmem:[#allocation2 + $0x18] sm:$0xff] %v705_v16 }
 0x171   : > { %v714_v23 = vld [vmem:[#allocation2] sm:$0xff] }
 0x172   : > { %v715_v26 = vld [vmem:[#allocation2 + $0x8] sm:$0xff]  ;;  %v739_v31 = vadd.f32 %v734_v29, %v714_v23 }
 0x173   : > { %v716_v27 = vld [vmem:[#allocation2 + $0x10] sm:$0xff]  ;;  %v740_v32 = vadd.f32 %v738_v30, %v715_v26 }
 0x174   : > { %v717_v28 = vld [vmem:[#allocation2 + $0x18] sm:$0xff]  ;;  %v741_v33 = vadd.f32 %v734_v29, %v716_v27 }
 0x175   : > { %v742_v34 = vadd.f32 %v738_v30, %v717_v28  ;;  %v954_v35 = vpack.c.bf16 %v740_v32, %v739_v31 }
 0x177   : > { %v955_v36 = vpack.c.bf16 %v742_v34, %v741_v33  ;;  %755 = vst [vmem:[%s1481_s15] sm:$0xff] %v954_v35 }
 0x179   : > { %756 = vst [vmem:[%s1481_s15 + $0x8] sm:$0xff] %v955_v36 }
 0x17a PF: > { %s956_s19 = sshll.u32 %s1229_s20, 7  ;;  %s774_s11 = sshll.u32 %s1481_s15, 4  ;;  %s1535_s11 = int_to_ptr.vmem [resolvable:$true] %s774_s11 }
 0x17b   : > { %s1532_s5 = scalar_lea.hbm %s1606_s3, %s956_s19  ;;  %s1539_s8 = scalar_lea.sflag [#allocation6], %s429_s4 }
 0x17c   : > { %s1115_s9 = scalar_lea.vmem %s1535_s11, 256  ;;  %s1244_s20 = smov [#allocation5]  }
 0x17d   : > { %p1116_p9 = scmp.ne.s32.totalorder %s1535_s11, %s1115_s9  ;;  %s1119_s30 = sshll.u32 %s1244_s20, 4  ;;  %s1120_s30 = int_to_ptr.vmem [resolvable:$false] %s1119_s30 }
 0x17e   : > { %s1121_s29 = scalar_lea.vmem %s1120_s30, 512  ;;  %p1122_p12 = scmp.lt.s32.totalorder %s1535_s11, %s1120_s30 }
 0x17f   : > { %p1117_p10 = pnand %p1116_p9, %p1370_p0  ;;  %p1123_p13 = scmp.lt.s32.totalorder %s1121_s29, %s1115_s9 }
 0x181   : > { %p1118_p11 = pneg %p1117_p10  ;;  %p1124_p2 = por %p1123_p13, %p1122_p12 }
 0x183   : > { %p1125_p3 = pnand %p1124_p2, %p1118_p11 }
 0x185   : > { %1128 = shalt.err (!%p1125_p3)
}
 0x186   : > { %s1129_s4 = scalar_lea.hbm %s1532_s5, 256  ;;  %s1133_s6 = scalar_lea.hbm %s1606_s3, 512 }
 0x187   : > { %p1130_p4 = scmp.ne.s32.totalorder %s1532_s5, %s1129_s4  ;;  %p1134_p7 = scmp.lt.u32.totalorder %s1532_s5, %s1606_s3 }
 0x188   : > { %p1135_p8 = scmp.lt.u32.totalorder %s1133_s6, %s1129_s4  ;;  %p1137_p10 = scmp.lt.u32.totalorder %s1129_s4, %s1532_s5 }
 0x189   : > { %p1131_p5 = pnand %p1130_p4, %p1370_p0 }
 0x18a   : > { %p1136_p9 = por %p1135_p8, %p1134_p7 }
 0x18b   : > { %p1132_p6 = pneg %p1131_p5 }
 0x18c   : > { %p1138_p11 = por %p1137_p10, %p1136_p9 }
 0x18e   : > { %p1139_p12 = pnand %p1138_p11, %p1132_p6 }
 0x190   : > { %1142 = shalt.err (!%p1139_p12)
}
 0x191   : > { %s1245_s7 = smov 128   ;;  %s1246_s19 = smov 256  }
 0x192   : > { %s1247_s18 = smov 8  }
 0x193   : > { %957 = dma.vmem_to_hbm [thread:$0]  (%p1370_p0), %s1535_s11, 256, %s1532_s5, %s1539_s8, %s1245_s7, %s1246_s19, %s1247_s18  }
 0x194 PF: > { %p963_p13 = scmp.ge.s32.totalorder %s1241_s23, 2  ;;  %s789_s26 = sand.u32 1, %s1197_s12  }
 0x195   : > { %s790_s9 = scalar_lea.sflag [#allocation6], %s789_s26 }
 0x196   : > { %p960_p2 = pnand %p963_p13, %p1374_p1 }
 0x198   : > { %1192 = dma.done.wait (!%p960_p2), %s790_s9, 256  }
 0x199   : > { %1194 = vsyncadd (!%p960_p2), %s790_s9, 4294967040  ;;  %s16_s23 = sadd.s32 1, %s1241_s23   ;;  %s1619_s28 = sld [smem:[#allocation12_spill]] }
 0x19a   : > { %p13_p3 = scmp.ge.s32.totalorder %s16_s23, 10   ;;  %s1620_s17 = sld [smem:[#allocation8_spill]] }
 0x19b   : > { %s1621_s18 = sld [smem:[#allocation11_spill]]  ;;  %s1622_s5 = sld [smem:[#allocation9_spill]] }
 0x19c   : > { %s1623_s11 = sld [smem:[#allocation10_spill]]  ;;  %s1624_s12 = smov %s1201_s13 }
 0x19d   : > { %s1625_s13 = smov %s1205_s14  ;;  %s1626_s14 = smov %s1361_s10 }
 0x19e   : > { %s1627_s15 = smov %s1213_s16  ;;  %s1629_s19 = smov %s1233_s21 }
 0x19f   : > { %s1628_s16 = smov %s1619_s28  ;;  %s1630_s20 = smov %s1237_s22 }
 0x1a0   :  { %15 = sbr.rel (!%p13_p3) target bundleno = 7 (0x7), region = 167 }
 0x1a1   : > { %s1631_s21 = smov %s1622_s5 }
 0x1a2   : > { %s1632_s22 = smov %s1623_s11 }
 0x1a7   :  { %795 = vsyncpa [#allocation6], 1 }
 0x1a8   :  { %797 = vsyncpa [#allocation6 + $0x1], 1 }

</bundles_post_ra>
